<compile_context>
chip_gen: v6e
topology: v6e:2x2x1
jax: 0.10.0
libtpu: 0.0.40
codegen_flags: <defaults>
</compile_context>

<pallas_src>
import functools

import jax
import jax.numpy as jnp
from jax.experimental import pallas as pl
from jax.experimental.pallas import tpu as pltpu


_CONV_CHANNELS = [(3, 32), (32, 32), (32, 64), (64, 64), (64, 64)]
_CIN0 = 8   # first conv's input channels zero-padded 3 -> 8 (not 32)


def _shift_lanes(x, s):
    """piece[..., p] = x[..., p + s] when 0 <= p + s < N, else 0 (static s).

    Implemented as two static lane slices + a lane concat (lowers to lane
    rotates / relayouts on the XLU; equivalent to a zero-filled pltpu.roll).
    """
    if s == 0:
        return x
    n = x.shape[-1]
    zeros = jnp.zeros(x.shape[:-1] + (abs(s),), x.dtype)
    if s > 0:
        return jnp.concatenate([x[..., s:], zeros], axis=-1)
    return jnp.concatenate([zeros, x[..., :n + s]], axis=-1)


# ---------------------------------------------------------------------------
# Fused kernel: all 5 convs + pool + MLP head for `imgs` images per grid step.
# ---------------------------------------------------------------------------
def _fused_pigaze_kernel(x_ref,
                         cw0, cb0, cw1, cb1, cw2, cb2, cw3, cb3, cw4, cb4,
                         hw1, hb1, hw2, hb2,
                         o_ref, *, H, W, imgs):
    HW = H * W
    HWs = imgs * HW
    conv_ws = (cw0, cw1, cw2, cw3, cw4)
    conv_bs = (cb0, cb1, cb2, cb3, cb4)

    # Lane-position bookkeeping.  Masks are bf16 so mask-multiplies stay in
    # the activation dtype (0/1 * bf16 is exact).
    pos = jax.lax.broadcasted_iota(jnp.int32, (1, HWs), 1)
    col = pos % W
    # Column pre-masks on the *source* slab: a w==0 output for a dw=-1 tap
    # would otherwise read source column W-1 (and vice versa for dw=+1).
    not_last_col = (col != W - 1).astype(jnp.bfloat16)    # for dw = -1 taps
    not_first_col = (col != 0).astype(jnp.bfloat16)       # for dw = +1 taps
    if imgs > 1:
        # Row masks are only needed to stop adjacent packed images from
        # bleeding into each other; zero-fill shifts already cover the
        # top/bottom boundary of the packed slab itself.
        q = pos % HW
        not_top = (q >= W).astype(jnp.bfloat16)            # for dh = -1 taps
        not_bot = (q < HW - W).astype(jnp.bfloat16)        # for dh = +1 taps

    act = x_ref[0]                                         # (cin, HWs), bf16

    for w_ref, b_ref in zip(conv_ws, conv_bs):
        cout = b_ref.shape[0]
        # Two pre-masked source slabs, each reused by all three kh taps.
        src = {-1: act * not_last_col, 0: act, 1: act * not_first_col}
        acc = jnp.zeros((cout, HWs), jnp.float32)
        for kh in range(3):
            for kw in range(3):
                dh, dw = kh - 1, kw - 1
                piece = _shift_lanes(src[dw], dh * W + dw)  # (cin, HWs) bf16
                if imgs > 1 and dh != 0:
                    piece = piece * (not_top if dh == -1 else not_bot)
                acc = acc + jnp.dot(w_ref[kh * 3 + kw], piece,
                                    preferred_element_type=jnp.float32)
        acc = acc + b_ref[...]                              # (cout, 1) broadcast
        act = (acc * jax.nn.sigmoid(acc)).astype(jnp.bfloat16)   # SiLU -> bf16

    # Head: adaptive avg-pool(1,1) + Linear(64,32) + ReLU + Linear(32,8).
    # TODO(synk): Dropout(0.2) is an eval-mode identity here (no RNG masking).
    cols = []
    for b in range(imgs):
        sl = act[:, b * HW:(b + 1) * HW].astype(jnp.float32)
        cols.append(jnp.sum(sl, axis=-1, keepdims=True) * (1.0 / HW))
    pooled = cols[0] if imgs == 1 else jnp.concatenate(cols, axis=-1)  # (64, imgs)
    h = jnp.dot(hw1[...], pooled, preferred_element_type=jnp.float32) + hb1[...]
    h = jnp.maximum(h, 0.0)
    out = jnp.dot(hw2[...], h, preferred_element_type=jnp.float32) + hb2[...]
    o_ref[0] = out.astype(o_ref.dtype)                      # (8, imgs)


# ---------------------------------------------------------------------------
# One-time parameter prep (hoisted out of the per-call jit path).
# ---------------------------------------------------------------------------
def prep_params(params):
    """Convert PyTorch-layout params into kernel operands (do this ONCE).

    Conv weights (Cout, Cin, 3, 3) -> tap-major (9, Cout, Cin) bf16
    (tap = kh*3 + kw), layer 0's Cin zero-padded 3 -> _CIN0.  Biases become
    f32 column vectors; head weights stay in PyTorch (out, in) layout so the
    kernel applies them directly to column-vector activations.
    """
    conv_ws, conv_bs = [], []
    for li, (w, b) in enumerate(params["convs"]):
        cout, cin = w.shape[0], w.shape[1]
        if li == 0:
            w = jnp.pad(w, ((0, 0), (0, _CIN0 - cin), (0, 0), (0, 0)))
            cin = _CIN0
        w_taps = jnp.transpose(w, (2, 3, 0, 1)).reshape(9, cout, cin)
        conv_ws.append(w_taps.astype(jnp.bfloat16))
        conv_bs.append(b.reshape(cout, 1).astype(jnp.float32))
    head = (params["w1"].astype(jnp.float32),
            params["b1"].reshape(-1, 1).astype(jnp.float32),
            params["w2"].astype(jnp.float32),
            params["b2"].reshape(-1, 1).astype(jnp.float32))
    return tuple(conv_ws), tuple(conv_bs), head


# ---------------------------------------------------------------------------
# Forward wrapper.
# ---------------------------------------------------------------------------
@jax.jit
def pigaze_forward(x_nchw, prepped):
    conv_ws, conv_bs, (hw1, hb1, hw2, hb2) = prepped
    B, C, H, W = x_nchw.shape
    HW = H * W
    out_dim = hw2.shape[0]

    # Batch packing: keep the grid length 2 when possible (both v7x TCs get
    # work) while folding the remaining batch into the lane / matmul-N dim
    # (amortizes per-step overhead on single-TC v5e/v6e).
    imgs = B // 2 if (B >= 2 and B % 2 == 0) else 1
    n_steps = B // imgs

    x = jnp.pad(x_nchw.astype(jnp.bfloat16),
                ((0, 0), (0, _CIN0 - C), (0, 0), (0, 0)))
    # (B, C0, H, W) -> (n_steps, C0, imgs*HW): images packed along lanes.
    x = (x.reshape(n_steps, imgs, _CIN0, HW)
           .transpose(0, 2, 1, 3)
           .reshape(n_steps, _CIN0, imgs * HW))

    operands = [x]
    in_specs = [pl.BlockSpec((1, _CIN0, imgs * HW), lambda s: (s, 0, 0))]
    for w_taps, b_col in zip(conv_ws, conv_bs):
        operands += [w_taps, b_col]
        in_specs += [pl.BlockSpec(w_taps.shape, lambda s: (0, 0, 0)),
                     pl.BlockSpec(b_col.shape, lambda s: (0, 0))]
    for t in (hw1, hb1, hw2, hb2):
        operands.append(t)
        in_specs.append(pl.BlockSpec(t.shape, lambda s: (0, 0)))

    out = pl.pallas_call(
        functools.partial(_fused_pigaze_kernel, H=H, W=W, imgs=imgs),
        out_shape=jax.ShapeDtypeStruct((n_steps, out_dim, imgs), jnp.float32),
        grid_spec=pltpu.PrefetchScalarGridSpec(
            num_scalar_prefetch=0,
            grid=(n_steps,),
            in_specs=in_specs,
            out_specs=pl.BlockSpec((1, out_dim, imgs), lambda s: (s, 0, 0)),
        ),
        compiler_params=pltpu.CompilerParams(
            dimension_semantics=("parallel",)),
    )(*operands)
    return out.transpose(0, 2, 1).reshape(B, out_dim)        # (B, 8)


# ---------------------------------------------------------------------------
# Synthetic parameter init (PyTorch layouts) and pure-JAX reference.
# ---------------------------------------------------------------------------
def init_params(key):
    params = {"convs": []}
    keys = jax.random.split(key, len(_CONV_CHANNELS) + 2)
    for i, (cin, cout) in enumerate(_CONV_CHANNELS):
        w = (jax.random.normal(keys[i], (cout, cin, 3, 3), jnp.float32)
             / jnp.sqrt(9.0 * cin))
        b = jnp.zeros((cout,), jnp.float32)
        params["convs"].append((w, b))
    params["w1"] = jax.random.normal(keys[-2], (32, 64), jnp.float32) / jnp.sqrt(64.0)
    params["b1"] = jnp.zeros((32,), jnp.float32)
    params["w2"] = jax.random.normal(keys[-1], (8, 32), jnp.float32) / jnp.sqrt(32.0)
    params["b2"] = jnp.zeros((8,), jnp.float32)
    return params


def _reference_forward(x_nchw, params):
    # Conv operands rounded to bf16 (f32 accumulate) to mirror kernel precision.
    x = x_nchw
    for w, b in params["convs"]:
        y = jax.lax.conv_general_dilated(
            x.astype(jnp.bfloat16), w.astype(jnp.bfloat16),
            window_strides=(1, 1), padding="SAME",
            dimension_numbers=("NCHW", "OIHW", "NCHW"),
            preferred_element_type=jnp.float32)
        y = y + b[None, :, None, None]
        x = y * jax.nn.sigmoid(y)
    pooled = jnp.mean(x, axis=(2, 3))                          # (B, 64)
    h = jnp.maximum(pooled @ params["w1"].T + params["b1"], 0.0)
    return h @ params["w2"].T + params["b2"]


if __name__ == "__main__":
    key = jax.random.PRNGKey(0)
    kx, kp = jax.random.split(key)

    # NCHW input, PyTorch convention: batch=2, 3 channels, 16x16 spatial.
    x = jax.random.normal(kx, (2, 3, 16, 16), jnp.float32)
    params = init_params(kp)
    prepped = prep_params(params)          # one-time weight prep (hoisted)

    out = pigaze_forward(x, prepped)
    jax.block_until_ready(out)
    assert out.shape == (2, 8), out.shape

    ref = _reference_forward(x, params)
    max_err = float(jnp.max(jnp.abs(out - ref)))
    assert bool(jnp.allclose(out, ref, rtol=5e-2, atol=2e-2)), (
        f"mismatch vs reference, max abs err = {max_err}")
    print("KERNEL_OK")
</pallas_src>

<mosaic_0001>
module attributes {stable_mosaic.version = 11 : i64} {
  func.func @_fused_pigaze_kernel(%arg0: i32, %arg1: memref<1x8x256xbf16, #tpu.memory_space<vmem>>, %arg2: memref<9x32x8xbf16, #tpu.memory_space<vmem>>, %arg3: memref<32x1xf32, #tpu.memory_space<vmem>>, %arg4: memref<9x32x32xbf16, #tpu.memory_space<vmem>>, %arg5: memref<32x1xf32, #tpu.memory_space<vmem>>, %arg6: memref<9x64x32xbf16, #tpu.memory_space<vmem>>, %arg7: memref<64x1xf32, #tpu.memory_space<vmem>>, %arg8: memref<9x64x64xbf16, #tpu.memory_space<vmem>>, %arg9: memref<64x1xf32, #tpu.memory_space<vmem>>, %arg10: memref<9x64x64xbf16, #tpu.memory_space<vmem>>, %arg11: memref<64x1xf32, #tpu.memory_space<vmem>>, %arg12: memref<32x64xf32, #tpu.memory_space<vmem>>, %arg13: memref<32x1xf32, #tpu.memory_space<vmem>>, %arg14: memref<8x32xf32, #tpu.memory_space<vmem>>, %arg15: memref<8x1xf32, #tpu.memory_space<vmem>>, %arg16: memref<1x8x1xf32, #tpu.memory_space<vmem>>) attributes {dimension_semantics = [#tpu.dimension_semantics<parallel>], iteration_bounds = array<i64: 2>, scalar_prefetch = 0 : i64, scratch_operands = 0 : i64, tpu.core_type = #tpu.core_type<tc>, window_params = [{transform_indices = @transform_0, window_bounds = array<i64: 1, 8, 256>}, {pipeline_mode = #tpu.pipeline_mode<synchronous>, transform_indices = @transform_1, window_bounds = array<i64: 9, 32, 8>}, {pipeline_mode = #tpu.pipeline_mode<synchronous>, transform_indices = @transform_2, window_bounds = array<i64: 32, 1>}, {pipeline_mode = #tpu.pipeline_mode<synchronous>, transform_indices = @transform_3, window_bounds = array<i64: 9, 32, 32>}, {pipeline_mode = #tpu.pipeline_mode<synchronous>, transform_indices = @transform_4, window_bounds = array<i64: 32, 1>}, {pipeline_mode = #tpu.pipeline_mode<synchronous>, transform_indices = @transform_5, window_bounds = array<i64: 9, 64, 32>}, {pipeline_mode = #tpu.pipeline_mode<synchronous>, transform_indices = @transform_6, window_bounds = array<i64: 64, 1>}, {pipeline_mode = #tpu.pipeline_mode<synchronous>, transform_indices = @transform_7, window_bounds = array<i64: 9, 64, 64>}, {pipeline_mode = #tpu.pipeline_mode<synchronous>, transform_indices = @transform_8, window_bounds = array<i64: 64, 1>}, {pipeline_mode = #tpu.pipeline_mode<synchronous>, transform_indices = @transform_9, window_bounds = array<i64: 9, 64, 64>}, {pipeline_mode = #tpu.pipeline_mode<synchronous>, transform_indices = @transform_10, window_bounds = array<i64: 64, 1>}, {pipeline_mode = #tpu.pipeline_mode<synchronous>, transform_indices = @transform_11, window_bounds = array<i64: 32, 64>}, {pipeline_mode = #tpu.pipeline_mode<synchronous>, transform_indices = @transform_12, window_bounds = array<i64: 32, 1>}, {pipeline_mode = #tpu.pipeline_mode<synchronous>, transform_indices = @transform_13, window_bounds = array<i64: 8, 32>}, {pipeline_mode = #tpu.pipeline_mode<synchronous>, transform_indices = @transform_14, window_bounds = array<i64: 8, 1>}, {transform_indices = @transform_15, window_bounds = array<i64: 1, 8, 1>}]} {
    %0 = tpu.iota {dimensions = array<i32: 1>} : vector<1x256xi32>
    %c16_i32 = arith.constant 16 : i32
    %c0_i32 = arith.constant 0 : i32
    %1 = arith.cmpi eq, %c16_i32, %c0_i32 : i32
    %c1_i32 = arith.constant 1 : i32
    %2 = arith.select %1, %c1_i32, %c16_i32 : i32
    %3 = vector.broadcast %2 : i32 to vector<1x256xi32>
    %4 = arith.remsi %0, %3 : vector<1x256xi32>
    %c0_i32_0 = arith.constant 0 : i32
    %5 = vector.broadcast %c0_i32_0 : i32 to vector<1x256xi32>
    %6 = arith.cmpi ne, %4, %5 : vector<1x256xi32>
    %c0_i32_1 = arith.constant 0 : i32
    %7 = vector.broadcast %c0_i32_1 : i32 to vector<1x256xi32>
    %8 = arith.cmpi slt, %4, %7 : vector<1x256xi32>
    %c0_i32_2 = arith.constant 0 : i32
    %9 = arith.cmpi slt, %2, %c0_i32_2 : i32
    %10 = vector.broadcast %9 : i1 to vector<1x256xi1>
    %11 = vector.broadcast %10 : vector<1x256xi1> to vector<1x256xi1>
    %12 = arith.xori %8, %11 : vector<1x256xi1>
    %13 = arith.andi %12, %6 : vector<1x256xi1>
    %14 = vector.broadcast %2 : i32 to vector<1x256xi32>
    %15 = arith.addi %4, %14 : vector<1x256xi32>
    %16 = arith.select %13, %15, %4 : vector<1x256xi1>, vector<1x256xi32>
    %c15_i32 = arith.constant 15 : i32
    %17 = vector.broadcast %c15_i32 : i32 to vector<1x256xi32>
    %18 = arith.cmpi ne, %16, %17 : vector<1x256xi32>
    %19 = arith.extui %18 : vector<1x256xi1> to vector<1x256xi32>
    %20 = arith.sitofp %19 : vector<1x256xi32> to vector<1x256xf32>
    %21 = arith.truncf %20 : vector<1x256xf32> to vector<1x256xbf16>
    %c0_i32_3 = arith.constant 0 : i32
    %22 = vector.broadcast %c0_i32_3 : i32 to vector<1x256xi32>
    %23 = arith.cmpi ne, %16, %22 : vector<1x256xi32>
    %24 = arith.extui %23 : vector<1x256xi1> to vector<1x256xi32>
    %25 = arith.sitofp %24 : vector<1x256xi32> to vector<1x256xf32>
    %26 = arith.truncf %25 : vector<1x256xf32> to vector<1x256xbf16>
    %c0 = arith.constant 0 : index
    %c0_4 = arith.constant 0 : index
    %c0_5 = arith.constant 0 : index
    %27 = vector.load %arg1[%c0, %c0_4, %c0_5] : memref<1x8x256xbf16, #tpu.memory_space<vmem>>, vector<1x8x256xbf16>
    %28 = vector.shape_cast %27 : vector<1x8x256xbf16> to vector<8x256xbf16>
    %29 = vector.broadcast %21 : vector<1x256xbf16> to vector<8x256xbf16>
    %30 = arith.mulf %28, %29 : vector<8x256xbf16>
    %31 = vector.broadcast %26 : vector<1x256xbf16> to vector<8x256xbf16>
    %32 = arith.mulf %28, %31 : vector<8x256xbf16>
    %cst = arith.constant 0.000000e+00 : f32
    %33 = vector.broadcast %cst : f32 to vector<32x256xf32>
    %cst_6 = arith.constant 0.000000e+00 : bf16
    %34 = vector.broadcast %cst_6 : bf16 to vector<8x17xbf16>
    %35 = vector.extract_strided_slice %30 {offsets = [0, 0], sizes = [8, 239], strides = [1, 1]} : vector<8x256xbf16> to vector<8x239xbf16>
    %36 = tpu.concatenate %34, %35 in 1 : vector<8x17xbf16>, vector<8x239xbf16> -> vector<8x256xbf16>
    %c0_7 = arith.constant 0 : index
    %c0_8 = arith.constant 0 : index
    %c0_9 = arith.constant 0 : index
    %37 = vector.load %arg2[%c0_7, %c0_8, %c0_9] : memref<9x32x8xbf16, #tpu.memory_space<vmem>>, vector<1x32x8xbf16>
    %38 = vector.shape_cast %37 : vector<1x32x8xbf16> to vector<32x8xbf16>
    %cst_10 = arith.constant dense<0.000000e+00> : vector<32x256xf32>
    %39 = tpu.matmul %38, %36, %cst_10 {dimension_numbers = #tpu.dot_dimension_numbers<[1], [0], [0], [1], [0, 0, 1, 1], [], []>} : vector<32x8xbf16>, vector<8x256xbf16>, vector<32x256xf32> -> vector<32x256xf32>
    %40 = arith.addf %33, %39 : vector<32x256xf32>
    %cst_11 = arith.constant 0.000000e+00 : bf16
    %41 = vector.broadcast %cst_11 : bf16 to vector<8x16xbf16>
    %42 = vector.extract_strided_slice %28 {offsets = [0, 0], sizes = [8, 240], strides = [1, 1]} : vector<8x256xbf16> to vector<8x240xbf16>
    %43 = tpu.concatenate %41, %42 in 1 : vector<8x16xbf16>, vector<8x240xbf16> -> vector<8x256xbf16>
    %c1 = arith.constant 1 : index
    %c0_12 = arith.constant 0 : index
    %c0_13 = arith.constant 0 : index
    %44 = vector.load %arg2[%c1, %c0_12, %c0_13] : memref<9x32x8xbf16, #tpu.memory_space<vmem>>, vector<1x32x8xbf16>
    %45 = vector.shape_cast %44 : vector<1x32x8xbf16> to vector<32x8xbf16>
    %cst_14 = arith.constant dense<0.000000e+00> : vector<32x256xf32>
    %46 = tpu.matmul %45, %43, %cst_14 {dimension_numbers = #tpu.dot_dimension_numbers<[1], [0], [0], [1], [0, 0, 1, 1], [], []>} : vector<32x8xbf16>, vector<8x256xbf16>, vector<32x256xf32> -> vector<32x256xf32>
    %47 = arith.addf %40, %46 : vector<32x256xf32>
    %cst_15 = arith.constant 0.000000e+00 : bf16
    %48 = vector.broadcast %cst_15 : bf16 to vector<8x15xbf16>
    %49 = vector.extract_strided_slice %32 {offsets = [0, 0], sizes = [8, 241], strides = [1, 1]} : vector<8x256xbf16> to vector<8x241xbf16>
    %50 = tpu.concatenate %48, %49 in 1 : vector<8x15xbf16>, vector<8x241xbf16> -> vector<8x256xbf16>
    %c2 = arith.constant 2 : index
    %c0_16 = arith.constant 0 : index
    %c0_17 = arith.constant 0 : index
    %51 = vector.load %arg2[%c2, %c0_16, %c0_17] : memref<9x32x8xbf16, #tpu.memory_space<vmem>>, vector<1x32x8xbf16>
    %52 = vector.shape_cast %51 : vector<1x32x8xbf16> to vector<32x8xbf16>
    %cst_18 = arith.constant dense<0.000000e+00> : vector<32x256xf32>
    %53 = tpu.matmul %52, %50, %cst_18 {dimension_numbers = #tpu.dot_dimension_numbers<[1], [0], [0], [1], [0, 0, 1, 1], [], []>} : vector<32x8xbf16>, vector<8x256xbf16>, vector<32x256xf32> -> vector<32x256xf32>
    %54 = arith.addf %47, %53 : vector<32x256xf32>
    %cst_19 = arith.constant 0.000000e+00 : bf16
    %55 = vector.broadcast %cst_19 : bf16 to vector<8x1xbf16>
    %56 = vector.extract_strided_slice %30 {offsets = [0, 0], sizes = [8, 255], strides = [1, 1]} : vector<8x256xbf16> to vector<8x255xbf16>
    %57 = tpu.concatenate %55, %56 in 1 : vector<8x1xbf16>, vector<8x255xbf16> -> vector<8x256xbf16>
    %c3 = arith.constant 3 : index
    %c0_20 = arith.constant 0 : index
    %c0_21 = arith.constant 0 : index
    %58 = vector.load %arg2[%c3, %c0_20, %c0_21] : memref<9x32x8xbf16, #tpu.memory_space<vmem>>, vector<1x32x8xbf16>
    %59 = vector.shape_cast %58 : vector<1x32x8xbf16> to vector<32x8xbf16>
    %cst_22 = arith.constant dense<0.000000e+00> : vector<32x256xf32>
    %60 = tpu.matmul %59, %57, %cst_22 {dimension_numbers = #tpu.dot_dimension_numbers<[1], [0], [0], [1], [0, 0, 1, 1], [], []>} : vector<32x8xbf16>, vector<8x256xbf16>, vector<32x256xf32> -> vector<32x256xf32>
    %61 = arith.addf %54, %60 : vector<32x256xf32>
    %c4 = arith.constant 4 : index
    %c0_23 = arith.constant 0 : index
    %c0_24 = arith.constant 0 : index
    %62 = vector.load %arg2[%c4, %c0_23, %c0_24] : memref<9x32x8xbf16, #tpu.memory_space<vmem>>, vector<1x32x8xbf16>
    %63 = vector.shape_cast %62 : vector<1x32x8xbf16> to vector<32x8xbf16>
    %cst_25 = arith.constant dense<0.000000e+00> : vector<32x256xf32>
    %64 = tpu.matmul %63, %28, %cst_25 {dimension_numbers = #tpu.dot_dimension_numbers<[1], [0], [0], [1], [0, 0, 1, 1], [], []>} : vector<32x8xbf16>, vector<8x256xbf16>, vector<32x256xf32> -> vector<32x256xf32>
    %65 = arith.addf %61, %64 : vector<32x256xf32>
    %cst_26 = arith.constant 0.000000e+00 : bf16
    %66 = vector.broadcast %cst_26 : bf16 to vector<8x1xbf16>
    %67 = vector.extract_strided_slice %32 {offsets = [0, 1], sizes = [8, 255], strides = [1, 1]} : vector<8x256xbf16> to vector<8x255xbf16>
    %68 = tpu.concatenate %67, %66 in 1 : vector<8x255xbf16>, vector<8x1xbf16> -> vector<8x256xbf16>
    %c5 = arith.constant 5 : index
    %c0_27 = arith.constant 0 : index
    %c0_28 = arith.constant 0 : index
    %69 = vector.load %arg2[%c5, %c0_27, %c0_28] : memref<9x32x8xbf16, #tpu.memory_space<vmem>>, vector<1x32x8xbf16>
    %70 = vector.shape_cast %69 : vector<1x32x8xbf16> to vector<32x8xbf16>
    %cst_29 = arith.constant dense<0.000000e+00> : vector<32x256xf32>
    %71 = tpu.matmul %70, %68, %cst_29 {dimension_numbers = #tpu.dot_dimension_numbers<[1], [0], [0], [1], [0, 0, 1, 1], [], []>} : vector<32x8xbf16>, vector<8x256xbf16>, vector<32x256xf32> -> vector<32x256xf32>
    %72 = arith.addf %65, %71 : vector<32x256xf32>
    %cst_30 = arith.constant 0.000000e+00 : bf16
    %73 = vector.broadcast %cst_30 : bf16 to vector<8x15xbf16>
    %74 = vector.extract_strided_slice %30 {offsets = [0, 15], sizes = [8, 241], strides = [1, 1]} : vector<8x256xbf16> to vector<8x241xbf16>
    %75 = tpu.concatenate %74, %73 in 1 : vector<8x241xbf16>, vector<8x15xbf16> -> vector<8x256xbf16>
    %c6 = arith.constant 6 : index
    %c0_31 = arith.constant 0 : index
    %c0_32 = arith.constant 0 : index
    %76 = vector.load %arg2[%c6, %c0_31, %c0_32] : memref<9x32x8xbf16, #tpu.memory_space<vmem>>, vector<1x32x8xbf16>
    %77 = vector.shape_cast %76 : vector<1x32x8xbf16> to vector<32x8xbf16>
    %cst_33 = arith.constant dense<0.000000e+00> : vector<32x256xf32>
    %78 = tpu.matmul %77, %75, %cst_33 {dimension_numbers = #tpu.dot_dimension_numbers<[1], [0], [0], [1], [0, 0, 1, 1], [], []>} : vector<32x8xbf16>, vector<8x256xbf16>, vector<32x256xf32> -> vector<32x256xf32>
    %79 = arith.addf %72, %78 : vector<32x256xf32>
    %cst_34 = arith.constant 0.000000e+00 : bf16
    %80 = vector.broadcast %cst_34 : bf16 to vector<8x16xbf16>
    %81 = vector.extract_strided_slice %28 {offsets = [0, 16], sizes = [8, 240], strides = [1, 1]} : vector<8x256xbf16> to vector<8x240xbf16>
    %82 = tpu.concatenate %81, %80 in 1 : vector<8x240xbf16>, vector<8x16xbf16> -> vector<8x256xbf16>
    %c7 = arith.constant 7 : index
    %c0_35 = arith.constant 0 : index
    %c0_36 = arith.constant 0 : index
    %83 = vector.load %arg2[%c7, %c0_35, %c0_36] : memref<9x32x8xbf16, #tpu.memory_space<vmem>>, vector<1x32x8xbf16>
    %84 = vector.shape_cast %83 : vector<1x32x8xbf16> to vector<32x8xbf16>
    %cst_37 = arith.constant dense<0.000000e+00> : vector<32x256xf32>
    %85 = tpu.matmul %84, %82, %cst_37 {dimension_numbers = #tpu.dot_dimension_numbers<[1], [0], [0], [1], [0, 0, 1, 1], [], []>} : vector<32x8xbf16>, vector<8x256xbf16>, vector<32x256xf32> -> vector<32x256xf32>
    %86 = arith.addf %79, %85 : vector<32x256xf32>
    %cst_38 = arith.constant 0.000000e+00 : bf16
    %87 = vector.broadcast %cst_38 : bf16 to vector<8x17xbf16>
    %88 = vector.extract_strided_slice %32 {offsets = [0, 17], sizes = [8, 239], strides = [1, 1]} : vector<8x256xbf16> to vector<8x239xbf16>
    %89 = tpu.concatenate %88, %87 in 1 : vector<8x239xbf16>, vector<8x17xbf16> -> vector<8x256xbf16>
    %c8 = arith.constant 8 : index
    %c0_39 = arith.constant 0 : index
    %c0_40 = arith.constant 0 : index
    %90 = vector.load %arg2[%c8, %c0_39, %c0_40] : memref<9x32x8xbf16, #tpu.memory_space<vmem>>, vector<1x32x8xbf16>
    %91 = vector.shape_cast %90 : vector<1x32x8xbf16> to vector<32x8xbf16>
    %cst_41 = arith.constant dense<0.000000e+00> : vector<32x256xf32>
    %92 = tpu.matmul %91, %89, %cst_41 {dimension_numbers = #tpu.dot_dimension_numbers<[1], [0], [0], [1], [0, 0, 1, 1], [], []>} : vector<32x8xbf16>, vector<8x256xbf16>, vector<32x256xf32> -> vector<32x256xf32>
    %93 = arith.addf %86, %92 : vector<32x256xf32>
    %c0_42 = arith.constant 0 : index
    %c0_43 = arith.constant 0 : index
    %94 = vector.load %arg3[%c0_42, %c0_43] : memref<32x1xf32, #tpu.memory_space<vmem>>, vector<32x1xf32>
    %95 = vector.broadcast %94 : vector<32x1xf32> to vector<32x256xf32>
    %96 = arith.addf %93, %95 : vector<32x256xf32>
    %97 = arith.negf %96 : vector<32x256xf32>
    %98 = math.exp %97 : vector<32x256xf32>
    %cst_44 = arith.constant 1.000000e+00 : f32
    %99 = vector.broadcast %cst_44 : f32 to vector<32x256xf32>
    %100 = arith.addf %99, %98 : vector<32x256xf32>
    %101 = arith.divf %99, %100 : vector<32x256xf32>
    %102 = arith.mulf %96, %101 : vector<32x256xf32>
    %103 = arith.truncf %102 : vector<32x256xf32> to vector<32x256xbf16>
    %104 = vector.broadcast %21 : vector<1x256xbf16> to vector<32x256xbf16>
    %105 = arith.mulf %103, %104 : vector<32x256xbf16>
    %106 = vector.broadcast %26 : vector<1x256xbf16> to vector<32x256xbf16>
    %107 = arith.mulf %103, %106 : vector<32x256xbf16>
    %cst_45 = arith.constant 0.000000e+00 : f32
    %108 = vector.broadcast %cst_45 : f32 to vector<32x256xf32>
    %cst_46 = arith.constant 0.000000e+00 : bf16
    %109 = vector.broadcast %cst_46 : bf16 to vector<32x17xbf16>
    %110 = vector.extract_strided_slice %105 {offsets = [0, 0], sizes = [32, 239], strides = [1, 1]} : vector<32x256xbf16> to vector<32x239xbf16>
    %111 = tpu.concatenate %109, %110 in 1 : vector<32x17xbf16>, vector<32x239xbf16> -> vector<32x256xbf16>
    %c0_47 = arith.constant 0 : index
    %c0_48 = arith.constant 0 : index
    %c0_49 = arith.constant 0 : index
    %112 = vector.load %arg4[%c0_47, %c0_48, %c0_49] : memref<9x32x32xbf16, #tpu.memory_space<vmem>>, vector<1x32x32xbf16>
    %113 = vector.shape_cast %112 : vector<1x32x32xbf16> to vector<32x32xbf16>
    %cst_50 = arith.constant dense<0.000000e+00> : vector<32x256xf32>
    %114 = tpu.matmul %113, %111, %cst_50 {dimension_numbers = #tpu.dot_dimension_numbers<[1], [0], [0], [1], [0, 0, 1, 1], [], []>} : vector<32x32xbf16>, vector<32x256xbf16>, vector<32x256xf32> -> vector<32x256xf32>
    %115 = arith.addf %108, %114 : vector<32x256xf32>
    %cst_51 = arith.constant 0.000000e+00 : bf16
    %116 = vector.broadcast %cst_51 : bf16 to vector<32x16xbf16>
    %117 = vector.extract_strided_slice %103 {offsets = [0, 0], sizes = [32, 240], strides = [1, 1]} : vector<32x256xbf16> to vector<32x240xbf16>
    %118 = tpu.concatenate %116, %117 in 1 : vector<32x16xbf16>, vector<32x240xbf16> -> vector<32x256xbf16>
    %c1_52 = arith.constant 1 : index
    %c0_53 = arith.constant 0 : index
    %c0_54 = arith.constant 0 : index
    %119 = vector.load %arg4[%c1_52, %c0_53, %c0_54] : memref<9x32x32xbf16, #tpu.memory_space<vmem>>, vector<1x32x32xbf16>
    %120 = vector.shape_cast %119 : vector<1x32x32xbf16> to vector<32x32xbf16>
    %cst_55 = arith.constant dense<0.000000e+00> : vector<32x256xf32>
    %121 = tpu.matmul %120, %118, %cst_55 {dimension_numbers = #tpu.dot_dimension_numbers<[1], [0], [0], [1], [0, 0, 1, 1], [], []>} : vector<32x32xbf16>, vector<32x256xbf16>, vector<32x256xf32> -> vector<32x256xf32>
    %122 = arith.addf %115, %121 : vector<32x256xf32>
    %cst_56 = arith.constant 0.000000e+00 : bf16
    %123 = vector.broadcast %cst_56 : bf16 to vector<32x15xbf16>
    %124 = vector.extract_strided_slice %107 {offsets = [0, 0], sizes = [32, 241], strides = [1, 1]} : vector<32x256xbf16> to vector<32x241xbf16>
    %125 = tpu.concatenate %123, %124 in 1 : vector<32x15xbf16>, vector<32x241xbf16> -> vector<32x256xbf16>
    %c2_57 = arith.constant 2 : index
    %c0_58 = arith.constant 0 : index
    %c0_59 = arith.constant 0 : index
    %126 = vector.load %arg4[%c2_57, %c0_58, %c0_59] : memref<9x32x32xbf16, #tpu.memory_space<vmem>>, vector<1x32x32xbf16>
    %127 = vector.shape_cast %126 : vector<1x32x32xbf16> to vector<32x32xbf16>
    %cst_60 = arith.constant dense<0.000000e+00> : vector<32x256xf32>
    %128 = tpu.matmul %127, %125, %cst_60 {dimension_numbers = #tpu.dot_dimension_numbers<[1], [0], [0], [1], [0, 0, 1, 1], [], []>} : vector<32x32xbf16>, vector<32x256xbf16>, vector<32x256xf32> -> vector<32x256xf32>
    %129 = arith.addf %122, %128 : vector<32x256xf32>
    %cst_61 = arith.constant 0.000000e+00 : bf16
    %130 = vector.broadcast %cst_61 : bf16 to vector<32x1xbf16>
    %131 = vector.extract_strided_slice %105 {offsets = [0, 0], sizes = [32, 255], strides = [1, 1]} : vector<32x256xbf16> to vector<32x255xbf16>
    %132 = tpu.concatenate %130, %131 in 1 : vector<32x1xbf16>, vector<32x255xbf16> -> vector<32x256xbf16>
    %c3_62 = arith.constant 3 : index
    %c0_63 = arith.constant 0 : index
    %c0_64 = arith.constant 0 : index
    %133 = vector.load %arg4[%c3_62, %c0_63, %c0_64] : memref<9x32x32xbf16, #tpu.memory_space<vmem>>, vector<1x32x32xbf16>
    %134 = vector.shape_cast %133 : vector<1x32x32xbf16> to vector<32x32xbf16>
    %cst_65 = arith.constant dense<0.000000e+00> : vector<32x256xf32>
    %135 = tpu.matmul %134, %132, %cst_65 {dimension_numbers = #tpu.dot_dimension_numbers<[1], [0], [0], [1], [0, 0, 1, 1], [], []>} : vector<32x32xbf16>, vector<32x256xbf16>, vector<32x256xf32> -> vector<32x256xf32>
    %136 = arith.addf %129, %135 : vector<32x256xf32>
    %c4_66 = arith.constant 4 : index
    %c0_67 = arith.constant 0 : index
    %c0_68 = arith.constant 0 : index
    %137 = vector.load %arg4[%c4_66, %c0_67, %c0_68] : memref<9x32x32xbf16, #tpu.memory_space<vmem>>, vector<1x32x32xbf16>
    %138 = vector.shape_cast %137 : vector<1x32x32xbf16> to vector<32x32xbf16>
    %cst_69 = arith.constant dense<0.000000e+00> : vector<32x256xf32>
    %139 = tpu.matmul %138, %103, %cst_69 {dimension_numbers = #tpu.dot_dimension_numbers<[1], [0], [0], [1], [0, 0, 1, 1], [], []>} : vector<32x32xbf16>, vector<32x256xbf16>, vector<32x256xf32> -> vector<32x256xf32>
    %140 = arith.addf %136, %139 : vector<32x256xf32>
    %cst_70 = arith.constant 0.000000e+00 : bf16
    %141 = vector.broadcast %cst_70 : bf16 to vector<32x1xbf16>
    %142 = vector.extract_strided_slice %107 {offsets = [0, 1], sizes = [32, 255], strides = [1, 1]} : vector<32x256xbf16> to vector<32x255xbf16>
    %143 = tpu.concatenate %142, %141 in 1 : vector<32x255xbf16>, vector<32x1xbf16> -> vector<32x256xbf16>
    %c5_71 = arith.constant 5 : index
    %c0_72 = arith.constant 0 : index
    %c0_73 = arith.constant 0 : index
    %144 = vector.load %arg4[%c5_71, %c0_72, %c0_73] : memref<9x32x32xbf16, #tpu.memory_space<vmem>>, vector<1x32x32xbf16>
    %145 = vector.shape_cast %144 : vector<1x32x32xbf16> to vector<32x32xbf16>
    %cst_74 = arith.constant dense<0.000000e+00> : vector<32x256xf32>
    %146 = tpu.matmul %145, %143, %cst_74 {dimension_numbers = #tpu.dot_dimension_numbers<[1], [0], [0], [1], [0, 0, 1, 1], [], []>} : vector<32x32xbf16>, vector<32x256xbf16>, vector<32x256xf32> -> vector<32x256xf32>
    %147 = arith.addf %140, %146 : vector<32x256xf32>
    %cst_75 = arith.constant 0.000000e+00 : bf16
    %148 = vector.broadcast %cst_75 : bf16 to vector<32x15xbf16>
    %149 = vector.extract_strided_slice %105 {offsets = [0, 15], sizes = [32, 241], strides = [1, 1]} : vector<32x256xbf16> to vector<32x241xbf16>
    %150 = tpu.concatenate %149, %148 in 1 : vector<32x241xbf16>, vector<32x15xbf16> -> vector<32x256xbf16>
    %c6_76 = arith.constant 6 : index
    %c0_77 = arith.constant 0 : index
    %c0_78 = arith.constant 0 : index
    %151 = vector.load %arg4[%c6_76, %c0_77, %c0_78] : memref<9x32x32xbf16, #tpu.memory_space<vmem>>, vector<1x32x32xbf16>
    %152 = vector.shape_cast %151 : vector<1x32x32xbf16> to vector<32x32xbf16>
    %cst_79 = arith.constant dense<0.000000e+00> : vector<32x256xf32>
    %153 = tpu.matmul %152, %150, %cst_79 {dimension_numbers = #tpu.dot_dimension_numbers<[1], [0], [0], [1], [0, 0, 1, 1], [], []>} : vector<32x32xbf16>, vector<32x256xbf16>, vector<32x256xf32> -> vector<32x256xf32>
    %154 = arith.addf %147, %153 : vector<32x256xf32>
    %cst_80 = arith.constant 0.000000e+00 : bf16
    %155 = vector.broadcast %cst_80 : bf16 to vector<32x16xbf16>
    %156 = vector.extract_strided_slice %103 {offsets = [0, 16], sizes = [32, 240], strides = [1, 1]} : vector<32x256xbf16> to vector<32x240xbf16>
    %157 = tpu.concatenate %156, %155 in 1 : vector<32x240xbf16>, vector<32x16xbf16> -> vector<32x256xbf16>
    %c7_81 = arith.constant 7 : index
    %c0_82 = arith.constant 0 : index
    %c0_83 = arith.constant 0 : index
    %158 = vector.load %arg4[%c7_81, %c0_82, %c0_83] : memref<9x32x32xbf16, #tpu.memory_space<vmem>>, vector<1x32x32xbf16>
    %159 = vector.shape_cast %158 : vector<1x32x32xbf16> to vector<32x32xbf16>
    %cst_84 = arith.constant dense<0.000000e+00> : vector<32x256xf32>
    %160 = tpu.matmul %159, %157, %cst_84 {dimension_numbers = #tpu.dot_dimension_numbers<[1], [0], [0], [1], [0, 0, 1, 1], [], []>} : vector<32x32xbf16>, vector<32x256xbf16>, vector<32x256xf32> -> vector<32x256xf32>
    %161 = arith.addf %154, %160 : vector<32x256xf32>
    %cst_85 = arith.constant 0.000000e+00 : bf16
    %162 = vector.broadcast %cst_85 : bf16 to vector<32x17xbf16>
    %163 = vector.extract_strided_slice %107 {offsets = [0, 17], sizes = [32, 239], strides = [1, 1]} : vector<32x256xbf16> to vector<32x239xbf16>
    %164 = tpu.concatenate %163, %162 in 1 : vector<32x239xbf16>, vector<32x17xbf16> -> vector<32x256xbf16>
    %c8_86 = arith.constant 8 : index
    %c0_87 = arith.constant 0 : index
    %c0_88 = arith.constant 0 : index
    %165 = vector.load %arg4[%c8_86, %c0_87, %c0_88] : memref<9x32x32xbf16, #tpu.memory_space<vmem>>, vector<1x32x32xbf16>
    %166 = vector.shape_cast %165 : vector<1x32x32xbf16> to vector<32x32xbf16>
    %cst_89 = arith.constant dense<0.000000e+00> : vector<32x256xf32>
    %167 = tpu.matmul %166, %164, %cst_89 {dimension_numbers = #tpu.dot_dimension_numbers<[1], [0], [0], [1], [0, 0, 1, 1], [], []>} : vector<32x32xbf16>, vector<32x256xbf16>, vector<32x256xf32> -> vector<32x256xf32>
    %168 = arith.addf %161, %167 : vector<32x256xf32>
    %c0_90 = arith.constant 0 : index
    %c0_91 = arith.constant 0 : index
    %169 = vector.load %arg5[%c0_90, %c0_91] : memref<32x1xf32, #tpu.memory_space<vmem>>, vector<32x1xf32>
    %170 = vector.broadcast %169 : vector<32x1xf32> to vector<32x256xf32>
    %171 = arith.addf %168, %170 : vector<32x256xf32>
    %172 = arith.negf %171 : vector<32x256xf32>
    %173 = math.exp %172 : vector<32x256xf32>
    %cst_92 = arith.constant 1.000000e+00 : f32
    %174 = vector.broadcast %cst_92 : f32 to vector<32x256xf32>
    %175 = arith.addf %174, %173 : vector<32x256xf32>
    %176 = arith.divf %174, %175 : vector<32x256xf32>
    %177 = arith.mulf %171, %176 : vector<32x256xf32>
    %178 = arith.truncf %177 : vector<32x256xf32> to vector<32x256xbf16>
    %179 = vector.broadcast %21 : vector<1x256xbf16> to vector<32x256xbf16>
    %180 = arith.mulf %178, %179 : vector<32x256xbf16>
    %181 = vector.broadcast %26 : vector<1x256xbf16> to vector<32x256xbf16>
    %182 = arith.mulf %178, %181 : vector<32x256xbf16>
    %cst_93 = arith.constant 0.000000e+00 : f32
    %183 = vector.broadcast %cst_93 : f32 to vector<64x256xf32>
    %cst_94 = arith.constant 0.000000e+00 : bf16
    %184 = vector.broadcast %cst_94 : bf16 to vector<32x17xbf16>
    %185 = vector.extract_strided_slice %180 {offsets = [0, 0], sizes = [32, 239], strides = [1, 1]} : vector<32x256xbf16> to vector<32x239xbf16>
    %186 = tpu.concatenate %184, %185 in 1 : vector<32x17xbf16>, vector<32x239xbf16> -> vector<32x256xbf16>
    %c0_95 = arith.constant 0 : index
    %c0_96 = arith.constant 0 : index
    %c0_97 = arith.constant 0 : index
    %187 = vector.load %arg6[%c0_95, %c0_96, %c0_97] : memref<9x64x32xbf16, #tpu.memory_space<vmem>>, vector<1x64x32xbf16>
    %188 = vector.shape_cast %187 : vector<1x64x32xbf16> to vector<64x32xbf16>
    %cst_98 = arith.constant dense<0.000000e+00> : vector<64x256xf32>
    %189 = tpu.matmul %188, %186, %cst_98 {dimension_numbers = #tpu.dot_dimension_numbers<[1], [0], [0], [1], [0, 0, 1, 1], [], []>} : vector<64x32xbf16>, vector<32x256xbf16>, vector<64x256xf32> -> vector<64x256xf32>
    %190 = arith.addf %183, %189 : vector<64x256xf32>
    %cst_99 = arith.constant 0.000000e+00 : bf16
    %191 = vector.broadcast %cst_99 : bf16 to vector<32x16xbf16>
    %192 = vector.extract_strided_slice %178 {offsets = [0, 0], sizes = [32, 240], strides = [1, 1]} : vector<32x256xbf16> to vector<32x240xbf16>
    %193 = tpu.concatenate %191, %192 in 1 : vector<32x16xbf16>, vector<32x240xbf16> -> vector<32x256xbf16>
    %c1_100 = arith.constant 1 : index
    %c0_101 = arith.constant 0 : index
    %c0_102 = arith.constant 0 : index
    %194 = vector.load %arg6[%c1_100, %c0_101, %c0_102] : memref<9x64x32xbf16, #tpu.memory_space<vmem>>, vector<1x64x32xbf16>
    %195 = vector.shape_cast %194 : vector<1x64x32xbf16> to vector<64x32xbf16>
    %cst_103 = arith.constant dense<0.000000e+00> : vector<64x256xf32>
    %196 = tpu.matmul %195, %193, %cst_103 {dimension_numbers = #tpu.dot_dimension_numbers<[1], [0], [0], [1], [0, 0, 1, 1], [], []>} : vector<64x32xbf16>, vector<32x256xbf16>, vector<64x256xf32> -> vector<64x256xf32>
    %197 = arith.addf %190, %196 : vector<64x256xf32>
    %cst_104 = arith.constant 0.000000e+00 : bf16
    %198 = vector.broadcast %cst_104 : bf16 to vector<32x15xbf16>
    %199 = vector.extract_strided_slice %182 {offsets = [0, 0], sizes = [32, 241], strides = [1, 1]} : vector<32x256xbf16> to vector<32x241xbf16>
    %200 = tpu.concatenate %198, %199 in 1 : vector<32x15xbf16>, vector<32x241xbf16> -> vector<32x256xbf16>
    %c2_105 = arith.constant 2 : index
    %c0_106 = arith.constant 0 : index
    %c0_107 = arith.constant 0 : index
    %201 = vector.load %arg6[%c2_105, %c0_106, %c0_107] : memref<9x64x32xbf16, #tpu.memory_space<vmem>>, vector<1x64x32xbf16>
    %202 = vector.shape_cast %201 : vector<1x64x32xbf16> to vector<64x32xbf16>
    %cst_108 = arith.constant dense<0.000000e+00> : vector<64x256xf32>
    %203 = tpu.matmul %202, %200, %cst_108 {dimension_numbers = #tpu.dot_dimension_numbers<[1], [0], [0], [1], [0, 0, 1, 1], [], []>} : vector<64x32xbf16>, vector<32x256xbf16>, vector<64x256xf32> -> vector<64x256xf32>
    %204 = arith.addf %197, %203 : vector<64x256xf32>
    %cst_109 = arith.constant 0.000000e+00 : bf16
    %205 = vector.broadcast %cst_109 : bf16 to vector<32x1xbf16>
    %206 = vector.extract_strided_slice %180 {offsets = [0, 0], sizes = [32, 255], strides = [1, 1]} : vector<32x256xbf16> to vector<32x255xbf16>
    %207 = tpu.concatenate %205, %206 in 1 : vector<32x1xbf16>, vector<32x255xbf16> -> vector<32x256xbf16>
    %c3_110 = arith.constant 3 : index
    %c0_111 = arith.constant 0 : index
    %c0_112 = arith.constant 0 : index
    %208 = vector.load %arg6[%c3_110, %c0_111, %c0_112] : memref<9x64x32xbf16, #tpu.memory_space<vmem>>, vector<1x64x32xbf16>
    %209 = vector.shape_cast %208 : vector<1x64x32xbf16> to vector<64x32xbf16>
    %cst_113 = arith.constant dense<0.000000e+00> : vector<64x256xf32>
    %210 = tpu.matmul %209, %207, %cst_113 {dimension_numbers = #tpu.dot_dimension_numbers<[1], [0], [0], [1], [0, 0, 1, 1], [], []>} : vector<64x32xbf16>, vector<32x256xbf16>, vector<64x256xf32> -> vector<64x256xf32>
    %211 = arith.addf %204, %210 : vector<64x256xf32>
    %c4_114 = arith.constant 4 : index
    %c0_115 = arith.constant 0 : index
    %c0_116 = arith.constant 0 : index
    %212 = vector.load %arg6[%c4_114, %c0_115, %c0_116] : memref<9x64x32xbf16, #tpu.memory_space<vmem>>, vector<1x64x32xbf16>
    %213 = vector.shape_cast %212 : vector<1x64x32xbf16> to vector<64x32xbf16>
    %cst_117 = arith.constant dense<0.000000e+00> : vector<64x256xf32>
    %214 = tpu.matmul %213, %178, %cst_117 {dimension_numbers = #tpu.dot_dimension_numbers<[1], [0], [0], [1], [0, 0, 1, 1], [], []>} : vector<64x32xbf16>, vector<32x256xbf16>, vector<64x256xf32> -> vector<64x256xf32>
    %215 = arith.addf %211, %214 : vector<64x256xf32>
    %cst_118 = arith.constant 0.000000e+00 : bf16
    %216 = vector.broadcast %cst_118 : bf16 to vector<32x1xbf16>
    %217 = vector.extract_strided_slice %182 {offsets = [0, 1], sizes = [32, 255], strides = [1, 1]} : vector<32x256xbf16> to vector<32x255xbf16>
    %218 = tpu.concatenate %217, %216 in 1 : vector<32x255xbf16>, vector<32x1xbf16> -> vector<32x256xbf16>
    %c5_119 = arith.constant 5 : index
    %c0_120 = arith.constant 0 : index
    %c0_121 = arith.constant 0 : index
    %219 = vector.load %arg6[%c5_119, %c0_120, %c0_121] : memref<9x64x32xbf16, #tpu.memory_space<vmem>>, vector<1x64x32xbf16>
    %220 = vector.shape_cast %219 : vector<1x64x32xbf16> to vector<64x32xbf16>
    %cst_122 = arith.constant dense<0.000000e+00> : vector<64x256xf32>
    %221 = tpu.matmul %220, %218, %cst_122 {dimension_numbers = #tpu.dot_dimension_numbers<[1], [0], [0], [1], [0, 0, 1, 1], [], []>} : vector<64x32xbf16>, vector<32x256xbf16>, vector<64x256xf32> -> vector<64x256xf32>
    %222 = arith.addf %215, %221 : vector<64x256xf32>
    %cst_123 = arith.constant 0.000000e+00 : bf16
    %223 = vector.broadcast %cst_123 : bf16 to vector<32x15xbf16>
    %224 = vector.extract_strided_slice %180 {offsets = [0, 15], sizes = [32, 241], strides = [1, 1]} : vector<32x256xbf16> to vector<32x241xbf16>
    %225 = tpu.concatenate %224, %223 in 1 : vector<32x241xbf16>, vector<32x15xbf16> -> vector<32x256xbf16>
    %c6_124 = arith.constant 6 : index
    %c0_125 = arith.constant 0 : index
    %c0_126 = arith.constant 0 : index
    %226 = vector.load %arg6[%c6_124, %c0_125, %c0_126] : memref<9x64x32xbf16, #tpu.memory_space<vmem>>, vector<1x64x32xbf16>
    %227 = vector.shape_cast %226 : vector<1x64x32xbf16> to vector<64x32xbf16>
    %cst_127 = arith.constant dense<0.000000e+00> : vector<64x256xf32>
    %228 = tpu.matmul %227, %225, %cst_127 {dimension_numbers = #tpu.dot_dimension_numbers<[1], [0], [0], [1], [0, 0, 1, 1], [], []>} : vector<64x32xbf16>, vector<32x256xbf16>, vector<64x256xf32> -> vector<64x256xf32>
    %229 = arith.addf %222, %228 : vector<64x256xf32>
    %cst_128 = arith.constant 0.000000e+00 : bf16
    %230 = vector.broadcast %cst_128 : bf16 to vector<32x16xbf16>
    %231 = vector.extract_strided_slice %178 {offsets = [0, 16], sizes = [32, 240], strides = [1, 1]} : vector<32x256xbf16> to vector<32x240xbf16>
    %232 = tpu.concatenate %231, %230 in 1 : vector<32x240xbf16>, vector<32x16xbf16> -> vector<32x256xbf16>
    %c7_129 = arith.constant 7 : index
    %c0_130 = arith.constant 0 : index
    %c0_131 = arith.constant 0 : index
    %233 = vector.load %arg6[%c7_129, %c0_130, %c0_131] : memref<9x64x32xbf16, #tpu.memory_space<vmem>>, vector<1x64x32xbf16>
    %234 = vector.shape_cast %233 : vector<1x64x32xbf16> to vector<64x32xbf16>
    %cst_132 = arith.constant dense<0.000000e+00> : vector<64x256xf32>
    %235 = tpu.matmul %234, %232, %cst_132 {dimension_numbers = #tpu.dot_dimension_numbers<[1], [0], [0], [1], [0, 0, 1, 1], [], []>} : vector<64x32xbf16>, vector<32x256xbf16>, vector<64x256xf32> -> vector<64x256xf32>
    %236 = arith.addf %229, %235 : vector<64x256xf32>
    %cst_133 = arith.constant 0.000000e+00 : bf16
    %237 = vector.broadcast %cst_133 : bf16 to vector<32x17xbf16>
    %238 = vector.extract_strided_slice %182 {offsets = [0, 17], sizes = [32, 239], strides = [1, 1]} : vector<32x256xbf16> to vector<32x239xbf16>
    %239 = tpu.concatenate %238, %237 in 1 : vector<32x239xbf16>, vector<32x17xbf16> -> vector<32x256xbf16>
    %c8_134 = arith.constant 8 : index
    %c0_135 = arith.constant 0 : index
    %c0_136 = arith.constant 0 : index
    %240 = vector.load %arg6[%c8_134, %c0_135, %c0_136] : memref<9x64x32xbf16, #tpu.memory_space<vmem>>, vector<1x64x32xbf16>
    %241 = vector.shape_cast %240 : vector<1x64x32xbf16> to vector<64x32xbf16>
    %cst_137 = arith.constant dense<0.000000e+00> : vector<64x256xf32>
    %242 = tpu.matmul %241, %239, %cst_137 {dimension_numbers = #tpu.dot_dimension_numbers<[1], [0], [0], [1], [0, 0, 1, 1], [], []>} : vector<64x32xbf16>, vector<32x256xbf16>, vector<64x256xf32> -> vector<64x256xf32>
    %243 = arith.addf %236, %242 : vector<64x256xf32>
    %c0_138 = arith.constant 0 : index
    %c0_139 = arith.constant 0 : index
    %244 = vector.load %arg7[%c0_138, %c0_139] : memref<64x1xf32, #tpu.memory_space<vmem>>, vector<64x1xf32>
    %245 = vector.broadcast %244 : vector<64x1xf32> to vector<64x256xf32>
    %246 = arith.addf %243, %245 : vector<64x256xf32>
    %247 = arith.negf %246 : vector<64x256xf32>
    %248 = math.exp %247 : vector<64x256xf32>
    %cst_140 = arith.constant 1.000000e+00 : f32
    %249 = vector.broadcast %cst_140 : f32 to vector<64x256xf32>
    %250 = arith.addf %249, %248 : vector<64x256xf32>
    %251 = arith.divf %249, %250 : vector<64x256xf32>
    %252 = arith.mulf %246, %251 : vector<64x256xf32>
    %253 = arith.truncf %252 : vector<64x256xf32> to vector<64x256xbf16>
    %254 = vector.broadcast %21 : vector<1x256xbf16> to vector<64x256xbf16>
    %255 = arith.mulf %253, %254 : vector<64x256xbf16>
    %256 = vector.broadcast %26 : vector<1x256xbf16> to vector<64x256xbf16>
    %257 = arith.mulf %253, %256 : vector<64x256xbf16>
    %cst_141 = arith.constant 0.000000e+00 : f32
    %258 = vector.broadcast %cst_141 : f32 to vector<64x256xf32>
    %cst_142 = arith.constant 0.000000e+00 : bf16
    %259 = vector.broadcast %cst_142 : bf16 to vector<64x17xbf16>
    %260 = vector.extract_strided_slice %255 {offsets = [0, 0], sizes = [64, 239], strides = [1, 1]} : vector<64x256xbf16> to vector<64x239xbf16>
    %261 = tpu.concatenate %259, %260 in 1 : vector<64x17xbf16>, vector<64x239xbf16> -> vector<64x256xbf16>
    %c0_143 = arith.constant 0 : index
    %c0_144 = arith.constant 0 : index
    %c0_145 = arith.constant 0 : index
    %262 = vector.load %arg8[%c0_143, %c0_144, %c0_145] : memref<9x64x64xbf16, #tpu.memory_space<vmem>>, vector<1x64x64xbf16>
    %263 = vector.shape_cast %262 : vector<1x64x64xbf16> to vector<64x64xbf16>
    %cst_146 = arith.constant dense<0.000000e+00> : vector<64x256xf32>
    %264 = tpu.matmul %263, %261, %cst_146 {dimension_numbers = #tpu.dot_dimension_numbers<[1], [0], [0], [1], [0, 0, 1, 1], [], []>} : vector<64x64xbf16>, vector<64x256xbf16>, vector<64x256xf32> -> vector<64x256xf32>
    %265 = arith.addf %258, %264 : vector<64x256xf32>
    %cst_147 = arith.constant 0.000000e+00 : bf16
    %266 = vector.broadcast %cst_147 : bf16 to vector<64x16xbf16>
    %267 = vector.extract_strided_slice %253 {offsets = [0, 0], sizes = [64, 240], strides = [1, 1]} : vector<64x256xbf16> to vector<64x240xbf16>
    %268 = tpu.concatenate %266, %267 in 1 : vector<64x16xbf16>, vector<64x240xbf16> -> vector<64x256xbf16>
    %c1_148 = arith.constant 1 : index
    %c0_149 = arith.constant 0 : index
    %c0_150 = arith.constant 0 : index
    %269 = vector.load %arg8[%c1_148, %c0_149, %c0_150] : memref<9x64x64xbf16, #tpu.memory_space<vmem>>, vector<1x64x64xbf16>
    %270 = vector.shape_cast %269 : vector<1x64x64xbf16> to vector<64x64xbf16>
    %cst_151 = arith.constant dense<0.000000e+00> : vector<64x256xf32>
    %271 = tpu.matmul %270, %268, %cst_151 {dimension_numbers = #tpu.dot_dimension_numbers<[1], [0], [0], [1], [0, 0, 1, 1], [], []>} : vector<64x64xbf16>, vector<64x256xbf16>, vector<64x256xf32> -> vector<64x256xf32>
    %272 = arith.addf %265, %271 : vector<64x256xf32>
    %cst_152 = arith.constant 0.000000e+00 : bf16
    %273 = vector.broadcast %cst_152 : bf16 to vector<64x15xbf16>
    %274 = vector.extract_strided_slice %257 {offsets = [0, 0], sizes = [64, 241], strides = [1, 1]} : vector<64x256xbf16> to vector<64x241xbf16>
    %275 = tpu.concatenate %273, %274 in 1 : vector<64x15xbf16>, vector<64x241xbf16> -> vector<64x256xbf16>
    %c2_153 = arith.constant 2 : index
    %c0_154 = arith.constant 0 : index
    %c0_155 = arith.constant 0 : index
    %276 = vector.load %arg8[%c2_153, %c0_154, %c0_155] : memref<9x64x64xbf16, #tpu.memory_space<vmem>>, vector<1x64x64xbf16>
    %277 = vector.shape_cast %276 : vector<1x64x64xbf16> to vector<64x64xbf16>
    %cst_156 = arith.constant dense<0.000000e+00> : vector<64x256xf32>
    %278 = tpu.matmul %277, %275, %cst_156 {dimension_numbers = #tpu.dot_dimension_numbers<[1], [0], [0], [1], [0, 0, 1, 1], [], []>} : vector<64x64xbf16>, vector<64x256xbf16>, vector<64x256xf32> -> vector<64x256xf32>
    %279 = arith.addf %272, %278 : vector<64x256xf32>
    %cst_157 = arith.constant 0.000000e+00 : bf16
    %280 = vector.broadcast %cst_157 : bf16 to vector<64x1xbf16>
    %281 = vector.extract_strided_slice %255 {offsets = [0, 0], sizes = [64, 255], strides = [1, 1]} : vector<64x256xbf16> to vector<64x255xbf16>
    %282 = tpu.concatenate %280, %281 in 1 : vector<64x1xbf16>, vector<64x255xbf16> -> vector<64x256xbf16>
    %c3_158 = arith.constant 3 : index
    %c0_159 = arith.constant 0 : index
    %c0_160 = arith.constant 0 : index
    %283 = vector.load %arg8[%c3_158, %c0_159, %c0_160] : memref<9x64x64xbf16, #tpu.memory_space<vmem>>, vector<1x64x64xbf16>
    %284 = vector.shape_cast %283 : vector<1x64x64xbf16> to vector<64x64xbf16>
    %cst_161 = arith.constant dense<0.000000e+00> : vector<64x256xf32>
    %285 = tpu.matmul %284, %282, %cst_161 {dimension_numbers = #tpu.dot_dimension_numbers<[1], [0], [0], [1], [0, 0, 1, 1], [], []>} : vector<64x64xbf16>, vector<64x256xbf16>, vector<64x256xf32> -> vector<64x256xf32>
    %286 = arith.addf %279, %285 : vector<64x256xf32>
    %c4_162 = arith.constant 4 : index
    %c0_163 = arith.constant 0 : index
    %c0_164 = arith.constant 0 : index
    %287 = vector.load %arg8[%c4_162, %c0_163, %c0_164] : memref<9x64x64xbf16, #tpu.memory_space<vmem>>, vector<1x64x64xbf16>
    %288 = vector.shape_cast %287 : vector<1x64x64xbf16> to vector<64x64xbf16>
    %cst_165 = arith.constant dense<0.000000e+00> : vector<64x256xf32>
    %289 = tpu.matmul %288, %253, %cst_165 {dimension_numbers = #tpu.dot_dimension_numbers<[1], [0], [0], [1], [0, 0, 1, 1], [], []>} : vector<64x64xbf16>, vector<64x256xbf16>, vector<64x256xf32> -> vector<64x256xf32>
    %290 = arith.addf %286, %289 : vector<64x256xf32>
    %cst_166 = arith.constant 0.000000e+00 : bf16
    %291 = vector.broadcast %cst_166 : bf16 to vector<64x1xbf16>
    %292 = vector.extract_strided_slice %257 {offsets = [0, 1], sizes = [64, 255], strides = [1, 1]} : vector<64x256xbf16> to vector<64x255xbf16>
    %293 = tpu.concatenate %292, %291 in 1 : vector<64x255xbf16>, vector<64x1xbf16> -> vector<64x256xbf16>
    %c5_167 = arith.constant 5 : index
    %c0_168 = arith.constant 0 : index
    %c0_169 = arith.constant 0 : index
    %294 = vector.load %arg8[%c5_167, %c0_168, %c0_169] : memref<9x64x64xbf16, #tpu.memory_space<vmem>>, vector<1x64x64xbf16>
    %295 = vector.shape_cast %294 : vector<1x64x64xbf16> to vector<64x64xbf16>
    %cst_170 = arith.constant dense<0.000000e+00> : vector<64x256xf32>
    %296 = tpu.matmul %295, %293, %cst_170 {dimension_numbers = #tpu.dot_dimension_numbers<[1], [0], [0], [1], [0, 0, 1, 1], [], []>} : vector<64x64xbf16>, vector<64x256xbf16>, vector<64x256xf32> -> vector<64x256xf32>
    %297 = arith.addf %290, %296 : vector<64x256xf32>
    %cst_171 = arith.constant 0.000000e+00 : bf16
    %298 = vector.broadcast %cst_171 : bf16 to vector<64x15xbf16>
    %299 = vector.extract_strided_slice %255 {offsets = [0, 15], sizes = [64, 241], strides = [1, 1]} : vector<64x256xbf16> to vector<64x241xbf16>
    %300 = tpu.concatenate %299, %298 in 1 : vector<64x241xbf16>, vector<64x15xbf16> -> vector<64x256xbf16>
    %c6_172 = arith.constant 6 : index
    %c0_173 = arith.constant 0 : index
    %c0_174 = arith.constant 0 : index
    %301 = vector.load %arg8[%c6_172, %c0_173, %c0_174] : memref<9x64x64xbf16, #tpu.memory_space<vmem>>, vector<1x64x64xbf16>
    %302 = vector.shape_cast %301 : vector<1x64x64xbf16> to vector<64x64xbf16>
    %cst_175 = arith.constant dense<0.000000e+00> : vector<64x256xf32>
    %303 = tpu.matmul %302, %300, %cst_175 {dimension_numbers = #tpu.dot_dimension_numbers<[1], [0], [0], [1], [0, 0, 1, 1], [], []>} : vector<64x64xbf16>, vector<64x256xbf16>, vector<64x256xf32> -> vector<64x256xf32>
    %304 = arith.addf %297, %303 : vector<64x256xf32>
    %cst_176 = arith.constant 0.000000e+00 : bf16
    %305 = vector.broadcast %cst_176 : bf16 to vector<64x16xbf16>
    %306 = vector.extract_strided_slice %253 {offsets = [0, 16], sizes = [64, 240], strides = [1, 1]} : vector<64x256xbf16> to vector<64x240xbf16>
    %307 = tpu.concatenate %306, %305 in 1 : vector<64x240xbf16>, vector<64x16xbf16> -> vector<64x256xbf16>
    %c7_177 = arith.constant 7 : index
    %c0_178 = arith.constant 0 : index
    %c0_179 = arith.constant 0 : index
    %308 = vector.load %arg8[%c7_177, %c0_178, %c0_179] : memref<9x64x64xbf16, #tpu.memory_space<vmem>>, vector<1x64x64xbf16>
    %309 = vector.shape_cast %308 : vector<1x64x64xbf16> to vector<64x64xbf16>
    %cst_180 = arith.constant dense<0.000000e+00> : vector<64x256xf32>
    %310 = tpu.matmul %309, %307, %cst_180 {dimension_numbers = #tpu.dot_dimension_numbers<[1], [0], [0], [1], [0, 0, 1, 1], [], []>} : vector<64x64xbf16>, vector<64x256xbf16>, vector<64x256xf32> -> vector<64x256xf32>
    %311 = arith.addf %304, %310 : vector<64x256xf32>
    %cst_181 = arith.constant 0.000000e+00 : bf16
    %312 = vector.broadcast %cst_181 : bf16 to vector<64x17xbf16>
    %313 = vector.extract_strided_slice %257 {offsets = [0, 17], sizes = [64, 239], strides = [1, 1]} : vector<64x256xbf16> to vector<64x239xbf16>
    %314 = tpu.concatenate %313, %312 in 1 : vector<64x239xbf16>, vector<64x17xbf16> -> vector<64x256xbf16>
    %c8_182 = arith.constant 8 : index
    %c0_183 = arith.constant 0 : index
    %c0_184 = arith.constant 0 : index
    %315 = vector.load %arg8[%c8_182, %c0_183, %c0_184] : memref<9x64x64xbf16, #tpu.memory_space<vmem>>, vector<1x64x64xbf16>
    %316 = vector.shape_cast %315 : vector<1x64x64xbf16> to vector<64x64xbf16>
    %cst_185 = arith.constant dense<0.000000e+00> : vector<64x256xf32>
    %317 = tpu.matmul %316, %314, %cst_185 {dimension_numbers = #tpu.dot_dimension_numbers<[1], [0], [0], [1], [0, 0, 1, 1], [], []>} : vector<64x64xbf16>, vector<64x256xbf16>, vector<64x256xf32> -> vector<64x256xf32>
    %318 = arith.addf %311, %317 : vector<64x256xf32>
    %c0_186 = arith.constant 0 : index
    %c0_187 = arith.constant 0 : index
    %319 = vector.load %arg9[%c0_186, %c0_187] : memref<64x1xf32, #tpu.memory_space<vmem>>, vector<64x1xf32>
    %320 = vector.broadcast %319 : vector<64x1xf32> to vector<64x256xf32>
    %321 = arith.addf %318, %320 : vector<64x256xf32>
    %322 = arith.negf %321 : vector<64x256xf32>
    %323 = math.exp %322 : vector<64x256xf32>
    %cst_188 = arith.constant 1.000000e+00 : f32
    %324 = vector.broadcast %cst_188 : f32 to vector<64x256xf32>
    %325 = arith.addf %324, %323 : vector<64x256xf32>
    %326 = arith.divf %324, %325 : vector<64x256xf32>
    %327 = arith.mulf %321, %326 : vector<64x256xf32>
    %328 = arith.truncf %327 : vector<64x256xf32> to vector<64x256xbf16>
    %329 = vector.broadcast %21 : vector<1x256xbf16> to vector<64x256xbf16>
    %330 = arith.mulf %328, %329 : vector<64x256xbf16>
    %331 = vector.broadcast %26 : vector<1x256xbf16> to vector<64x256xbf16>
    %332 = arith.mulf %328, %331 : vector<64x256xbf16>
    %cst_189 = arith.constant 0.000000e+00 : f32
    %333 = vector.broadcast %cst_189 : f32 to vector<64x256xf32>
    %cst_190 = arith.constant 0.000000e+00 : bf16
    %334 = vector.broadcast %cst_190 : bf16 to vector<64x17xbf16>
    %335 = vector.extract_strided_slice %330 {offsets = [0, 0], sizes = [64, 239], strides = [1, 1]} : vector<64x256xbf16> to vector<64x239xbf16>
    %336 = tpu.concatenate %334, %335 in 1 : vector<64x17xbf16>, vector<64x239xbf16> -> vector<64x256xbf16>
    %c0_191 = arith.constant 0 : index
    %c0_192 = arith.constant 0 : index
    %c0_193 = arith.constant 0 : index
    %337 = vector.load %arg10[%c0_191, %c0_192, %c0_193] : memref<9x64x64xbf16, #tpu.memory_space<vmem>>, vector<1x64x64xbf16>
    %338 = vector.shape_cast %337 : vector<1x64x64xbf16> to vector<64x64xbf16>
    %cst_194 = arith.constant dense<0.000000e+00> : vector<64x256xf32>
    %339 = tpu.matmul %338, %336, %cst_194 {dimension_numbers = #tpu.dot_dimension_numbers<[1], [0], [0], [1], [0, 0, 1, 1], [], []>} : vector<64x64xbf16>, vector<64x256xbf16>, vector<64x256xf32> -> vector<64x256xf32>
    %340 = arith.addf %333, %339 : vector<64x256xf32>
    %cst_195 = arith.constant 0.000000e+00 : bf16
    %341 = vector.broadcast %cst_195 : bf16 to vector<64x16xbf16>
    %342 = vector.extract_strided_slice %328 {offsets = [0, 0], sizes = [64, 240], strides = [1, 1]} : vector<64x256xbf16> to vector<64x240xbf16>
    %343 = tpu.concatenate %341, %342 in 1 : vector<64x16xbf16>, vector<64x240xbf16> -> vector<64x256xbf16>
    %c1_196 = arith.constant 1 : index
    %c0_197 = arith.constant 0 : index
    %c0_198 = arith.constant 0 : index
    %344 = vector.load %arg10[%c1_196, %c0_197, %c0_198] : memref<9x64x64xbf16, #tpu.memory_space<vmem>>, vector<1x64x64xbf16>
    %345 = vector.shape_cast %344 : vector<1x64x64xbf16> to vector<64x64xbf16>
    %cst_199 = arith.constant dense<0.000000e+00> : vector<64x256xf32>
    %346 = tpu.matmul %345, %343, %cst_199 {dimension_numbers = #tpu.dot_dimension_numbers<[1], [0], [0], [1], [0, 0, 1, 1], [], []>} : vector<64x64xbf16>, vector<64x256xbf16>, vector<64x256xf32> -> vector<64x256xf32>
    %347 = arith.addf %340, %346 : vector<64x256xf32>
    %cst_200 = arith.constant 0.000000e+00 : bf16
    %348 = vector.broadcast %cst_200 : bf16 to vector<64x15xbf16>
    %349 = vector.extract_strided_slice %332 {offsets = [0, 0], sizes = [64, 241], strides = [1, 1]} : vector<64x256xbf16> to vector<64x241xbf16>
    %350 = tpu.concatenate %348, %349 in 1 : vector<64x15xbf16>, vector<64x241xbf16> -> vector<64x256xbf16>
    %c2_201 = arith.constant 2 : index
    %c0_202 = arith.constant 0 : index
    %c0_203 = arith.constant 0 : index
    %351 = vector.load %arg10[%c2_201, %c0_202, %c0_203] : memref<9x64x64xbf16, #tpu.memory_space<vmem>>, vector<1x64x64xbf16>
    %352 = vector.shape_cast %351 : vector<1x64x64xbf16> to vector<64x64xbf16>
    %cst_204 = arith.constant dense<0.000000e+00> : vector<64x256xf32>
    %353 = tpu.matmul %352, %350, %cst_204 {dimension_numbers = #tpu.dot_dimension_numbers<[1], [0], [0], [1], [0, 0, 1, 1], [], []>} : vector<64x64xbf16>, vector<64x256xbf16>, vector<64x256xf32> -> vector<64x256xf32>
    %354 = arith.addf %347, %353 : vector<64x256xf32>
    %cst_205 = arith.constant 0.000000e+00 : bf16
    %355 = vector.broadcast %cst_205 : bf16 to vector<64x1xbf16>
    %356 = vector.extract_strided_slice %330 {offsets = [0, 0], sizes = [64, 255], strides = [1, 1]} : vector<64x256xbf16> to vector<64x255xbf16>
    %357 = tpu.concatenate %355, %356 in 1 : vector<64x1xbf16>, vector<64x255xbf16> -> vector<64x256xbf16>
    %c3_206 = arith.constant 3 : index
    %c0_207 = arith.constant 0 : index
    %c0_208 = arith.constant 0 : index
    %358 = vector.load %arg10[%c3_206, %c0_207, %c0_208] : memref<9x64x64xbf16, #tpu.memory_space<vmem>>, vector<1x64x64xbf16>
    %359 = vector.shape_cast %358 : vector<1x64x64xbf16> to vector<64x64xbf16>
    %cst_209 = arith.constant dense<0.000000e+00> : vector<64x256xf32>
    %360 = tpu.matmul %359, %357, %cst_209 {dimension_numbers = #tpu.dot_dimension_numbers<[1], [0], [0], [1], [0, 0, 1, 1], [], []>} : vector<64x64xbf16>, vector<64x256xbf16>, vector<64x256xf32> -> vector<64x256xf32>
    %361 = arith.addf %354, %360 : vector<64x256xf32>
    %c4_210 = arith.constant 4 : index
    %c0_211 = arith.constant 0 : index
    %c0_212 = arith.constant 0 : index
    %362 = vector.load %arg10[%c4_210, %c0_211, %c0_212] : memref<9x64x64xbf16, #tpu.memory_space<vmem>>, vector<1x64x64xbf16>
    %363 = vector.shape_cast %362 : vector<1x64x64xbf16> to vector<64x64xbf16>
    %cst_213 = arith.constant dense<0.000000e+00> : vector<64x256xf32>
    %364 = tpu.matmul %363, %328, %cst_213 {dimension_numbers = #tpu.dot_dimension_numbers<[1], [0], [0], [1], [0, 0, 1, 1], [], []>} : vector<64x64xbf16>, vector<64x256xbf16>, vector<64x256xf32> -> vector<64x256xf32>
    %365 = arith.addf %361, %364 : vector<64x256xf32>
    %cst_214 = arith.constant 0.000000e+00 : bf16
    %366 = vector.broadcast %cst_214 : bf16 to vector<64x1xbf16>
    %367 = vector.extract_strided_slice %332 {offsets = [0, 1], sizes = [64, 255], strides = [1, 1]} : vector<64x256xbf16> to vector<64x255xbf16>
    %368 = tpu.concatenate %367, %366 in 1 : vector<64x255xbf16>, vector<64x1xbf16> -> vector<64x256xbf16>
    %c5_215 = arith.constant 5 : index
    %c0_216 = arith.constant 0 : index
    %c0_217 = arith.constant 0 : index
    %369 = vector.load %arg10[%c5_215, %c0_216, %c0_217] : memref<9x64x64xbf16, #tpu.memory_space<vmem>>, vector<1x64x64xbf16>
    %370 = vector.shape_cast %369 : vector<1x64x64xbf16> to vector<64x64xbf16>
    %cst_218 = arith.constant dense<0.000000e+00> : vector<64x256xf32>
    %371 = tpu.matmul %370, %368, %cst_218 {dimension_numbers = #tpu.dot_dimension_numbers<[1], [0], [0], [1], [0, 0, 1, 1], [], []>} : vector<64x64xbf16>, vector<64x256xbf16>, vector<64x256xf32> -> vector<64x256xf32>
    %372 = arith.addf %365, %371 : vector<64x256xf32>
    %cst_219 = arith.constant 0.000000e+00 : bf16
    %373 = vector.broadcast %cst_219 : bf16 to vector<64x15xbf16>
    %374 = vector.extract_strided_slice %330 {offsets = [0, 15], sizes = [64, 241], strides = [1, 1]} : vector<64x256xbf16> to vector<64x241xbf16>
    %375 = tpu.concatenate %374, %373 in 1 : vector<64x241xbf16>, vector<64x15xbf16> -> vector<64x256xbf16>
    %c6_220 = arith.constant 6 : index
    %c0_221 = arith.constant 0 : index
    %c0_222 = arith.constant 0 : index
    %376 = vector.load %arg10[%c6_220, %c0_221, %c0_222] : memref<9x64x64xbf16, #tpu.memory_space<vmem>>, vector<1x64x64xbf16>
    %377 = vector.shape_cast %376 : vector<1x64x64xbf16> to vector<64x64xbf16>
    %cst_223 = arith.constant dense<0.000000e+00> : vector<64x256xf32>
    %378 = tpu.matmul %377, %375, %cst_223 {dimension_numbers = #tpu.dot_dimension_numbers<[1], [0], [0], [1], [0, 0, 1, 1], [], []>} : vector<64x64xbf16>, vector<64x256xbf16>, vector<64x256xf32> -> vector<64x256xf32>
    %379 = arith.addf %372, %378 : vector<64x256xf32>
    %cst_224 = arith.constant 0.000000e+00 : bf16
    %380 = vector.broadcast %cst_224 : bf16 to vector<64x16xbf16>
    %381 = vector.extract_strided_slice %328 {offsets = [0, 16], sizes = [64, 240], strides = [1, 1]} : vector<64x256xbf16> to vector<64x240xbf16>
    %382 = tpu.concatenate %381, %380 in 1 : vector<64x240xbf16>, vector<64x16xbf16> -> vector<64x256xbf16>
    %c7_225 = arith.constant 7 : index
    %c0_226 = arith.constant 0 : index
    %c0_227 = arith.constant 0 : index
    %383 = vector.load %arg10[%c7_225, %c0_226, %c0_227] : memref<9x64x64xbf16, #tpu.memory_space<vmem>>, vector<1x64x64xbf16>
    %384 = vector.shape_cast %383 : vector<1x64x64xbf16> to vector<64x64xbf16>
    %cst_228 = arith.constant dense<0.000000e+00> : vector<64x256xf32>
    %385 = tpu.matmul %384, %382, %cst_228 {dimension_numbers = #tpu.dot_dimension_numbers<[1], [0], [0], [1], [0, 0, 1, 1], [], []>} : vector<64x64xbf16>, vector<64x256xbf16>, vector<64x256xf32> -> vector<64x256xf32>
    %386 = arith.addf %379, %385 : vector<64x256xf32>
    %cst_229 = arith.constant 0.000000e+00 : bf16
    %387 = vector.broadcast %cst_229 : bf16 to vector<64x17xbf16>
    %388 = vector.extract_strided_slice %332 {offsets = [0, 17], sizes = [64, 239], strides = [1, 1]} : vector<64x256xbf16> to vector<64x239xbf16>
    %389 = tpu.concatenate %388, %387 in 1 : vector<64x239xbf16>, vector<64x17xbf16> -> vector<64x256xbf16>
    %c8_230 = arith.constant 8 : index
    %c0_231 = arith.constant 0 : index
    %c0_232 = arith.constant 0 : index
    %390 = vector.load %arg10[%c8_230, %c0_231, %c0_232] : memref<9x64x64xbf16, #tpu.memory_space<vmem>>, vector<1x64x64xbf16>
    %391 = vector.shape_cast %390 : vector<1x64x64xbf16> to vector<64x64xbf16>
    %cst_233 = arith.constant dense<0.000000e+00> : vector<64x256xf32>
    %392 = tpu.matmul %391, %389, %cst_233 {dimension_numbers = #tpu.dot_dimension_numbers<[1], [0], [0], [1], [0, 0, 1, 1], [], []>} : vector<64x64xbf16>, vector<64x256xbf16>, vector<64x256xf32> -> vector<64x256xf32>
    %393 = arith.addf %386, %392 : vector<64x256xf32>
    %c0_234 = arith.constant 0 : index
    %c0_235 = arith.constant 0 : index
    %394 = vector.load %arg11[%c0_234, %c0_235] : memref<64x1xf32, #tpu.memory_space<vmem>>, vector<64x1xf32>
    %395 = vector.broadcast %394 : vector<64x1xf32> to vector<64x256xf32>
    %396 = arith.addf %393, %395 : vector<64x256xf32>
    %397 = arith.negf %396 : vector<64x256xf32>
    %398 = math.exp %397 : vector<64x256xf32>
    %cst_236 = arith.constant 1.000000e+00 : f32
    %399 = vector.broadcast %cst_236 : f32 to vector<64x256xf32>
    %400 = arith.addf %399, %398 : vector<64x256xf32>
    %401 = arith.divf %399, %400 : vector<64x256xf32>
    %402 = arith.mulf %396, %401 : vector<64x256xf32>
    %403 = arith.truncf %402 : vector<64x256xf32> to vector<64x256xbf16>
    %404 = arith.extf %403 : vector<64x256xbf16> to vector<64x256xf32>
    %cst_237 = arith.constant dense<0.000000e+00> : vector<64xf32>
    %405 = vector.multi_reduction <add>, %404, %cst_237 [1] : vector<64x256xf32> to vector<64xf32>
    %406 = vector.shape_cast %405 : vector<64xf32> to vector<64x1xf32>
    %cst_238 = arith.constant 3.906250e-03 : f32
    %407 = vector.broadcast %cst_238 : f32 to vector<64x1xf32>
    %408 = arith.mulf %406, %407 : vector<64x1xf32>
    %c0_239 = arith.constant 0 : index
    %c0_240 = arith.constant 0 : index
    %409 = vector.load %arg12[%c0_239, %c0_240] : memref<32x64xf32, #tpu.memory_space<vmem>>, vector<32x64xf32>
    %cst_241 = arith.constant dense<0.000000e+00> : vector<32x1xf32>
    %410 = tpu.matmul %409, %408, %cst_241 {dimension_numbers = #tpu.dot_dimension_numbers<[1], [0], [0], [1], [0, 0, 1, 1], [], []>} : vector<32x64xf32>, vector<64x1xf32>, vector<32x1xf32> -> vector<32x1xf32>
    %c0_242 = arith.constant 0 : index
    %c0_243 = arith.constant 0 : index
    %411 = vector.load %arg13[%c0_242, %c0_243] : memref<32x1xf32, #tpu.memory_space<vmem>>, vector<32x1xf32>
    %412 = arith.addf %410, %411 : vector<32x1xf32>
    %cst_244 = arith.constant 0.000000e+00 : f32
    %413 = vector.broadcast %cst_244 : f32 to vector<32x1xf32>
    %414 = arith.maximumf %412, %413 : vector<32x1xf32>
    %c0_245 = arith.constant 0 : index
    %c0_246 = arith.constant 0 : index
    %415 = vector.load %arg14[%c0_245, %c0_246] : memref<8x32xf32, #tpu.memory_space<vmem>>, vector<8x32xf32>
    %cst_247 = arith.constant dense<0.000000e+00> : vector<8x1xf32>
    %416 = tpu.matmul %415, %414, %cst_247 {dimension_numbers = #tpu.dot_dimension_numbers<[1], [0], [0], [1], [0, 0, 1, 1], [], []>} : vector<8x32xf32>, vector<32x1xf32>, vector<8x1xf32> -> vector<8x1xf32>
    %c0_248 = arith.constant 0 : index
    %c0_249 = arith.constant 0 : index
    %417 = vector.load %arg15[%c0_248, %c0_249] : memref<8x1xf32, #tpu.memory_space<vmem>>, vector<8x1xf32>
    %418 = arith.addf %416, %417 : vector<8x1xf32>
    %c0_250 = arith.constant 0 : index
    %c0_251 = arith.constant 0 : index
    %c0_252 = arith.constant 0 : index
    %419 = vector.load %arg16[%c0_250, %c0_251, %c0_252] : memref<1x8x1xf32, #tpu.memory_space<vmem>>, vector<1x8x1xf32>
    %420 = vector.shape_cast %419 : vector<1x8x1xf32> to vector<8x1xf32>
    %421 = vector.shape_cast %418 : vector<8x1xf32> to vector<1x8x1xf32>
    tpu.vector_store %arg16[%c0_250, %c0_251, %c0_252], %421 {strides = array<i32>} : memref<1x8x1xf32, #tpu.memory_space<vmem>>, vector<1x8x1xf32>,
    return
  }
  func.func @transform_0(%arg0: i32) -> (i32, i32, i32) {
    %c0_i32 = arith.constant 0 : i32
    %c0_i32_0 = arith.constant 0 : i32
    %c0_i32_1 = arith.constant 0 : i32
    return %arg0, %c0_i32, %c0_i32_0 : i32, i32, i32
  }
  func.func @transform_1(%arg0: i32) -> (i32, i32, i32) {
    %c0_i32 = arith.constant 0 : i32
    %c0_i32_0 = arith.constant 0 : i32
    %c0_i32_1 = arith.constant 0 : i32
    %c0_i32_2 = arith.constant 0 : i32
    return %c0_i32, %c0_i32_0, %c0_i32_1 : i32, i32, i32
  }
  func.func @transform_2(%arg0: i32) -> (i32, i32) {
    %c0_i32 = arith.constant 0 : i32
    %c0_i32_0 = arith.constant 0 : i32
    %c0_i32_1 = arith.constant 0 : i32
    return %c0_i32, %c0_i32_0 : i32, i32
  }
  func.func @transform_3(%arg0: i32) -> (i32, i32, i32) {
    %c0_i32 = arith.constant 0 : i32
    %c0_i32_0 = arith.constant 0 : i32
    %c0_i32_1 = arith.constant 0 : i32
    %c0_i32_2 = arith.constant 0 : i32
    return %c0_i32, %c0_i32_0, %c0_i32_1 : i32, i32, i32
  }
  func.func @transform_4(%arg0: i32) -> (i32, i32) {
    %c0_i32 = arith.constant 0 : i32
    %c0_i32_0 = arith.constant 0 : i32
    %c0_i32_1 = arith.constant 0 : i32
    return %c0_i32, %c0_i32_0 : i32, i32
  }
  func.func @transform_5(%arg0: i32) -> (i32, i32, i32) {
    %c0_i32 = arith.constant 0 : i32
    %c0_i32_0 = arith.constant 0 : i32
    %c0_i32_1 = arith.constant 0 : i32
    %c0_i32_2 = arith.constant 0 : i32
    return %c0_i32, %c0_i32_0, %c0_i32_1 : i32, i32, i32
  }
  func.func @transform_6(%arg0: i32) -> (i32, i32) {
    %c0_i32 = arith.constant 0 : i32
    %c0_i32_0 = arith.constant 0 : i32
    %c0_i32_1 = arith.constant 0 : i32
    return %c0_i32, %c0_i32_0 : i32, i32
  }
  func.func @transform_7(%arg0: i32) -> (i32, i32, i32) {
    %c0_i32 = arith.constant 0 : i32
    %c0_i32_0 = arith.constant 0 : i32
    %c0_i32_1 = arith.constant 0 : i32
    %c0_i32_2 = arith.constant 0 : i32
    return %c0_i32, %c0_i32_0, %c0_i32_1 : i32, i32, i32
  }
  func.func @transform_8(%arg0: i32) -> (i32, i32) {
    %c0_i32 = arith.constant 0 : i32
    %c0_i32_0 = arith.constant 0 : i32
    %c0_i32_1 = arith.constant 0 : i32
    return %c0_i32, %c0_i32_0 : i32, i32
  }
  func.func @transform_9(%arg0: i32) -> (i32, i32, i32) {
    %c0_i32 = arith.constant 0 : i32
    %c0_i32_0 = arith.constant 0 : i32
    %c0_i32_1 = arith.constant 0 : i32
    %c0_i32_2 = arith.constant 0 : i32
    return %c0_i32, %c0_i32_0, %c0_i32_1 : i32, i32, i32
  }
  func.func @transform_10(%arg0: i32) -> (i32, i32) {
    %c0_i32 = arith.constant 0 : i32
    %c0_i32_0 = arith.constant 0 : i32
    %c0_i32_1 = arith.constant 0 : i32
    return %c0_i32, %c0_i32_0 : i32, i32
  }
  func.func @transform_11(%arg0: i32) -> (i32, i32) {
    %c0_i32 = arith.constant 0 : i32
    %c0_i32_0 = arith.constant 0 : i32
    %c0_i32_1 = arith.constant 0 : i32
    return %c0_i32, %c0_i32_0 : i32, i32
  }
  func.func @transform_12(%arg0: i32) -> (i32, i32) {
    %c0_i32 = arith.constant 0 : i32
    %c0_i32_0 = arith.constant 0 : i32
    %c0_i32_1 = arith.constant 0 : i32
    return %c0_i32, %c0_i32_0 : i32, i32
  }
  func.func @transform_13(%arg0: i32) -> (i32, i32) {
    %c0_i32 = arith.constant 0 : i32
    %c0_i32_0 = arith.constant 0 : i32
    %c0_i32_1 = arith.constant 0 : i32
    return %c0_i32, %c0_i32_0 : i32, i32
  }
  func.func @transform_14(%arg0: i32) -> (i32, i32) {
    %c0_i32 = arith.constant 0 : i32
    %c0_i32_0 = arith.constant 0 : i32
    %c0_i32_1 = arith.constant 0 : i32
    return %c0_i32, %c0_i32_0 : i32, i32
  }
  func.func @transform_15(%arg0: i32) -> (i32, i32, i32) {
    %c0_i32 = arith.constant 0 : i32
    %c0_i32_0 = arith.constant 0 : i32
    %c0_i32_1 = arith.constant 0 : i32
    return %arg0, %c0_i32, %c0_i32_0 : i32, i32, i32
  }
}

</mosaic_0001>

<bundles_post_ra>
// kernel: pigaze_forward.1
= control target key start
LH: loop header
LB: loop body
LE: loop exit
PB: predicated region body
PF: predicated region fallthrough
CT: control target
= control target key end

     0   :  { %s8914_s18 = smov 0   ;;  %s11405_s0 = inlined_call_operand.vmem [shape: bf16[2,8,256], index: 0, kind: input, shape index: {}]   ;;  %s11406_s1 = inlined_call_operand.vmem [shape: bf16[9,32,8], index: 1, kind: input, shape index: {}]   ;;  %s11407_s2 = inlined_call_operand.vmem [shape: f32[32,1], index: 2, kind: input, shape index: {}]   ;;  %s11408_s3 = inlined_call_operand.vmem [shape: bf16[9,32,32], index: 3, kind: input, shape index: {}]   ;;  %s11409_s4 = inlined_call_operand.vmem [shape: f32[32,1], index: 4, kind: input, shape index: {}]   ;;  %s11410_s5 = inlined_call_operand.vmem [shape: bf16[9,64,32], index: 5, kind: input, shape index: {}]   ;;  %s11411_s6 = inlined_call_operand.vmem [shape: f32[64,1], index: 6, kind: input, shape index: {}]   ;;  %s11412_s7 = inlined_call_operand.vmem [shape: bf16[9,64,64], index: 7, kind: input, shape index: {}]   ;;  %s11413_s8 = inlined_call_operand.vmem [shape: f32[64,1], index: 8, kind: input, shape index: {}]   ;;  %s11414_s9 = inlined_call_operand.vmem [shape: bf16[9,64,64], index: 9, kind: input, shape index: {}]   ;;  %s11415_s10 = inlined_call_operand.vmem [shape: f32[64,1], index: 10, kind: input, shape index: {}]   ;;  %s11416_s11 = inlined_call_operand.vmem [shape: f32[32,64], index: 11, kind: input, shape index: {}]   ;;  %s11417_s12 = inlined_call_operand.vmem [shape: f32[32,1], index: 12, kind: input, shape index: {}]   ;;  %s11418_s13 = inlined_call_operand.vmem [shape: f32[8,32], index: 13, kind: input, shape index: {}]   ;;  %s11419_s14 = inlined_call_operand.vmem [shape: f32[8,1], index: 14, kind: input, shape index: {}]   ;;  %s11420_s15 = inlined_call_operand.vmem [shape: f32[2,8,1], index: 15, kind: output, shape index: {}]  }
   0x1   :  { %11489 = sst [smem:[#allocation37_spill]] %s11405_s0 }
   0x2   :  { %11490 = sst [smem:[#allocation38_spill]] %s11406_s1 }
   0x3   :  { %11491 = sst [smem:[#allocation39_spill]] %s11407_s2 }
   0x4 LB: > { %s7549_s19 = sadd.s32 4294967295, %s8821_s18   ;;  %p7553_p0 = scmp.ge.s32.totalorder %s8821_s18, 1  ;;  %s8821_s18 = sphi %s8914_s18, %s25_s18  }
   0x5   : > { %p437_p1 = scmp.lt.s32.totalorder %s8821_s18, 3 }
   0x7   : > { %p438_p2 = pnand %p7553_p0, %p437_p1 }
   0x9   : > { %441 = sbr.rel (%p438_p2) target bundleno = 3018 (0xbca), region = 80 }
   0xe   : > { %p484_p3 = scmp.lt.s32.totalorder %s7549_s19, 1  ;;  %v494_v0 = vlaneseq  ;;  %v11430_v4 = vmov 0   ;;  %s11492_s0 = sld [smem:[#allocation37_spill]]  ;;  %v11428_v8 = vmov 0.0   ;;  %vm580_vm4 = vcmask 130048  }
   0xf   : > { %645 = vmatprep.mubr.bf16.mxu0 %v11430_v4  ;;  %655 = vmatprep.mubr.bf16.mxu1 %v11430_v4  ;;  %s11456_s24 = smov 16   ;;  %s11437_s25 = smov 17   ;;  %vm607_vm5 = vcmask 1043456   ;;  %vm561_vm6 = vcmask 138240   ;;  %vm600_vm7 = vcmask 64512   ;;  %vm749_vm8 = vcmask 121856   ;;  %vm9235_vm14 = vmneg %vm580_vm4 }
  0x10   : > { %s11656_s19 = smov (!%p484_p3, %s7549_s19), 1  ;;  %v495_v1 = vand.u32 127, %v494_v0  ;;  %8412 = vset.pattern.permute.xlu1 %v11430_v4  ;;  %8411 = vset.pattern.permute.xlu0 %v11430_v4  ;;  %s11433_s26 = smov 15   ;;  %vm845_vm9 = vcmask 7168   ;;  %vm1029_vm10 = vcmask 1039360   ;;  %vm1125_vm11 = vcmask 924672  }
  0x11   : > { %s11421_s20 = sshll.u32 %s11656_s19, 3  ;;  %s11426_s27 = smov 1   ;;  %vm1221_vm12 = vcmask 916480   ;;  %vm1317_vm13 = vcmask 908288   ;;  %vm1572_vm15 = vcmask 261120  }
  0x12   : > { %v496_v2 = vadd.s32 128, %v495_v1  ;;  %v501_v3 = vand.u32 15, %v495_v1  ;;  %s11422_s28 = smov 127   ;;  %s11424_s29 = smov 113  }
  0x13   : > { %s11435_s30 = smov 112   ;;  %s11458_s16 = smov 111  }
  0x14   : > { %s488_s23 = scalar_lea.vmem %s11492_s0, %s11421_s20  ;;  %v508_v6 = vand.u32 15, %v496_v2  ;;  %vm521_vm0 = vcmp.ne.s32.totalorder %v501_v3, 15  ;;  %vm529_vm1 = vcmp.ne.s32.totalorder %v501_v3, 0  ;;  %s11494_s2 = sld [smem:[#allocation39_spill]] }
  0x15   : > { %v537_v5 = vld [vmem:[%s488_s23] sm:$0xff]  ;;  %v8937_v9 = vsel %vm521_vm0, 1.0, %v11428_v8  ;;  %v8940_v10 = vsel %vm529_vm1, 1.0, %v11428_v8  ;;  %s11495_s1 = sld [smem:[#allocation38_spill]]  ;;  %s11501_s17 = smov 1   ;;  %vm9251_vm0 = vmneg %vm561_vm6 }
  0x16   : > { %v8934_v7 = vcombine.low %v537_v5, %v537_v5  ;;  %vm522_vm2 = vcmp.ne.s32.totalorder %v508_v6, 15  ;;  %vm530_vm3 = vcmp.ne.s32.totalorder %v508_v6, 0  ;;  %v8944_v11 = vcombine.high %v537_v5, %v537_v5  ;;  %s11502_s21 = smov 127   ;;  %s11503_s22 = smov 113   ;;  %vm9263_vm1 = vmneg %vm749_vm8 }
  0x17   : > { %v8947_v12 = vsel %vm522_vm2, 1.0, %v11428_v8  ;;  %v8950_v13 = vsel %vm530_vm3, 1.0, %v11428_v8  ;;  %vm9287_vm2 = vmneg %vm845_vm9  ;;  %s11522_s20 = smov 17   ;;  %vm4105_vm3 = vcmask 523264  }
  0x18   : > { %576 = vrot.lane.b32.xlu0 %v8934_v7, %s11456_s24  ;;  %11493 = vst [vmem:[#allocation2_spill] sm:$0xff] %v8950_v13  ;;  %v8338_v14 = vpack.c.bf16 %v8947_v12, %v8937_v9  ;;  %v8339_v15 = vpack.c.bf16 %v8950_v13, %v8940_v10  ;;  %v959_v50 = vsel %vm607_vm5, %v8934_v7, 0 }
  0x1a   : > { %v544_v16 = vmul.bf16 %v8338_v14, %v537_v5  ;;  %v551_v17 = vmul.bf16 %v8339_v15, %v537_v5  ;;  %v1412_v22 = vld [vmem:[%s11494_s2 + $0x18] sm:$0xff]  ;;  %v1411_v23 = vld [vmem:[%s11494_s2 + $0x10] sm:$0xff]  ;;  %v1409_v24 = vld [vmem:[%s11494_s2] sm:$0xff] }
  0x1b   : > { %v1410_v25 = vld [vmem:[%s11494_s2 + $0x8] sm:$0xff]  ;;  %v8415_v31 = vld [vmem:[%s11495_s1 + $0x10] sm:$0xff]   ;;  %v8416_v32 = vld [vmem:[%s11495_s1 + $0x18] sm:$0xff]   ;;  %s11587_s2 = smov 16  }
  0x1c   : > { %578 = vrot.lane.b32.xlu0 %v8944_v11, %s11456_s24  ;;  %v7563_v18 = vcombine.low %v544_v16, %v544_v16  ;;  %v7581_v19 = vcombine.low %v551_v17, %v551_v17  ;;  %v7564_v20 = vcombine.high %v544_v16, %v544_v16  ;;  %v7582_v21 = vcombine.high %v551_v17, %v551_v17  ;;  %v8417_v41 = vld [vmem:[%s11495_s1] sm:$0xff]   ;;  %v8419_v51 = vld [vmem:[%s11495_s1 + $0x8] sm:$0xff]   ;;  %v8421_v60 = vld [vmem:[%s11495_s1 + $0x30] sm:$0xff]  }
  0x1d   : > { %v8418_v46 = vld [vmem:[%s11495_s1 + $0x20] sm:$0xff]   ;;  %v8420_v55 = vld [vmem:[%s11495_s1 + $0x28] sm:$0xff]   ;;  %v8423_v6 = vld [vmem:[%s11495_s1 + $0x38] sm:$0xff]  }
  0x1e   : > { %557 = vrot.lane.b32.xlu1 %v7563_v18, %s11437_s25  ;;  %v8422_v0 = vld [vmem:[%s11495_s1 + $0x40] sm:$0xff]   ;;  %v8425_v16 = vld [vmem:[%s11495_s1 + $0x50] sm:$0xff]  }
  0x20   : > { %745 = vrot.lane.b32.xlu0 %v7581_v19, %s11433_s26 }
  0x22   : > { %559 = vrot.lane.b32.xlu1 %v7564_v20, %s11437_s25 }
  0x24   : > { %841 = vrot.lane.b32.xlu0 %v7563_v18, %s11426_s27 }
  0x26   : > { %747 = vrot.lane.b32.xlu1 %v7582_v21, %s11433_s26 }
  0x28   : > { %1025 = vrot.lane.b32.xlu0 %v7581_v19, %s11422_s28 }
  0x2a   : > { %843 = vrot.lane.b32.xlu1 %v7564_v20, %s11426_s27  ;;  %s11527_s27 = smov 112  }
  0x2c   : > { %1121 = vrot.lane.b32.xlu0 %v7563_v18, %s11424_s29 }
  0x2e   : > { %1027 = vrot.lane.b32.xlu1 %v7582_v21, %s11422_s28  ;;  %s11525_s28 = smov 15  }
  0x30   : > { %1217 = vrot.lane.b32.xlu0 %v8934_v7, %s11435_s30 }
  0x32   : > { %1123 = vrot.lane.b32.xlu1 %v7564_v20, %s11424_s29 }
  0x34   : > { %1313 = vrot.lane.b32.xlu0 %v7581_v19, %s11458_s16  ;;  %v8426_v19 = vld [vmem:[%s11495_s1 + $0x60] sm:$0xff]  }
  0x36   : > { %1219 = vrot.lane.b32.xlu1 %v8944_v11, %s11435_s30 }
  0x38   : > { %1425 = vperm.xlu0 %8411, %v1411_v23   ;;  %v8429_v23 = vld [vmem:[%s11495_s1 + $0x70] sm:$0xff]  }
  0x3a   : > { %1315 = vrot.lane.b32.xlu1 %v7582_v21, %s11458_s16  ;;  %v8427_v21 = vld [vmem:[%s11495_s1 + $0x58] sm:$0xff]  }
  0x3c   : > { %1420 = vperm.xlu0 %8411, %v1410_v25   ;;  %v8431_v25 = vld [vmem:[%s11495_s1 + $0x78] sm:$0xff]  }
  0x3e   : > { %1430 = vperm.xlu1 %8412, %v1412_v22   ;;  %v8428_v22 = vld [vmem:[%s11495_s1 + $0x68] sm:$0xff]  }
  0x42   : > { %1415 = vperm.xlu1 %8412, %v1409_v24   ;;  %v8430_v24 = vld [vmem:[%s11495_s1 + $0x80] sm:$0xff]  }
  0x8a   : > { %v577_v26 = vpop.permute.xlu0 %576 }
  0x8b   : > { %v584_v27 = vsel %vm580_vm4, 0, %v577_v26 }
  0x8c   : > { %v608_v30 = vsel %vm607_vm5, %v584_v27, 0 }
  0x8e   : > { %v579_v28 = vpop.permute.xlu0 %578 }
  0x8f   : > { %v581_v29 = vsel %vm580_vm4, %v577_v26, %v579_v28  ;;  %v8432_v26 = vld [vmem:[%s11495_s1 + $0x88] sm:$0xff]  }
  0x90   : > { %7573 = vmatprep.subr.msk.bf16.mxu0 %vm607_vm5, %v581_v29  ;;  %8390 = vmatprep.subr.msk.bf16.mxu1 %vm607_vm5, %v581_v29  ;;  %v558_v33 = vpop.permute.xlu1 %557 }
  0x91   : > { %628 = vmatpush1.bf16.msra.mxu0 %v608_v30  ;;  %8391 = vmatpush1.bf16.msra.mxu1 %v608_v30  ;;  %v566_v35 = vsel %vm561_vm6, 0, %v558_v33 }
  0x92   : > { %v746_v34 = vpop.permute.xlu0 %745  ;;  %v682_v39 = vsel %vm607_vm5, %v566_v35, 0 }
  0x93   : > { %v753_v38 = vsel %vm749_vm8, 0, %v746_v34 }
  0x94   : > { %7574 = vmatmul.mubr.msk.bf16.vlgmr.msra.gmra.mxu0 %vm600_vm7, %v8415_v31  ;;  %7575 = vmatmul.mubr.msk.bf16.vlgmr.msra.gmra.mxu1 %vm600_vm7, %v8416_v32  ;;  %v560_v36 = vpop.permute.xlu1 %559  ;;  %v775_v43 = vsel %vm607_vm5, %v753_v38, 0 }
  0x95   : > { %719 = vmatprep.mubr.bf16.mxu1 %v11430_v4  ;;  %812 = vmatprep.mubr.bf16.mxu0 %v11430_v4  ;;  %v562_v37 = vsel %vm561_vm6, %v558_v33, %v560_v36 }
  0x96   : > { %7578 = vmatprep.subr.msk.bf16.mxu1 %vm607_vm5, %v562_v37  ;;  %v842_v40 = vpop.permute.xlu0 %841 }
  0x97   : > { %702 = vmatpush1.bf16.msra.mxu1 %v682_v39  ;;  %v849_v45 = vsel %vm845_vm9, 0, %v842_v40 }
  0x98   : > { %v748_v42 = vpop.permute.xlu1 %747  ;;  %v871_v48 = vsel %vm607_vm5, %v849_v45, 0 }
  0x99   : > { %v750_v44 = vsel %vm749_vm8, %v746_v34, %v748_v42 }
  0x9a   : > { %7589 = vmatprep.subr.msk.bf16.mxu0 %vm607_vm5, %v750_v44  ;;  %v1026_v52 = vpop.permute.xlu0 %1025 }
  0x9b   : > { %795 = vmatpush1.bf16.msra.mxu0 %v775_v43 }
  0x9c   : > { %7579 = vmatmul.mubr.msk.bf16.vlgmr.msra.gmra.mxu1 %vm600_vm7, %v8417_v41  ;;  %v844_v47 = vpop.permute.xlu1 %843  ;;  %7607 = vmatprep.subr.msk.bf16.mxu0 %vm607_vm5, %v8944_v11  ;;  %v8424_v11 = vld [vmem:[%s11495_s1 + $0x48] sm:$0xff]  }
  0x9d   : > { %729 = vmatprep.mubr.bf16.mxu1 %v11430_v4  ;;  %v846_v49 = vsel %vm845_vm9, %v842_v40, %v844_v47 }
  0x9e   : > { %7590 = vmatmul.mubr.msk.bf16.vlgmr.msra.gmra.mxu0 %vm600_vm7, %v8418_v46  ;;  %7598 = vmatprep.subr.msk.bf16.mxu1 %vm607_vm5, %v846_v49  ;;  %v1122_v59 = vpop.permute.xlu0 %1121 }
  0x9f   : > { %822 = vmatprep.mubr.bf16.mxu0 %v11430_v4  ;;  %891 = vmatpush1.bf16.msra.mxu1 %v871_v48 }
  0xa0   : > { %979 = vmatpush1.bf16.msra.mxu0 %v959_v50  ;;  %v1028_v53 = vpop.permute.xlu1 %1027 }
  0xa1   : > { %v1033_v54 = vsel %vm1029_vm10, %v1028_v53, 0  ;;  %v1030_v58 = vsel %vm1029_vm10, %v1026_v52, %v1028_v53 }
  0xa2   : > { %7616 = vmatprep.subr.msk.bf16.mxu1 %vm607_vm5, %v1033_v54  ;;  %v1056_v62 = vsel %vm607_vm5, %v1030_v58, 0  ;;  %v1218_v7 = vpop.permute.xlu0 %1217 }
  0xa4   : > { %7580 = vmatmul.mubr.msk.bf16.gmra.mxu1 %vm600_vm7, %v8419_v51  ;;  %v1124_v56 = vpop.permute.xlu1 %1123 }
  0xa5   : > { %908 = vmatprep.mubr.bf16.mxu1 %v11430_v4  ;;  %v1129_v57 = vsel %vm1125_vm11, %v1124_v56, 0  ;;  %v1126_v63 = vsel %vm1125_vm11, %v1122_v59, %v1124_v56 }
  0xa6   : > { %7591 = vmatmul.mubr.msk.bf16.gmra.mxu0 %vm600_vm7, %v8420_v55  ;;  %7625 = vmatprep.subr.msk.bf16.mxu0 %vm607_vm5, %v1129_v57  ;;  %v1152_v2 = vsel %vm607_vm5, %v1126_v63, 0  ;;  %v1314_v15 = vpop.permute.xlu0 %1313 }
  0xa7   : > { %996 = vmatprep.mubr.bf16.mxu0 %v11430_v4 }
  0xa8   : > { %v1220_v61 = vpop.permute.xlu1 %1219 }
  0xa9   : > { %v1225_v1 = vsel %vm1221_vm12, %v1220_v61, 0  ;;  %v1222_v14 = vsel %vm1221_vm12, %v1218_v7, %v1220_v61 }
  0xaa   : > { %v1248_v17 = vsel %vm607_vm5, %v1222_v14, 0 }
  0xac   : > { %7599 = vmatmul.mubr.msk.bf16.vlgmr.msra.gmra.mxu1 %vm600_vm7, %v8421_v60  ;;  %v1316_v3 = vpop.permute.xlu1 %1315 }
  0xad   : > { %918 = vmatprep.mubr.bf16.mxu1 %v11430_v4  ;;  %1075 = vmatpush1.bf16.msra.mxu1 %v1056_v62  ;;  %v1321_v5 = vsel %vm1317_vm13, %v1316_v3, 0  ;;  %v1318_v18 = vsel %vm1317_vm13, %v1314_v15, %v1316_v3 }
  0xae   : > { %7634 = vmatprep.subr.msk.bf16.mxu1 %vm607_vm5, %v1225_v1  ;;  %7608 = vmatmul.mubr.msk.bf16.vlgmr.msra.gmra.mxu0 %vm600_vm7, %v8422_v0  ;;  %v1344_v20 = vsel %vm607_vm5, %v1318_v18, 0 }
  0xaf   : > { %1006 = vmatprep.mubr.bf16.mxu0 %v11430_v4  ;;  %1171 = vmatpush1.bf16.msra.mxu0 %v1152_v2 }
  0xb0   : > { %7643 = vmatprep.subr.msk.bf16.mxu0 %vm607_vm5, %v1321_v5 }
  0xb4   : > { %7600 = vmatmul.mubr.msk.bf16.gmra.mxu1 %vm600_vm7, %v8423_v6 }
  0xb5   : > { %1092 = vmatprep.mubr.bf16.mxu1 %v11430_v4 }
  0xb6   : > { %7609 = vmatmul.mubr.msk.bf16.gmra.mxu0 %vm600_vm7, %v8424_v11 }
  0xb7   : > { %1188 = vmatprep.mubr.bf16.mxu0 %v11430_v4 }
  0xbc   : > { %7617 = vmatmul.mubr.msk.bf16.vlgmr.msra.gmra.mxu1 %vm600_vm7, %v8425_v16 }
  0xbd   : > { %1102 = vmatprep.mubr.bf16.mxu1 %v11430_v4  ;;  %1267 = vmatpush1.bf16.msra.mxu1 %v1248_v17 }
  0xbe   : > { %7626 = vmatmul.mubr.msk.bf16.vlgmr.msra.gmra.mxu0 %vm600_vm7, %v8426_v19 }
  0xbf   : > { %1198 = vmatprep.mubr.bf16.mxu0 %v11430_v4  ;;  %1363 = vmatpush1.bf16.msra.mxu0 %v1344_v20 }
  0xc4   : > { %7618 = vmatmul.mubr.msk.bf16.gmra.mxu1 %vm600_vm7, %v8427_v21 }
  0xc5   : > { %1284 = vmatprep.mubr.bf16.mxu1 %v11430_v4 }
  0xc6   : > { %7627 = vmatmul.mubr.msk.bf16.gmra.mxu0 %vm600_vm7, %v8428_v22 }
  0xc7   : > { %1380 = vmatprep.mubr.bf16.mxu0 %v11430_v4 }
  0xcc   : > { %7635 = vmatmul.mubr.msk.bf16.vlgmr.msra.gmra.mxu1 %vm600_vm7, %v8429_v23 }
  0xcd   : > { %1294 = vmatprep.mubr.bf16.mxu1 %v11430_v4 }
  0xce   : > { %7644 = vmatmul.mubr.msk.bf16.vlgmr.msra.gmra.mxu0 %vm600_vm7, %v8430_v24 }
  0xcf   : > { %1390 = vmatprep.mubr.bf16.mxu0 %v11430_v4 }
  0xd4   : > { %7636 = vmatmul.mubr.msk.bf16.gmra.mxu1 %vm600_vm7, %v8431_v25 }
  0xd5   : > { %1611 = vmatprep.mubr.bf16.mxu1 %v11430_v4 }
  0xd6   : > { %7645 = vmatmul.mubr.msk.bf16.gmra.mxu0 %vm600_vm7, %v8432_v26 }
  0xd7   : > { %1680 = vmatprep.mubr.bf16.mxu0 %v11430_v4 }
 0x154   : > { %v647_v27 = vpop.f32.mrf.mxu0  ;;  %v657_v28 = vpop.f32.mrf.mxu1 }
 0x156   : > { %v649_v29 = vpop.f32.mrf.mxu0  ;;  %v659_v30 = vpop.f32.mrf.mxu1 }
 0x158   : > { %v661_v31 = vpop.f32.mrf.mxu1  ;;  %v651_v32 = vpop.f32.mrf.mxu0 }
 0x15a   : > { %v9113_v33 = vpop.f32.mrf.mxu1  ;;  %v653_v35 = vpop.f32.mrf.mxu0 }
 0x15c   : > { %v721_v34 = vpop.f32.mrf.mxu1 }
 0x15d   : > { %v722_v1 = vadd.f32 %v721_v34, %v647_v27 }
 0x15e   : > { %v723_v36 = vpop.f32.mrf.mxu1  ;;  %v814_v37 = vpop.f32.mrf.mxu0 }
 0x15f   : > { %v724_v7 = vadd.f32 %v723_v36, %v649_v29  ;;  %v833_v11 = vadd.f32 %v814_v37, %v722_v1 }
 0x160   : > { %v725_v38 = vpop.f32.mrf.mxu1  ;;  %v816_v39 = vpop.f32.mrf.mxu0 }
 0x161   : > { %v726_v14 = vadd.f32 %v725_v38, %v651_v32  ;;  %v834_v21 = vadd.f32 %v816_v39, %v724_v7 }
 0x162   : > { %v727_v40 = vpop.f32.mrf.mxu1  ;;  %v818_v41 = vpop.f32.mrf.mxu0 }
 0x163   : > { %v728_v17 = vadd.f32 %v727_v40, %v653_v35  ;;  %v835_v22 = vadd.f32 %v818_v41, %v726_v14 }
 0x164   : > { %v731_v42 = vpop.f32.mrf.mxu1  ;;  %v820_v43 = vpop.f32.mrf.mxu0 }
 0x165   : > { %v732_v23 = vadd.f32 %v731_v42, %v657_v28  ;;  %v836_v27 = vadd.f32 %v820_v43, %v728_v17 }
 0x166   : > { %v733_v44 = vpop.f32.mrf.mxu1  ;;  %v824_v45 = vpop.f32.mrf.mxu0 }
 0x167   : > { %v734_v25 = vadd.f32 %v733_v44, %v659_v30  ;;  %v837_v32 = vadd.f32 %v824_v45, %v732_v23  ;;  %v9120_v44 = vpop.permute.xlu1 %1430 }
 0x168   : > { %v735_v46 = vpop.f32.mrf.mxu1  ;;  %v826_v47 = vpop.f32.mrf.mxu0 }
 0x169   : > { %v736_v29 = vadd.f32 %v735_v46, %v661_v31  ;;  %v838_v40 = vadd.f32 %v826_v47, %v734_v25 }
 0x16a   : > { %v737_v48 = vpop.f32.mrf.mxu1  ;;  %v828_v49 = vpop.f32.mrf.mxu0 }
 0x16b   : > { %v738_v39 = vadd.f32 %v737_v48, %v9113_v33  ;;  %v839_v43 = vadd.f32 %v828_v49, %v736_v29 }
 0x16c   : > { %v910_v50 = vpop.f32.mrf.mxu1  ;;  %v9115_v51 = vpop.f32.mrf.mxu0 }
 0x16d   : > { %v929_v18 = vadd.f32 %v910_v50, %v833_v11  ;;  %v840_v47 = vadd.f32 %v9115_v51, %v738_v39 }
 0x16e   : > { %v912_v52 = vpop.f32.mrf.mxu1  ;;  %v998_v53 = vpop.f32.mrf.mxu0 }
 0x16f   : > { %v930_v34 = vadd.f32 %v912_v52, %v834_v21  ;;  %v1017_v8 = vadd.f32 %v998_v53, %v929_v18 }
 0x170   : > { %v914_v54 = vpop.f32.mrf.mxu1  ;;  %v1000_v55 = vpop.f32.mrf.mxu0 }
 0x171   : > { %v931_v4 = vadd.f32 %v914_v54, %v835_v22  ;;  %v1018_v41 = vadd.f32 %v1000_v55, %v930_v34  ;;  %v1426_v55 = vpop.permute.xlu0 %1425 }
 0x172   : > { %v916_v56 = vpop.f32.mrf.mxu1  ;;  %v1002_v57 = vpop.f32.mrf.mxu0 }
 0x173   : > { %v932_v37 = vadd.f32 %v916_v56, %v836_v27  ;;  %v1019_v28 = vadd.f32 %v1002_v57, %v931_v4 }
 0x174   : > { %v920_v58 = vpop.f32.mrf.mxu1  ;;  %v1004_v59 = vpop.f32.mrf.mxu0 }
 0x175   : > { %v933_v42 = vadd.f32 %v920_v58, %v837_v32  ;;  %v1020_v54 = vadd.f32 %v1004_v59, %v932_v37 }
 0x176   : > { %v922_v60 = vpop.f32.mrf.mxu1  ;;  %v1008_v61 = vpop.f32.mrf.mxu0 }
 0x177   : > { %v934_v52 = vadd.f32 %v922_v60, %v838_v40 }
 0x178   : > { %v924_v62 = vpop.f32.mrf.mxu1  ;;  %v1010_v63 = vpop.f32.mrf.mxu0 }
 0x179   : > { %v1022_v57 = vadd.f32 %v1010_v63, %v934_v52 }
 0x17a   : > { %v926_v0 = vpop.f32.mrf.mxu1  ;;  %v1012_v2 = vpop.f32.mrf.mxu0 }
 0x17b   : > { %v936_v7 = vadd.f32 %v926_v0, %v840_v47 }
 0x17c   : > { %v1094_v3 = vpop.f32.mrf.mxu1  ;;  %v9117_v5 = vpop.f32.mrf.mxu0 }
 0x17d   : > { %v1113_v38 = vadd.f32 %v1094_v3, %v1017_v8  ;;  %v935_v8 = vadd.f32 %v924_v62, %v839_v43  ;;  %v1021_v3 = vadd.f32 %v1008_v61, %v933_v42  ;;  %v1024_v63 = vadd.f32 %v9117_v5, %v936_v7 }
 0x17e   : > { %v1096_v6 = vpop.f32.mrf.mxu1  ;;  %v1190_v15 = vpop.f32.mrf.mxu0 }
 0x17f   : > { %v1114_v31 = vadd.f32 %v1096_v6, %v1018_v41  ;;  %v1209_v46 = vadd.f32 %v1190_v15, %v1113_v38  ;;  %v1416_v6 = vpop.permute.xlu1 %1415  ;;  %v1023_v14 = vadd.f32 %v1012_v2, %v935_v8 }
 0x180   : > { %v1098_v16 = vpop.f32.mrf.mxu1  ;;  %v1192_v19 = vpop.f32.mrf.mxu0 }
 0x181   : > { %v1115_v45 = vadd.f32 %v1098_v16, %v1019_v28  ;;  %v1210_v49 = vadd.f32 %v1192_v19, %v1114_v31 }
 0x182   : > { %v1100_v20 = vpop.f32.mrf.mxu1  ;;  %v1194_v24 = vpop.f32.mrf.mxu0 }
 0x183   : > { %v1116_v33 = vadd.f32 %v1100_v20, %v1020_v54  ;;  %v1211_v60 = vadd.f32 %v1194_v24, %v1115_v45  ;;  %v1421_v24 = vpop.permute.xlu0 %1420 }
 0x184   : > { %v1104_v26 = vpop.f32.mrf.mxu1  ;;  %v1196_v13 = vpop.f32.mrf.mxu0 }
 0x185   : > { %v1117_v11 = vadd.f32 %v1104_v26, %v1021_v3  ;;  %v1212_v62 = vadd.f32 %v1196_v13, %v1116_v33 }
 0x186   : > { %v1106_v36 = vpop.f32.mrf.mxu1  ;;  %v1200_v35 = vpop.f32.mrf.mxu0 }
 0x187   : > { %v1118_v17 = vadd.f32 %v1106_v36, %v1022_v57  ;;  %v1213_v22 = vadd.f32 %v1200_v35, %v1117_v11 }
 0x188   : > { %v1108_v50 = vpop.f32.mrf.mxu1  ;;  %v1202_v30 = vpop.f32.mrf.mxu0 }
 0x189   : > { %v1119_v0 = vadd.f32 %v1108_v50, %v1023_v14  ;;  %v1214_v2 = vadd.f32 %v1202_v30, %v1118_v17 }
 0x18a   : > { %v1110_v53 = vpop.f32.mrf.mxu1  ;;  %v1204_v56 = vpop.f32.mrf.mxu0 }
 0x18b   : > { %v1120_v27 = vadd.f32 %v1110_v53, %v1024_v63  ;;  %v1215_v40 = vadd.f32 %v1204_v56, %v1119_v0 }
 0x18c   : > { %v1286_v1 = vpop.f32.mrf.mxu1  ;;  %v1206_v4 = vpop.f32.mrf.mxu0 }
 0x18d   : > { %v1305_v48 = vadd.f32 %v1286_v1, %v1209_v46  ;;  %v1216_v42 = vadd.f32 %v1206_v4, %v1120_v27 }
 0x18e   : > { %v1288_v58 = vpop.f32.mrf.mxu1  ;;  %v1382_v59 = vpop.f32.mrf.mxu0 }
 0x18f   : > { %v1401_v15 = vadd.f32 %v1382_v59, %v1305_v48  ;;  %v1306_v18 = vadd.f32 %v1288_v58, %v1210_v49 }
 0x190   : > { %v1290_v16 = vpop.f32.mrf.mxu1  ;;  %v1384_v61 = vpop.f32.mrf.mxu0 }
 0x191   : > { %v1307_v51 = vadd.f32 %v1290_v16, %v1211_v60  ;;  %v9123_v20 = vadd.f32 %v1416_v6, %v1401_v15  ;;  %v1402_v34 = vadd.f32 %v1384_v61, %v1306_v18 }
 0x192   : > { %v1292_v21 = vpop.f32.mrf.mxu1  ;;  %v1386_v23 = vpop.f32.mrf.mxu0 }
 0x193   : > { %v1308_v19 = vadd.f32 %v1292_v21, %v1212_v62  ;;  %v1403_v25 = vadd.f32 %v1386_v23, %v1307_v51  ;;  %v7646_v36 = vmul.f32 -1.442695, %v9123_v20  ;;  %v9132_v30 = vadd.f32 %v1416_v6, %v1402_v34 }
 0x194   : > { %v1296_v26 = vpop.f32.mrf.mxu1  ;;  %v1388_v29 = vpop.f32.mrf.mxu0 }
 0x195   : > { %v1309_v13 = vadd.f32 %v1296_v26, %v1213_v22  ;;  %v9127_v32 = vadd.f32 %v1421_v24, %v1403_v25  ;;  %v1404_v37 = vadd.f32 %v1388_v29, %v1308_v19  ;;  %8559 = vpow2.f32 %v7646_v36 }
 0x196   : > { %v1298_v38 = vpop.f32.mrf.mxu1  ;;  %v1392_v35 = vpop.f32.mrf.mxu0  ;;  %v7647_v3 = vmul.f32 -1.442695, %v9132_v30 }
 0x197   : > { %v1310_v5 = vadd.f32 %v1298_v38, %v1214_v2  ;;  %v7648_v50 = vmul.f32 -1.442695, %v9127_v32  ;;  %v9130_v39 = vadd.f32 %v1421_v24, %v1404_v37  ;;  %v1405_v41 = vadd.f32 %v1392_v35, %v1309_v13 }
 0x198   : > { %v1300_v28 = vpop.f32.mrf.mxu1  ;;  %v1394_v52 = vpop.f32.mrf.mxu0  ;;  %v9149_v35 = vpack.c.bf16 %v8937_v9, %v8937_v9 }
 0x199   : > { %v1311_v43 = vadd.f32 %v1300_v28, %v1215_v40  ;;  %v1437_v53 = vadd.f32 %v1426_v55, %v1405_v41  ;;  %v1406_v54 = vadd.f32 %v1394_v52, %v1310_v5  ;;  %8561 = vpow2.f32 %v7648_v50 }
 0x19a   : > { %v1302_v31 = vpop.f32.mrf.mxu1  ;;  %v7649_v46 = vmul.f32 -1.442695, %v9130_v39  ;;  %v1396_v56 = vpop.f32.mrf.mxu0  ;;  %11496 = vst [vmem:[#allocation3_spill] sm:$0xff] %v9149_v35  ;;  %v9176_v28 = vpack.c.bf16 %v8940_v10, %v8940_v10 }
 0x19b   : > { %v1312_v45 = vadd.f32 %v1302_v31, %v1216_v42  ;;  %v7650_v8 = vmul.f32 -1.442695, %v1437_v53  ;;  %v1438_v1 = vadd.f32 %v1426_v55, %v1406_v54  ;;  %v1407_v47 = vadd.f32 %v1396_v56, %v1311_v43  ;;  %v2389_v31 = vld [vmem:[%s11409_s4 + $0x10] sm:$0xff]  ;;  %v2388_v56 = vld [vmem:[%s11409_s4 + $0x8] sm:$0xff] }
 0x19c   : > { %v1398_v33 = vpop.f32.mrf.mxu0  ;;  %11498 = vst [vmem:[#allocation5_spill] sm:$0xff] %v9176_v28 }
 0x19d   : > { %8563 = vpow2.f32 %v7650_v8  ;;  %v7651_v48 = vmul.f32 -1.442695, %v1438_v1  ;;  %v1439_v4 = vadd.f32 %v9120_v44, %v1407_v47  ;;  %v1408_v57 = vadd.f32 %v1398_v33, %v1312_v45  ;;  %v2387_v45 = vld [vmem:[%s11409_s4] sm:$0xff] }
 0x19e   : > { %8565 = vpow2.f32 %v7649_v46  ;;  %v2390_v46 = vld [vmem:[%s11409_s4 + $0x18] sm:$0xff]  ;;  %v11504_v47 = vmov 0 }
 0x19f   : > { %8567 = vpow2.f32 %v7651_v48  ;;  %v7652_v58 = vmul.f32 -1.442695, %v1439_v4  ;;  %v1440_v7 = vadd.f32 %v9120_v44, %v1408_v57  ;;  %v11505_v47 = vsel %vm9235_vm14, 4294967295, %v11504_v47 }
 0x1a0   : > { %8569 = vpow2.f32 %v7647_v3  ;;  %11506 = vst [vmem:[#allocation6_spill] sm:$0xff] %v11505_v47 }
 0x1a1   : > { %8571 = vpow2.f32 %v7652_v58  ;;  %v7653_v49 = vmul.f32 -1.442695, %v1440_v7  ;;  %v8433_v58 = vld [vmem:[%s11408_s3 + $0x10] sm:$0xff]  }
 0x1a2   : > { %v8560_v60 = vpop.eup %8559 }
 0x1a3   : > { %8573 = vpow2.f32 %v7653_v49  ;;  %v1465_v11 = vadd.f32 1.0, %v8560_v60  ;;  %v11507_v60 = vmov 0  }
 0x1a5   : > { %8575 = vrcp.f32 %v1465_v11  ;;  %v11508_v11 = vmov 0 }
 0x1a6   : > { %v8562_v55 = vpop.eup %8561  ;;  %v11509_v11 = vsel %vm9251_vm0, 4294967295, %v11508_v11 }
 0x1a7   : > { %v1467_v6 = vadd.f32 1.0, %v8562_v55  ;;  %11510 = vst [vmem:[#allocation7_spill] sm:$0xff] %v11509_v11 }
 0x1a9   : > { %8577 = vrcp.f32 %v1467_v6 }
 0x1aa   : > { %v8564_v59 = vpop.eup %8563 }
 0x1ab   : > { %v8566_v14 = vpop.eup %8565  ;;  %v1469_v15 = vadd.f32 1.0, %v8564_v59 }
 0x1ac   : > { %v8568_v16 = vpop.eup %8567  ;;  %v1468_v51 = vadd.f32 1.0, %v8566_v14  ;;  %v8434_v14 = vld [vmem:[%s11408_s3 + $0x18] sm:$0xff]  }
 0x1ad   : > { %v8570_v62 = vpop.eup %8569  ;;  %v1470_v17 = vadd.f32 1.0, %v8568_v16  ;;  %8579 = vrcp.f32 %v1469_v15 }
 0x1ae   : > { %v8572_v18 = vpop.eup %8571  ;;  %v1466_v21 = vadd.f32 1.0, %v8570_v62  ;;  %v11511_v62 = vmov 0 }
 0x1af   : > { %v1471_v44 = vadd.f32 1.0, %v8572_v18  ;;  %8581 = vrcp.f32 %v1470_v17  ;;  %v11512_v62 = vsel %vm9263_vm1, 4294967295, %v11511_v62 }
 0x1b0   : > { %v8574_v61 = vpop.eup %8573  ;;  %11513 = vst [vmem:[#allocation8_spill] sm:$0xff] %v11512_v62 }
 0x1b1   : > { %8583 = vrcp.f32 %v1471_v44  ;;  %v1472_v63 = vadd.f32 1.0, %v8574_v61 }
 0x1b2   : > { %8585 = vrcp.f32 %v1468_v51  ;;  %v8576_v22 = vpop.eup %8575  ;;  %v8435_v51 = vld [vmem:[%s11408_s3] sm:$0xff]  }
 0x1b3   : > { %8587 = vrcp.f32 %v1472_v63  ;;  %v1489_v38 = vmul.f32 %v8576_v22, %v9123_v20  ;;  %v9158_v20 = vpack.c.bf16 %v8947_v12, %v8947_v12  ;;  %v8436_v63 = vld [vmem:[%s11408_s3 + $0x20] sm:$0xff]  }
 0x1b4   : > { %8589 = vrcp.f32 %v1466_v21 }
 0x1b5   : > { %11497 = vst [vmem:[#allocation4_spill] sm:$0xff] %v9158_v20 }
 0x1b6   : > { %v8578_v0 = vpop.eup %8577 }
 0x1b7   : > { %v1491_v34 = vmul.f32 %v8578_v0, %v9127_v32  ;;  %v11514_v0 = vmov 0 }
 0x1b8   : > { %v11515_v0 = vsel %vm9287_vm2, 4294967295, %v11514_v0 }
 0x1b9   : > { %v9152_v50 = vpack.c.bf16 %v1491_v34, %v1489_v38  ;;  %11516 = vst [vmem:[#allocation9_spill] sm:$0xff] %v11515_v0 }
 0x1ba   : > { %v8580_v19 = vpop.eup %8579 }
 0x1bb   : > { %v1493_v26 = vmul.f32 %v8580_v19, %v1437_v53  ;;  %v1501_v9 = vmul.bf16 %v9152_v50, %v9149_v35  ;;  %v1505_v53 = vmul.bf16 %v9152_v50, %v9176_v28 }
 0x1bc   : > { %v8582_v23 = vpop.eup %8581 }
 0x1bd   : > { %v1494_v13 = vmul.f32 %v8582_v23, %v1438_v1 }
 0x1be   : > { %v8584_v24 = vpop.eup %8583 }
 0x1bf   : > { %v8586_v25 = vpop.eup %8585  ;;  %v1495_v2 = vmul.f32 %v8584_v24, %v1439_v4  ;;  %v8437_v24 = vld [vmem:[%s11408_s3 + $0x8] sm:$0xff]  }
 0x1c0   : > { %v8588_v27 = vpop.eup %8587  ;;  %v1492_v40 = vmul.f32 %v8586_v25, %v9130_v39 }
 0x1c1   : > { %v9139_v29 = vpack.c.bf16 %v1495_v2, %v1493_v26  ;;  %v1496_v36 = vmul.f32 %v8588_v27, %v1440_v7  ;;  %v8590_v37 = vpop.eup %8589  ;;  %v8438_v27 = vld [vmem:[%s11408_s3 + $0x28] sm:$0xff]  }
 0x1c2   : > { %v1490_v32 = vmul.f32 %v8590_v37, %v9132_v30  ;;  %v11499_v30 = vld [vmem:[#allocation2_spill] sm:$0xff] }
 0x1c3   : > { %v9143_v5 = vpack.c.bf16 %v1496_v36, %v1494_v13  ;;  %1543 = vrot.lane.b32.xlu1 %v9139_v29, %s11456_s24  ;;  %v1503_v12 = vmul.bf16 %v9139_v29, %v9149_v35  ;;  %v9183_v43 = vpack.c.bf16 %v11499_v30, %v11499_v30  ;;  %v1507_v52 = vmul.bf16 %v9139_v29, %v9176_v28  ;;  %v8442_v30 = vld [vmem:[%s11408_s3 + $0x48] sm:$0xff]  }
 0x1c4   : > { %v9160_v39 = vpack.c.bf16 %v1492_v40, %v1490_v32  ;;  %v8440_v40 = vld [vmem:[%s11408_s3 + $0x40] sm:$0xff]  }
 0x1c5   : > { %1545 = vrot.lane.b32.xlu0 %v9143_v5, %s11456_s24  ;;  %v1504_v42 = vmul.bf16 %v9143_v5, %v9158_v20  ;;  %11500 = vst [vmem:[#allocation2_spill] sm:$0xff] %v9183_v43  ;;  %v1508_v10 = vmul.bf16 %v9143_v5, %v9183_v43 }
 0x1c6   : > { %v1502_v41 = vmul.bf16 %v9160_v39, %v9158_v20  ;;  %v1506_v54 = vmul.bf16 %v9160_v39, %v9183_v43 }
 0x1c7   : > { %1539 = vrot.lane.b32.xlu1 %v9152_v50, %s11456_s24 }
 0x1c9   : > { %1541 = vrot.lane.b32.xlu0 %v9160_v39, %s11456_s24 }
 0x1cb   : > { %1513 = vrot.lane.b32.xlu1 %v1501_v9, %s11437_s25 }
 0x1cd   : > { %1515 = vrot.lane.b32.xlu0 %v1502_v41, %s11437_s25 }
 0x1cf   : > { %1517 = vrot.lane.b32.xlu1 %v1503_v12, %s11437_s25 }
 0x1d1   : > { %1519 = vrot.lane.b32.xlu0 %v1504_v42, %s11437_s25 }
 0x1d3   : > { %1709 = vrot.lane.b32.xlu1 %v1507_v52, %s11433_s26 }
 0x1d5   : > { %1711 = vrot.lane.b32.xlu0 %v1508_v10, %s11433_s26 }
 0x1d7   : > { %1705 = vrot.lane.b32.xlu1 %v1505_v53, %s11433_s26 }
 0x1d9   : > { %1707 = vrot.lane.b32.xlu0 %v1506_v54, %s11433_s26 }
 0x1db   : > { %1809 = vrot.lane.b32.xlu1 %v1503_v12, %s11501_s17 }
 0x1dd   : > { %1811 = vrot.lane.b32.xlu0 %v1504_v42, %s11501_s17 }
 0x1df   : > { %1805 = vrot.lane.b32.xlu1 %v1501_v9, %s11501_s17 }
 0x1e1   : > { %1807 = vrot.lane.b32.xlu0 %v1502_v41, %s11501_s17 }
 0x1e3   : > { %1991 = vrot.lane.b32.xlu1 %v1507_v52, %s11502_s21 }
 0x1e5   : > { %1989 = vrot.lane.b32.xlu0 %v1506_v54, %s11502_s21 }
 0x1e7   : > { %2091 = vrot.lane.b32.xlu1 %v1503_v12, %s11503_s22 }
 0x1e9   : > { %1993 = vrot.lane.b32.xlu0 %v1508_v10, %s11502_s21 }
 0x1eb   : > { %1987 = vrot.lane.b32.xlu1 %v1505_v53, %s11502_s21 }
 0x1ed   : > { %2093 = vrot.lane.b32.xlu0 %v1504_v42, %s11503_s22 }
 0x1ef   : > { %2087 = vrot.lane.b32.xlu1 %v1501_v9, %s11503_s22  ;;  %v8441_v9 = vld [vmem:[%s11408_s3 + $0x38] sm:$0xff]  }
 0x1f1   : > { %2089 = vrot.lane.b32.xlu0 %v1502_v41, %s11503_s22 }
 0x1f3   : > { %2191 = vrot.lane.b32.xlu1 %v9139_v29, %s11435_s30 }
 0x1f5   : > { %2193 = vrot.lane.b32.xlu0 %v9143_v5, %s11435_s30 }
 0x1f7   : > { %2291 = vrot.lane.b32.xlu1 %v1507_v52, %s11458_s16 }
 0x1f9   : > { %2189 = vrot.lane.b32.xlu0 %v9160_v39, %s11435_s30 }
 0x1fb   : > { %2187 = vrot.lane.b32.xlu1 %v9152_v50, %s11435_s30 }
 0x1fd   : > { %2293 = vrot.lane.b32.xlu0 %v1508_v10, %s11458_s16 }
 0x1ff   : > { %2287 = vrot.lane.b32.xlu1 %v1505_v53, %s11458_s16  ;;  %v8443_v53 = vld [vmem:[%s11408_s3 + $0x50] sm:$0xff]  }
 0x201   : > { %2289 = vrot.lane.b32.xlu0 %v1506_v54, %s11458_s16 }
 0x203   : > { %2403 = vperm.xlu1 %8412, %v2389_v31  }
 0x205   : > { %2408 = vperm.xlu0 %8411, %v2390_v46  }
 0x207   : > { %2393 = vperm.xlu1 %8412, %v2387_v45   ;;  %v8444_v45 = vld [vmem:[%s11408_s3 + $0x60] sm:$0xff]  }
 0x209   : > { %2398 = vperm.xlu0 %8411, %v2388_v56  }
 0x235   : > { %v1544_v8 = vpop.permute.xlu1 %1543 }
 0x237   : > { %v1546_v1 = vpop.permute.xlu0 %1545 }
 0x238   : > { %v1548_v3 = vsel %vm580_vm4, %v1544_v8, %v1546_v1 }
 0x239   : > { %1591 = vmatprep.subr.bf16.mxu1 %v1548_v3  ;;  %v1540_v33 = vpop.permute.xlu1 %1539  ;;  %v8445_v3 = vld [vmem:[%s11408_s3 + $0x58] sm:$0xff]  }
 0x23a   : > { %7661 = vmatpush1.bf16.msk.msra.mxu1 %vm9235_vm14, %v1544_v8 }
 0x23b   : > { %v1542_v48 = vpop.permute.xlu0 %1541 }
 0x23c   : > { %v1547_v4 = vsel %vm580_vm4, %v1540_v33, %v1542_v48 }
 0x23d   : > { %1593 = vmatprep.subr.bf16.mxu1 %v1547_v4  ;;  %v1514_v57 = vpop.permute.xlu1 %1513 }
 0x23e   : > { %7663 = vmatpush1.bf16.msk.msra.mxu1 %vm9235_vm14, %v1540_v33 }
 0x23f   : > { %v1516_v7 = vpop.permute.xlu0 %1515 }
 0x240   : > { %v1521_v15 = vsel %vm561_vm6, %v1514_v57, %v1516_v7  ;;  %v8448_v7 = vld [vmem:[%s11408_s3 + $0x80] sm:$0xff]  }
 0x241   : > { %7664 = vmatmul.mubr.msk.bf16.vlgmr.msra.gmra.mxu1 %vm1572_vm15, %v8433_v58  ;;  %v1518_v49 = vpop.permute.xlu1 %1517  ;;  %v8447_v58 = vld [vmem:[%s11408_s3 + $0x70] sm:$0xff]  }
 0x242   : > { %1621 = vmatprep.mubr.bf16.mxu1 %v11507_v60 }
 0x243   : > { %v1520_v55 = vpop.permute.xlu0 %1519 }
 0x244   : > { %v1522_v59 = vsel %vm561_vm6, %v1518_v49, %v1520_v55  ;;  %v8450_v55 = vld [vmem:[%s11408_s3 + $0x88] sm:$0xff]  }
 0x245   : > { %1660 = vmatprep.subr.bf16.mxu0 %v1522_v59  ;;  %v1710_v6 = vpop.permute.xlu1 %1709 }
 0x246   : > { %7669 = vmatpush1.bf16.msk.msra.mxu0 %vm9251_vm0, %v1518_v49  ;;  %v8449_v49 = vld [vmem:[%s11408_s3 + $0x78] sm:$0xff]  }
 0x247   : > { %v1712_v16 = vpop.permute.xlu0 %1711  ;;  %1662 = vmatprep.subr.bf16.mxu0 %v1521_v15 }
 0x248   : > { %v1714_v17 = vsel %vm749_vm8, %v1710_v6, %v1712_v16 }
 0x249   : > { %7665 = vmatmul.mubr.msk.bf16.gmra.mxu1 %vm1572_vm15, %v8434_v14  ;;  %1756 = vmatprep.subr.bf16.mxu1 %v1714_v17  ;;  %v1706_v18 = vpop.permute.xlu1 %1705 }
 0x24a   : > { %7671 = vmatpush1.bf16.msk.msra.mxu0 %vm9251_vm0, %v1514_v57  ;;  %7681 = vmatpush1.bf16.msk.msra.mxu1 %vm9263_vm1, %v1710_v6  ;;  %v8446_v57 = vld [vmem:[%s11408_s3 + $0x68] sm:$0xff]  }
 0x24b   : > { %v1708_v44 = vpop.permute.xlu0 %1707  ;;  %1776 = vmatprep.mubr.bf16.mxu1 %v11507_v60 }
 0x24c   : > { %v1713_v61 = vsel %vm749_vm8, %v1706_v18, %v1708_v44 }
 0x24d   : > { %7672 = vmatmul.mubr.msk.bf16.vlgmr.msra.gmra.mxu0 %vm1572_vm15, %v8435_v51  ;;  %1758 = vmatprep.subr.bf16.mxu1 %v1713_v61  ;;  %v1810_v21 = vpop.permute.xlu1 %1809 }
 0x24e   : > { %7683 = vmatpush1.bf16.msk.msra.mxu1 %vm9263_vm1, %v1706_v18  ;;  %1690 = vmatprep.mubr.bf16.mxu0 %v11507_v60 }
 0x24f   : > { %v1812_v22 = vpop.permute.xlu0 %1811  ;;  %1938 = vmatprep.subr.bf16.mxu1 %v9143_v5 }
 0x250   : > { %v1814_v19 = vsel %vm845_vm9, %v1810_v21, %v1812_v22 }
 0x251   : > { %7684 = vmatmul.mubr.msk.bf16.vlgmr.msra.gmra.mxu1 %vm1572_vm15, %v8436_v63  ;;  %1856 = vmatprep.subr.bf16.mxu0 %v1814_v19  ;;  %v1806_v23 = vpop.permute.xlu1 %1805 }
 0x252   : > { %7693 = vmatpush1.bf16.msk.msra.mxu0 %vm9287_vm2, %v1810_v21  ;;  %1939 = vmatpush1.bf16.msra.mxu1 %v9139_v29  ;;  %v8439_v29 = vld [vmem:[%s11408_s3 + $0x30] sm:$0xff]  }
 0x253   : > { %v1808_v25 = vpop.permute.xlu0 %1807  ;;  %1940 = vmatprep.subr.bf16.mxu1 %v9160_v39  ;;  %1786 = vmatprep.mubr.bf16.mxu1 %v11507_v60 }
 0x254   : > { %v1813_v26 = vsel %vm845_vm9, %v1806_v23, %v1808_v25 }
 0x255   : > { %7673 = vmatmul.mubr.msk.bf16.gmra.mxu0 %vm1572_vm15, %v8437_v24  ;;  %1858 = vmatprep.subr.bf16.mxu0 %v1813_v26  ;;  %v1992_v2 = vpop.permute.xlu1 %1991 }
 0x256   : > { %7695 = vmatpush1.bf16.msk.msra.mxu0 %vm9287_vm2, %v1806_v23  ;;  %1941 = vmatpush1.bf16.msra.mxu1 %v9152_v50 }
 0x257   : > { %v1990_v34 = vpop.permute.xlu0 %1989  ;;  %1876 = vmatprep.mubr.bf16.mxu0 %v11507_v60 }
 0x259   : > { %7685 = vmatmul.mubr.msk.bf16.gmra.mxu1 %vm1572_vm15, %v8438_v27  ;;  %v2092_v13 = vpop.permute.xlu1 %2091 }
 0x25a   : > { %1958 = vmatprep.mubr.bf16.mxu1 %v11507_v60 }
 0x25b   : > { %v1994_v36 = vpop.permute.xlu0 %1993 }
 0x25c   : > { %7712 = vmatprep.subr.msk.bf16.mxu0 %vm1029_vm10, %v1994_v36  ;;  %v1996_v37 = vsel %vm1029_vm10, %v1992_v2, %v1994_v36 }
 0x25d   : > { %7696 = vmatmul.mubr.msk.bf16.vlgmr.msra.gmra.mxu0 %vm1572_vm15, %v8439_v29  ;;  %v1988_v38 = vpop.permute.xlu1 %1987 }
 0x25e   : > { %2039 = vmatpush1.bf16.msra.mxu0 %v1996_v37  ;;  %1886 = vmatprep.mubr.bf16.mxu0 %v11507_v60  ;;  %v1995_v50 = vsel %vm1029_vm10, %v1988_v38, %v1990_v34 }
 0x25f   : > { %7713 = vmatprep.subr.msk.bf16.mxu0 %vm1029_vm10, %v1990_v34  ;;  %v2094_v5 = vpop.permute.xlu0 %2093 }
 0x260   : > { %7722 = vmatprep.subr.msk.bf16.mxu1 %vm1125_vm11, %v2094_v5  ;;  %v2096_v32 = vsel %vm1125_vm11, %v2092_v13, %v2094_v5 }
 0x261   : > { %7704 = vmatmul.mubr.msk.bf16.vlgmr.msra.gmra.mxu1 %vm1572_vm15, %v8440_v40  ;;  %v2088_v39 = vpop.permute.xlu1 %2087 }
 0x262   : > { %2041 = vmatpush1.bf16.msra.mxu0 %v1995_v50  ;;  %2139 = vmatpush1.bf16.msra.mxu1 %v2096_v32 }
 0x263   : > { %v2090_v41 = vpop.permute.xlu0 %2089  ;;  %1968 = vmatprep.mubr.bf16.mxu1 %v11507_v60 }
 0x264   : > { %7723 = vmatprep.subr.msk.bf16.mxu1 %vm1125_vm11, %v2090_v41  ;;  %v2095_v12 = vsel %vm1125_vm11, %v2088_v39, %v2090_v41 }
 0x265   : > { %7697 = vmatmul.mubr.msk.bf16.gmra.mxu0 %vm1572_vm15, %v8441_v9  ;;  %v2192_v42 = vpop.permute.xlu1 %2191 }
 0x266   : > { %2141 = vmatpush1.bf16.msra.mxu1 %v2095_v12  ;;  %2058 = vmatprep.mubr.bf16.mxu0 %v11507_v60 }
 0x267   : > { %v2194_v52 = vpop.permute.xlu0 %2193 }
 0x268   : > { %7732 = vmatprep.subr.msk.bf16.mxu0 %vm1221_vm12, %v2194_v52  ;;  %v2196_v31 = vsel %vm1221_vm12, %v2192_v42, %v2194_v52 }
 0x269   : > { %7705 = vmatmul.mubr.msk.bf16.gmra.mxu1 %vm1572_vm15, %v8442_v30  ;;  %v2292_v10 = vpop.permute.xlu1 %2291 }
 0x26a   : > { %2158 = vmatprep.mubr.bf16.mxu1 %v11507_v60 }
 0x26b   : > { %v2190_v54 = vpop.permute.xlu0 %2189 }
 0x26d   : > { %7714 = vmatmul.mubr.msk.bf16.vlgmr.msra.gmra.mxu0 %vm1572_vm15, %v8443_v53  ;;  %v2188_v46 = vpop.permute.xlu1 %2187 }
 0x26e   : > { %2239 = vmatpush1.bf16.msra.mxu0 %v2196_v31  ;;  %2068 = vmatprep.mubr.bf16.mxu0 %v11507_v60  ;;  %v2195_v1 = vsel %vm1221_vm12, %v2188_v46, %v2190_v54 }
 0x26f   : > { %7733 = vmatprep.subr.msk.bf16.mxu0 %vm1221_vm12, %v2190_v54  ;;  %v2294_v56 = vpop.permute.xlu0 %2293 }
 0x270   : > { %7742 = vmatprep.subr.msk.bf16.mxu1 %vm1317_vm13, %v2294_v56  ;;  %v2296_v8 = vsel %vm1317_vm13, %v2292_v10, %v2294_v56 }
 0x271   : > { %7724 = vmatmul.mubr.msk.bf16.vlgmr.msra.gmra.mxu1 %vm1572_vm15, %v8444_v45  ;;  %v2288_v33 = vpop.permute.xlu1 %2287 }
 0x272   : > { %2241 = vmatpush1.bf16.msra.mxu0 %v2195_v1  ;;  %2339 = vmatpush1.bf16.msra.mxu1 %v2296_v8 }
 0x273   : > { %v2290_v48 = vpop.permute.xlu0 %2289  ;;  %2168 = vmatprep.mubr.bf16.mxu1 %v11507_v60 }
 0x274   : > { %7743 = vmatprep.subr.msk.bf16.mxu1 %vm1317_vm13, %v2290_v48  ;;  %v2295_v4 = vsel %vm1317_vm13, %v2288_v33, %v2290_v48 }
 0x275   : > { %7715 = vmatmul.mubr.msk.bf16.gmra.mxu0 %vm1572_vm15, %v8445_v3 }
 0x276   : > { %2341 = vmatpush1.bf16.msra.mxu1 %v2295_v4  ;;  %2258 = vmatprep.mubr.bf16.mxu0 %v11507_v60 }
 0x279   : > { %7725 = vmatmul.mubr.msk.bf16.gmra.mxu1 %vm1572_vm15, %v8446_v57 }
 0x27a   : > { %2358 = vmatprep.mubr.bf16.mxu1 %v11507_v60 }
 0x27d   : > { %7734 = vmatmul.mubr.msk.bf16.vlgmr.msra.gmra.mxu0 %vm1572_vm15, %v8447_v58 }
 0x27e   : > { %2268 = vmatprep.mubr.bf16.mxu0 %v11507_v60  ;;  %v9414_v35 = vpop.permute.xlu1 %2403 }
 0x281   : > { %7744 = vmatmul.mubr.msk.bf16.vlgmr.msra.gmra.mxu1 %vm1572_vm15, %v8448_v7 }
 0x282   : > { %2368 = vmatprep.mubr.bf16.mxu1 %v11507_v60 }
 0x285   : > { %7735 = vmatmul.mubr.msk.bf16.gmra.mxu0 %vm1572_vm15, %v8449_v49 }
 0x286   : > { %2612 = vmatprep.mubr.bf16.mxu0 %v11507_v60 }
 0x289   : > { %7745 = vmatmul.mubr.msk.bf16.gmra.mxu1 %vm1572_vm15, %v8450_v55 }
 0x28a   : > { %2717 = vmatprep.mubr.bf16.mxu1 %v11507_v60 }
 0x301   : > { %v1613_v59 = vpop.f32.mrf.mxu1 }
 0x303   : > { %v1615_v6 = vpop.f32.mrf.mxu1 }
 0x305   : > { %v1617_v14 = vpop.f32.mrf.mxu1 }
 0x307   : > { %v1619_v15 = vpop.f32.mrf.mxu1 }
 0x309   : > { %v1623_v16 = vpop.f32.mrf.mxu1 }
 0x30b   : > { %v9388_v17 = vpop.f32.mrf.mxu1 }
 0x30d   : > { %v9390_v18 = vpop.f32.mrf.mxu1  ;;  %v1682_v51 = vpop.f32.mrf.mxu0 }
 0x30e   : > { %v1683_v3 = vadd.f32 %v1682_v51, %v1613_v59 }
 0x30f   : > { %v9392_v44 = vpop.f32.mrf.mxu1  ;;  %v1684_v61 = vpop.f32.mrf.mxu0 }
 0x310   : > { %v1685_v55 = vadd.f32 %v1684_v61, %v1615_v6 }
 0x311   : > { %v1686_v21 = vpop.f32.mrf.mxu0  ;;  %v1778_v63 = vpop.f32.mrf.mxu1 }
 0x312   : > { %v1797_v4 = vadd.f32 %v1778_v63, %v1683_v3  ;;  %v1687_v7 = vadd.f32 %v1686_v21, %v1617_v14 }
 0x313   : > { %v1688_v22 = vpop.f32.mrf.mxu0  ;;  %v1780_v19 = vpop.f32.mrf.mxu1 }
 0x314   : > { %v1689_v47 = vadd.f32 %v1688_v22, %v1619_v15  ;;  %v1798_v43 = vadd.f32 %v1780_v19, %v1685_v55 }
 0x315   : > { %v1692_v23 = vpop.f32.mrf.mxu0  ;;  %v1782_v24 = vpop.f32.mrf.mxu1 }
 0x316   : > { %v1799_v11 = vadd.f32 %v1782_v24, %v1687_v7  ;;  %v1693_v59 = vadd.f32 %v1692_v23, %v1623_v16 }
 0x317   : > { %v1694_v25 = vpop.f32.mrf.mxu0  ;;  %v1784_v26 = vpop.f32.mrf.mxu1 }
 0x318   : > { %v1800_v3 = vadd.f32 %v1784_v26, %v1689_v47  ;;  %v1695_v6 = vadd.f32 %v1694_v25, %v9388_v17 }
 0x319   : > { %v1696_v2 = vpop.f32.mrf.mxu0  ;;  %v1788_v27 = vpop.f32.mrf.mxu1 }
 0x31a   : > { %v1801_v61 = vadd.f32 %v1788_v27, %v1693_v59  ;;  %v1697_v15 = vadd.f32 %v1696_v2, %v9390_v18  ;;  %v2394_v18 = vpop.permute.xlu1 %2393 }
 0x31b   : > { %v9394_v34 = vpop.f32.mrf.mxu0  ;;  %v1790_v13 = vpop.f32.mrf.mxu1 }
 0x31c   : > { %v1802_v16 = vadd.f32 %v1790_v13, %v1695_v6 }
 0x31d   : > { %v9396_v29 = vpop.f32.mrf.mxu1  ;;  %v1878_v36 = vpop.f32.mrf.mxu0 }
 0x31e   : > { %v1897_v49 = vadd.f32 %v1878_v36, %v1797_v4  ;;  %v9418_v4 = vpop.permute.xlu0 %2408  ;;  %v1803_v17 = vadd.f32 %v9396_v29, %v1697_v15 }
 0x31f   : > { %v9398_v37 = vpop.f32.mrf.mxu1  ;;  %v1880_v38 = vpop.f32.mrf.mxu0 }
 0x321   : > { %v1882_v40 = vpop.f32.mrf.mxu0  ;;  %v1960_v5 = vpop.f32.mrf.mxu1 }
 0x322   : > { %v1979_v60 = vadd.f32 %v1960_v5, %v1897_v49  ;;  %v1899_v51 = vadd.f32 %v1882_v40, %v1799_v11 }
 0x323   : > { %v1884_v32 = vpop.f32.mrf.mxu0  ;;  %v1962_v50 = vpop.f32.mrf.mxu1 }
 0x324   : > { %v1900_v22 = vadd.f32 %v1884_v32, %v1800_v3 }
 0x325   : > { %v1888_v39 = vpop.f32.mrf.mxu0  ;;  %v1964_v9 = vpop.f32.mrf.mxu1 }
 0x326   : > { %v1981_v21 = vadd.f32 %v1964_v9, %v1899_v51  ;;  %v1901_v11 = vadd.f32 %v1888_v39, %v1801_v61 }
 0x327   : > { %v1890_v41 = vpop.f32.mrf.mxu0  ;;  %v1966_v12 = vpop.f32.mrf.mxu1 }
 0x328   : > { %v1982_v23 = vadd.f32 %v1966_v12, %v1900_v22  ;;  %v1902_v2 = vadd.f32 %v1890_v41, %v1802_v16 }
 0x329   : > { %v9400_v42 = vpop.f32.mrf.mxu0  ;;  %v1970_v30 = vpop.f32.mrf.mxu1 }
 0x32a   : > { %v1903_v13 = vadd.f32 %v9400_v42, %v1803_v17 }
 0x32b   : > { %v9402_v52 = vpop.f32.mrf.mxu0  ;;  %v9404_v10 = vpop.f32.mrf.mxu1 }
 0x32d   : > { %v9406_v53 = vpop.f32.mrf.mxu1  ;;  %v2060_v54 = vpop.f32.mrf.mxu0 }
 0x32e   : > { %v2079_v63 = vadd.f32 %v2060_v54, %v1979_v60  ;;  %v1985_v41 = vadd.f32 %v9406_v53, %v1903_v13 }
 0x32f   : > { %v9408_v31 = vpop.f32.mrf.mxu1  ;;  %v2062_v46 = vpop.f32.mrf.mxu0 }
 0x330   : > { %11517 = vst [vmem:[#allocation10_spill] sm:$0xff] %v9408_v31  ;;  %v1898_v31 = vadd.f32 %v1880_v38, %v1798_v43  ;;  %v1699_v43 = vadd.f32 %v9394_v34, %v9392_v44  ;;  %v1983_v38 = vadd.f32 %v1970_v30, %v1901_v11  ;;  %v1984_v44 = vadd.f32 %v9404_v10, %v1902_v2 }
 0x331   : > { %v2064_v45 = vpop.f32.mrf.mxu0  ;;  %v2160_v56 = vpop.f32.mrf.mxu1 }
 0x332   : > { %v2179_v24 = vadd.f32 %v2160_v56, %v2079_v63  ;;  %v1980_v19 = vadd.f32 %v1962_v50, %v1898_v31  ;;  %v2081_v60 = vadd.f32 %v2064_v45, %v1981_v21  ;;  %v1804_v50 = vadd.f32 %v9398_v37, %v1699_v43 }
 0x333   : > { %v2066_v8 = vpop.f32.mrf.mxu0  ;;  %v2162_v1 = vpop.f32.mrf.mxu1 }
 0x334   : > { %v2080_v25 = vadd.f32 %v2062_v46, %v1980_v19  ;;  %v2082_v39 = vadd.f32 %v2066_v8, %v1982_v23  ;;  %v1904_v46 = vadd.f32 %v9402_v52, %v1804_v50 }
 0x335   : > { %v2070_v33 = vpop.f32.mrf.mxu0  ;;  %v2164_v48 = vpop.f32.mrf.mxu1 }
 0x336   : > { %v2181_v40 = vadd.f32 %v2164_v48, %v2081_v60  ;;  %v2180_v9 = vadd.f32 %v2162_v1, %v2080_v25  ;;  %v2083_v34 = vadd.f32 %v2070_v33, %v1983_v38  ;;  %v2399_v48 = vpop.permute.xlu0 %2398 }
 0x337   : > { %v9410_v57 = vpop.f32.mrf.mxu0  ;;  %v2166_v58 = vpop.f32.mrf.mxu1  ;;  %v11520_v49 = vld [vmem:[#allocation10_spill] sm:$0xff] }
 0x338   : > { %11518 = vst [vmem:[#allocation11_spill] sm:$0xff] %v9410_v57  ;;  %v2182_v30 = vadd.f32 %v2166_v58, %v2082_v39  ;;  %v1986_v55 = vadd.f32 %v11520_v49, %v1904_v46 }
 0x339   : > { %v2074_v0 = vpop.f32.mrf.mxu0  ;;  %v2170_v62 = vpop.f32.mrf.mxu1 }
 0x33a   : > { %v2183_v1 = vadd.f32 %v2170_v62, %v2083_v34  ;;  %v2085_v10 = vadd.f32 %v2074_v0, %v1985_v41 }
 0x33b   : > { %v9412_v28 = vpop.f32.mrf.mxu0  ;;  %v2172_v20 = vpop.f32.mrf.mxu1 }
 0x33d   : > { %v2174_v57 = vpop.f32.mrf.mxu1  ;;  %v2260_v14 = vpop.f32.mrf.mxu0 }
 0x33e   : > { %v2279_v47 = vadd.f32 %v2260_v14, %v2179_v24  ;;  %v2086_v14 = vadd.f32 %v9412_v28, %v1986_v55  ;;  %v2185_v62 = vadd.f32 %v2174_v57, %v2085_v10 }
 0x33f   : > { %v2176_v36 = vpop.f32.mrf.mxu1  ;;  %v2262_v5 = vpop.f32.mrf.mxu0  ;;  %v11519_v42 = vld [vmem:[#allocation11_spill] sm:$0xff] }
 0x340   : > { %v2280_v45 = vadd.f32 %v2262_v5, %v2180_v9  ;;  %v2084_v8 = vadd.f32 %v11519_v42, %v1984_v44  ;;  %v2186_v22 = vadd.f32 %v2176_v36, %v2086_v14 }
 0x341   : > { %v2264_v26 = vpop.f32.mrf.mxu0  ;;  %v2360_v27 = vpop.f32.mrf.mxu1 }
 0x342   : > { %v2379_v32 = vadd.f32 %v2360_v27, %v2279_v47  ;;  %v2281_v29 = vadd.f32 %v2264_v26, %v2181_v40  ;;  %v2184_v3 = vadd.f32 %v2172_v20, %v2084_v8 }
 0x343   : > { %v2266_v54 = vpop.f32.mrf.mxu0  ;;  %v2362_v31 = vpop.f32.mrf.mxu1 }
 0x344   : > { %v9426_v12 = vadd.f32 %v2394_v18, %v2379_v32  ;;  %v2282_v33 = vadd.f32 %v2266_v54, %v2182_v30  ;;  %v2380_v59 = vadd.f32 %v2362_v31, %v2280_v45 }
 0x345   : > { %v2270_v56 = vpop.f32.mrf.mxu0  ;;  %v2364_v37 = vpop.f32.mrf.mxu1 }
 0x346   : > { %v2381_v7 = vadd.f32 %v2364_v37, %v2281_v29  ;;  %v7746_v52 = vmul.f32 -1.442695, %v9426_v12  ;;  %v2283_v53 = vadd.f32 %v2270_v56, %v2183_v1  ;;  %v9437_v19 = vadd.f32 %v2394_v18, %v2380_v59 }
 0x347   : > { %v2272_v51 = vpop.f32.mrf.mxu0  ;;  %v2366_v63 = vpop.f32.mrf.mxu1 }
 0x348   : > { %v9433_v58 = vadd.f32 %v2399_v48, %v2381_v7  ;;  %v2382_v6 = vadd.f32 %v2366_v63, %v2282_v33  ;;  %v2284_v15 = vadd.f32 %v2272_v51, %v2184_v3  ;;  %8591 = vpow2.f32 %v7746_v52 }
 0x349   : > { %v2274_v61 = vpop.f32.mrf.mxu0  ;;  %v2370_v21 = vpop.f32.mrf.mxu1  ;;  %v7747_v25 = vmul.f32 -1.442695, %v9437_v19 }
 0x34a   : > { %v7748_v24 = vmul.f32 -1.442695, %v9433_v58  ;;  %v2383_v0 = vadd.f32 %v2370_v21, %v2283_v53  ;;  %v9439_v5 = vadd.f32 %v2399_v48, %v2382_v6  ;;  %v2285_v11 = vadd.f32 %v2274_v61, %v2185_v62  ;;  %v11523_v62 = vld [vmem:[#allocation4_spill] sm:$0xff] }
 0x34b   : > { %v2276_v20 = vpop.f32.mrf.mxu0  ;;  %v2372_v16 = vpop.f32.mrf.mxu1 }
 0x34c   : > { %v2415_v60 = vadd.f32 %v9414_v35, %v2383_v0  ;;  %v2384_v28 = vadd.f32 %v2372_v16, %v2284_v15  ;;  %8593 = vpow2.f32 %v7748_v24  ;;  %v7749_v47 = vmul.f32 -1.442695, %v9439_v5 }
 0x34d   : > { %v2374_v57 = vpop.f32.mrf.mxu1  ;;  %v2286_v17 = vadd.f32 %v2276_v20, %v2186_v22  ;;  %v11524_v22 = vld [vmem:[#allocation5_spill] sm:$0xff] }
 0x34e   : > { %v7750_v43 = vmul.f32 -1.442695, %v2415_v60  ;;  %v2416_v23 = vadd.f32 %v9414_v35, %v2384_v28  ;;  %v2385_v36 = vadd.f32 %v2374_v57, %v2285_v11  ;;  %v3787_v28 = vld [vmem:[%s11411_s6 + $0x38] sm:$0xff]  ;;  %v3785_v57 = vld [vmem:[%s11411_s6 + $0x28] sm:$0xff] }
 0x34f   : > { %v2376_v26 = vpop.f32.mrf.mxu1 }
 0x350   : > { %8595 = vpow2.f32 %v7750_v43  ;;  %v7751_v27 = vmul.f32 -1.442695, %v2416_v23  ;;  %v2417_v18 = vadd.f32 %v9418_v4, %v2385_v36  ;;  %v2386_v2 = vadd.f32 %v2376_v26, %v2286_v17  ;;  %v3782_v43 = vld [vmem:[%s11411_s6 + $0x10] sm:$0xff]  ;;  %v3783_v17 = vld [vmem:[%s11411_s6 + $0x18] sm:$0xff]  ;;  %v3781_v36 = vld [vmem:[%s11411_s6 + $0x8] sm:$0xff] }
 0x351   : > { %8597 = vpow2.f32 %v7749_v47  ;;  %v3784_v47 = vld [vmem:[%s11411_s6 + $0x20] sm:$0xff] }
 0x352   : > { %8599 = vpow2.f32 %v7751_v27  ;;  %v7752_v38 = vmul.f32 -1.442695, %v2417_v18  ;;  %v2418_v40 = vadd.f32 %v9418_v4, %v2386_v2 }
 0x353   : > { %8601 = vpow2.f32 %v7747_v25 }
 0x354   : > { %8603 = vpow2.f32 %v7752_v38  ;;  %v7753_v32 = vmul.f32 -1.442695, %v2418_v40 }
 0x355   : > { %v8592_v50 = vpop.eup %8591 }
 0x356   : > { %8605 = vpow2.f32 %v7753_v32  ;;  %v2443_v13 = vadd.f32 1.0, %v8592_v50  ;;  %v8451_v50 = vld [vmem:[%s11410_s5 + $0x20] sm:$0xff]  }
 0x358   : > { %8607 = vrcp.f32 %v2443_v13 }
 0x359   : > { %v8594_v35 = vpop.eup %8593 }
 0x35a   : > { %v2445_v9 = vadd.f32 1.0, %v8594_v35 }
 0x35c   : > { %8609 = vrcp.f32 %v2445_v9 }
 0x35d   : > { %v8596_v39 = vpop.eup %8595 }
 0x35e   : > { %v8598_v54 = vpop.eup %8597  ;;  %v2447_v31 = vadd.f32 1.0, %v8596_v39  ;;  %v11529_v39 = vmov 0  }
 0x35f   : > { %v8600_v44 = vpop.eup %8599  ;;  %v2446_v41 = vadd.f32 1.0, %v8598_v54 }
 0x360   : > { %v8602_v34 = vpop.eup %8601  ;;  %v2448_v29 = vadd.f32 1.0, %v8600_v44  ;;  %8611 = vrcp.f32 %v2447_v31  ;;  %v8452_v44 = vld [vmem:[%s11410_s5 + $0x28] sm:$0xff]  }
 0x361   : > { %v8604_v46 = vpop.eup %8603  ;;  %v2444_v45 = vadd.f32 1.0, %v8602_v34 }
 0x362   : > { %v2449_v4 = vadd.f32 1.0, %v8604_v46  ;;  %8613 = vrcp.f32 %v2448_v29 }
 0x363   : > { %v8606_v30 = vpop.eup %8605 }
 0x364   : > { %8615 = vrcp.f32 %v2449_v4  ;;  %v2450_v56 = vadd.f32 1.0, %v8606_v30  ;;  %v8453_v30 = vld [vmem:[%s11410_s5] sm:$0xff]  }
 0x365   : > { %8617 = vrcp.f32 %v2446_v41  ;;  %v8608_v37 = vpop.eup %8607 }
 0x366   : > { %8619 = vrcp.f32 %v2450_v56  ;;  %v2467_v52 = vmul.f32 %v8608_v37, %v9426_v12  ;;  %v11521_v12 = vld [vmem:[#allocation3_spill] sm:$0xff] }
 0x367   : > { %8621 = vrcp.f32 %v2444_v45 }
 0x369   : > { %v8610_v48 = vpop.eup %8609 }
 0x36a   : > { %v2469_v33 = vmul.f32 %v8610_v48, %v9433_v58 }
 0x36c   : > { %v9457_v61 = vpack.c.bf16 %v2469_v33, %v2467_v52 }
 0x36d   : > { %v8612_v42 = vpop.eup %8611 }
 0x36e   : > { %v2471_v49 = vmul.f32 %v8612_v42, %v2415_v60  ;;  %v2479_v21 = vmul.bf16 %v9457_v61, %v11521_v12  ;;  %v2483_v16 = vmul.bf16 %v9457_v61, %v11524_v22  ;;  %v3786_v60 = vld [vmem:[%s11411_s6 + $0x30] sm:$0xff] }
 0x36f   : > { %v8614_v8 = vpop.eup %8613  ;;  %v8454_v42 = vld [vmem:[%s11410_s5 + $0x30] sm:$0xff]  }
 0x370   : > { %v2472_v59 = vmul.f32 %v8614_v8, %v2416_v23  ;;  %v3780_v23 = vld [vmem:[%s11411_s6] sm:$0xff] }
 0x371   : > { %v8616_v1 = vpop.eup %8615 }
 0x372   : > { %v8618_v7 = vpop.eup %8617  ;;  %v2473_v55 = vmul.f32 %v8616_v1, %v2417_v18 }
 0x373   : > { %v8620_v10 = vpop.eup %8619  ;;  %v2470_v53 = vmul.f32 %v8618_v7, %v9439_v5  ;;  %v11526_v5 = vld [vmem:[#allocation2_spill] sm:$0xff]  ;;  %v8455_v7 = vld [vmem:[%s11410_s5 + $0x8] sm:$0xff]  }
 0x374   : > { %v9448_v51 = vpack.c.bf16 %v2473_v55, %v2471_v49  ;;  %v2474_v63 = vmul.f32 %v8620_v10, %v2418_v40  ;;  %v8622_v3 = vpop.eup %8621 }
 0x375   : > { %v2468_v6 = vmul.f32 %v8622_v3, %v9437_v19  ;;  %v8457_v3 = vld [vmem:[%s11410_s5 + $0x10] sm:$0xff]  }
 0x376   : > { %v9452_v14 = vpack.c.bf16 %v2474_v63, %v2472_v59  ;;  %2525 = vrot.lane.b32.xlu1 %v9448_v51, %s11456_s24  ;;  %v2481_v15 = vmul.bf16 %v9448_v51, %v11521_v12  ;;  %v2485_v19 = vmul.bf16 %v9448_v51, %v11524_v22  ;;  %v8456_v59 = vld [vmem:[%s11410_s5 + $0x38] sm:$0xff]  }
 0x377   : > { %v9461_v58 = vpack.c.bf16 %v2470_v53, %v2468_v6  ;;  %v8458_v53 = vld [vmem:[%s11410_s5 + $0x40] sm:$0xff]  }
 0x378   : > { %2527 = vrot.lane.b32.xlu0 %v9452_v14, %s11456_s24  ;;  %v2482_v0 = vmul.bf16 %v9452_v14, %v11523_v62  ;;  %v2486_v20 = vmul.bf16 %v9452_v14, %v11526_v5 }
 0x379   : > { %v2480_v24 = vmul.bf16 %v9461_v58, %v11523_v62  ;;  %v2484_v11 = vmul.bf16 %v9461_v58, %v11526_v5 }
 0x37a   : > { %2521 = vrot.lane.b32.xlu1 %v9457_v61, %s11456_s24 }
 0x37c   : > { %2523 = vrot.lane.b32.xlu0 %v9461_v58, %s11456_s24  ;;  %s11654_s24 = sshll.u32 %s11656_s19, 3 }
 0x37d   : > { %s492_s1 = scalar_lea.vmem %s11420_s15, %s11654_s24 }
 0x37e   : > { %2491 = vrot.lane.b32.xlu1 %v2479_v21, %s11522_s20 }
 0x380   : > { %2493 = vrot.lane.b32.xlu0 %v2480_v24, %s11522_s20 }
 0x382   : > { %2495 = vrot.lane.b32.xlu1 %v2481_v15, %s11522_s20 }
 0x384   : > { %2497 = vrot.lane.b32.xlu0 %v2482_v0, %s11522_s20 }
 0x386   : > { %2766 = vrot.lane.b32.xlu1 %v2485_v19, %s11525_s28 }
 0x388   : > { %2768 = vrot.lane.b32.xlu0 %v2486_v20, %s11525_s28 }
 0x38a   : > { %2762 = vrot.lane.b32.xlu1 %v2483_v16, %s11525_s28 }
 0x38c   : > { %2764 = vrot.lane.b32.xlu0 %v2484_v11, %s11525_s28 }
 0x38e   : > { %2914 = vrot.lane.b32.xlu1 %v2481_v15, %s11501_s17 }
 0x390   : > { %2916 = vrot.lane.b32.xlu0 %v2482_v0, %s11501_s17 }
 0x392   : > { %2910 = vrot.lane.b32.xlu1 %v2479_v21, %s11501_s17 }
 0x394   : > { %2912 = vrot.lane.b32.xlu0 %v2480_v24, %s11501_s17 }
 0x396   : > { %3192 = vrot.lane.b32.xlu1 %v2485_v19, %s11502_s21 }
 0x398   : > { %3190 = vrot.lane.b32.xlu0 %v2484_v11, %s11502_s21 }
 0x39a   : > { %3340 = vrot.lane.b32.xlu1 %v2481_v15, %s11503_s22 }
 0x39c   : > { %3194 = vrot.lane.b32.xlu0 %v2486_v20, %s11502_s21 }
 0x39e   : > { %3188 = vrot.lane.b32.xlu1 %v2483_v16, %s11502_s21 }
 0x3a0   : > { %3342 = vrot.lane.b32.xlu0 %v2482_v0, %s11503_s22 }
 0x3a2   : > { %3336 = vrot.lane.b32.xlu1 %v2479_v21, %s11503_s22  ;;  %v8460_v21 = vld [vmem:[%s11410_s5 + $0x48] sm:$0xff]  }
 0x3a4   : > { %3338 = vrot.lane.b32.xlu0 %v2480_v24, %s11503_s22 }
 0x3a6   : > { %3488 = vrot.lane.b32.xlu1 %v9448_v51, %s11527_s27 }
 0x3a8   : > { %3490 = vrot.lane.b32.xlu0 %v9452_v14, %s11527_s27 }
 0x3aa   : > { %3636 = vrot.lane.b32.xlu1 %v2485_v19, %s11458_s16 }
 0x3ac   : > { %3486 = vrot.lane.b32.xlu0 %v9461_v58, %s11527_s27 }
 0x3ae   : > { %3484 = vrot.lane.b32.xlu1 %v9457_v61, %s11527_s27 }
 0x3b0   : > { %3638 = vrot.lane.b32.xlu0 %v2486_v20, %s11458_s16 }
 0x3b2   : > { %3632 = vrot.lane.b32.xlu1 %v2483_v16, %s11458_s16  ;;  %v8463_v16 = vld [vmem:[%s11410_s5 + $0x68] sm:$0xff]  }
 0x3b4   : > { %3634 = vrot.lane.b32.xlu0 %v2484_v11, %s11458_s16  ;;  %s11592_s16 = smov 111  }
 0x3b6   : > { %3820 = vperm.xlu1 %8412, %v3786_v60   ;;  %v8464_v60 = vld [vmem:[%s11410_s5 + $0x58] sm:$0xff]  }
 0x3b8   : > { %3825 = vperm.xlu0 %8411, %v3787_v28   ;;  %v8465_v28 = vld [vmem:[%s11410_s5 + $0x70] sm:$0xff]  }
 0x3ba   : > { %3810 = vperm.xlu1 %8412, %v3784_v47  }
 0x3bc   : > { %3815 = vperm.xlu0 %8411, %v3785_v57   ;;  %v8466_v57 = vld [vmem:[%s11410_s5 + $0x80] sm:$0xff]  }
 0x3be   : > { %3800 = vperm.xlu1 %8412, %v3782_v43  }
 0x3c0   : > { %3805 = vperm.xlu0 %8411, %v3783_v17  }
 0x3c2   : > { %3790 = vperm.xlu1 %8412, %v3780_v23   ;;  %v8467_v23 = vld [vmem:[%s11410_s5 + $0x78] sm:$0xff]  }
 0x3c4   : > { %3795 = vperm.xlu0 %8411, %v3781_v36  }
 0x3e8   : > { %v2526_v25 = vpop.permute.xlu1 %2525 }
 0x3ea   : > { %v2528_v26 = vpop.permute.xlu0 %2527 }
 0x3eb   : > { %v2530_v27 = vsel %vm580_vm4, %v2526_v25, %v2528_v26  ;;  %v8468_v26 = vld [vmem:[%s11410_s5 + $0x88] sm:$0xff]  }
 0x3ec   : > { %2592 = vmatprep.subr.bf16.mxu0 %v2530_v27  ;;  %v2522_v18 = vpop.permute.xlu1 %2521 }
 0x3ed   : > { %7767 = vmatpush1.bf16.msk.msra.mxu0 %vm9235_vm14, %v2526_v25 }
 0x3ee   : > { %v2524_v38 = vpop.permute.xlu0 %2523 }
 0x3ef   : > { %v2529_v40 = vsel %vm580_vm4, %v2522_v18, %v2524_v38  ;;  %v8469_v38 = vld [vmem:[%s11410_s5 + $0xa0] sm:$0xff]  }
 0x3f0   : > { %2594 = vmatprep.subr.bf16.mxu0 %v2529_v40  ;;  %v2492_v32 = vpop.permute.xlu1 %2491 }
 0x3f1   : > { %7769 = vmatpush1.bf16.msk.msra.mxu0 %vm9235_vm14, %v2522_v18 }
 0x3f2   : > { %v2494_v35 = vpop.permute.xlu0 %2493 }
 0x3f3   : > { %v2499_v29 = vsel %vm561_vm6, %v2492_v32, %v2494_v35 }
 0x3f4   : > { %7770 = vmatmul.mubr.msk.bf16.vlgmr.msra.gmra.mxu0 %vm1572_vm15, %v8451_v50  ;;  %v2496_v13 = vpop.permute.xlu1 %2495 }
 0x3f5   : > { %2622 = vmatprep.mubr.bf16.mxu0 %v11529_v39 }
 0x3f6   : > { %v2498_v9 = vpop.permute.xlu0 %2497 }
 0x3f7   : > { %v2500_v54 = vsel %vm561_vm6, %v2496_v13, %v2498_v9  ;;  %v8472_v9 = vld [vmem:[%s11410_s5 + $0x98] sm:$0xff]  }
 0x3f8   : > { %2697 = vmatprep.subr.bf16.mxu1 %v2500_v54  ;;  %v2767_v31 = vpop.permute.xlu1 %2766  ;;  %v8473_v54 = vld [vmem:[%s11410_s5 + $0xb0] sm:$0xff]  }
 0x3f9   : > { %7779 = vmatpush1.bf16.msk.msra.mxu1 %vm9251_vm0, %v2496_v13  ;;  %v8471_v13 = vld [vmem:[%s11410_s5 + $0xa8] sm:$0xff]  }
 0x3fa   : > { %v2769_v46 = vpop.permute.xlu0 %2768  ;;  %2699 = vmatprep.subr.bf16.mxu1 %v2499_v29  ;;  %v8475_v29 = vld [vmem:[%s11410_s5 + $0xb8] sm:$0xff]  }
 0x3fb   : > { %v2771_v41 = vsel %vm749_vm8, %v2767_v31, %v2769_v46 }
 0x3fc   : > { %7771 = vmatmul.mubr.msk.bf16.gmra.mxu0 %vm1572_vm15, %v8452_v44  ;;  %2833 = vmatprep.subr.bf16.mxu0 %v2771_v41  ;;  %v2763_v4 = vpop.permute.xlu1 %2762 }
 0x3fd   : > { %7781 = vmatpush1.bf16.msk.msra.mxu1 %vm9251_vm0, %v2492_v32  ;;  %7799 = vmatpush1.bf16.msk.msra.mxu0 %vm9263_vm1, %v2767_v31  ;;  %v8470_v32 = vld [vmem:[%s11410_s5 + $0x90] sm:$0xff]   ;;  %v8474_v31 = vld [vmem:[%s11410_s5 + $0xc0] sm:$0xff]  }
 0x3fe   : > { %v2765_v56 = vpop.permute.xlu0 %2764  ;;  %2632 = vmatprep.mubr.bf16.mxu0 %v11529_v39 }
 0x3ff   : > { %v2770_v37 = vsel %vm749_vm8, %v2763_v4, %v2765_v56  ;;  %v8477_v56 = vld [vmem:[%s11410_s5 + $0xe0] sm:$0xff]  }
 0x400   : > { %7782 = vmatmul.mubr.msk.bf16.vlgmr.msra.gmra.mxu1 %vm1572_vm15, %v8453_v30  ;;  %2835 = vmatprep.subr.bf16.mxu0 %v2770_v37  ;;  %v2915_v48 = vpop.permute.xlu1 %2914  ;;  %v8476_v30 = vld [vmem:[%s11410_s5 + $0xc8] sm:$0xff]   ;;  %v8478_v37 = vld [vmem:[%s11410_s5 + $0xd0] sm:$0xff]  }
 0x401   : > { %7801 = vmatpush1.bf16.msk.msra.mxu0 %vm9263_vm1, %v2763_v4  ;;  %2727 = vmatprep.mubr.bf16.mxu1 %v11529_v39 }
 0x402   : > { %v2917_v8 = vpop.permute.xlu0 %2916  ;;  %3111 = vmatprep.subr.bf16.mxu0 %v9452_v14  ;;  %v8459_v14 = vld [vmem:[%s11410_s5 + $0x18] sm:$0xff]  }
 0x403   : > { %v2919_v1 = vsel %vm845_vm9, %v2915_v48, %v2917_v8  ;;  %v8481_v8 = vld [vmem:[%s11410_s5 + $0xf0] sm:$0xff]  }
 0x404   : > { %7772 = vmatmul.mubr.msk.bf16.gmra.mxu0 %vm1572_vm15, %v8454_v42  ;;  %2981 = vmatprep.subr.bf16.mxu1 %v2919_v1  ;;  %v2911_v55 = vpop.permute.xlu1 %2910  ;;  %v8480_v42 = vld [vmem:[%s11410_s5 + $0xd8] sm:$0xff]   ;;  %v8482_v1 = vld [vmem:[%s11410_s5 + $0x100] sm:$0xff]  }
 0x405   : > { %7819 = vmatpush1.bf16.msk.msra.mxu1 %vm9287_vm2, %v2915_v48  ;;  %2642 = vmatprep.mubr.bf16.mxu0 %v11529_v39  ;;  %v8479_v48 = vld [vmem:[%s11410_s5 + $0xe8] sm:$0xff]  }
 0x406   : > { %v2913_v10 = vpop.permute.xlu0 %2912 }
 0x407   : > { %v2918_v33 = vsel %vm845_vm9, %v2911_v55, %v2913_v10  ;;  %v8485_v10 = vld [vmem:[%s11410_s5 + $0x110] sm:$0xff]  }
 0x408   : > { %7783 = vmatmul.mubr.msk.bf16.gmra.mxu1 %vm1572_vm15, %v8455_v7  ;;  %2983 = vmatprep.subr.bf16.mxu1 %v2918_v33  ;;  %v3193_v6 = vpop.permute.xlu1 %3192  ;;  %v8483_v7 = vld [vmem:[%s11410_s5 + $0xf8] sm:$0xff]  }
 0x409   : > { %7821 = vmatpush1.bf16.msk.msra.mxu1 %vm9287_vm2, %v2911_v55  ;;  %2737 = vmatprep.mubr.bf16.mxu1 %v11529_v39  ;;  %v8484_v55 = vld [vmem:[%s11410_s5 + $0x108] sm:$0xff]   ;;  %v8486_v33 = vld [vmem:[%s11410_s5 + $0x118] sm:$0xff]  }
 0x40a   : > { %v3191_v63 = vpop.permute.xlu0 %3190 }
 0x40c   : > { %7773 = vmatmul.mubr.msk.bf16.gmra.mxu0 %vm1572_vm15, %v8456_v59  ;;  %v3341_v15 = vpop.permute.xlu1 %3340 }
 0x40d   : > { %2853 = vmatprep.mubr.bf16.mxu0 %v11529_v39 }
 0x40e   : > { %v3195_v52 = vpop.permute.xlu0 %3194 }
 0x40f   : > { %7854 = vmatprep.subr.msk.bf16.mxu1 %vm1029_vm10, %v3195_v52  ;;  %v3197_v0 = vsel %vm1029_vm10, %v3193_v6, %v3195_v52 }
 0x410   : > { %7784 = vmatmul.mubr.msk.bf16.gmra.mxu1 %vm1572_vm15, %v8457_v3  ;;  %v3189_v19 = vpop.permute.xlu1 %3188 }
 0x411   : > { %2747 = vmatprep.mubr.bf16.mxu1 %v11529_v39  ;;  %v3196_v20 = vsel %vm1029_vm10, %v3189_v19, %v3191_v63 }
 0x412   : > { %v3343_v24 = vpop.permute.xlu0 %3342 }
 0x413   : > { %v3345_v17 = vsel %vm1125_vm11, %v3341_v15, %v3343_v24 }
 0x414   : > { %7802 = vmatmul.mubr.msk.bf16.vlgmr.msra.gmra.mxu0 %vm1572_vm15, %v8458_v53  ;;  %v3337_v47 = vpop.permute.xlu1 %3336 }
 0x415   : > { %3112 = vmatpush1.bf16.msra.mxu0 %v9448_v51  ;;  %2863 = vmatprep.mubr.bf16.mxu0 %v11529_v39  ;;  %v8461_v51 = vld [vmem:[%s11410_s5 + $0x60] sm:$0xff]  }
 0x416   : > { %3113 = vmatprep.subr.bf16.mxu0 %v9461_v58  ;;  %v3339_v58 = vpop.permute.xlu0 %3338 }
 0x417   : > { %v3344_v25 = vsel %vm1125_vm11, %v3337_v47, %v3339_v58 }
 0x418   : > { %7785 = vmatmul.mubr.msk.bf16.gmra.mxu1 %vm1572_vm15, %v8459_v14  ;;  %v3489_v36 = vpop.permute.xlu1 %3488 }
 0x419   : > { %3114 = vmatpush1.bf16.msra.mxu0 %v9457_v61  ;;  %3001 = vmatprep.mubr.bf16.mxu1 %v11529_v39  ;;  %v8462_v61 = vld [vmem:[%s11410_s5 + $0x50] sm:$0xff]  }
 0x41a   : > { %7872 = vmatprep.subr.msk.bf16.mxu0 %vm1125_vm11, %v3343_v24  ;;  %v3491_v11 = vpop.permute.xlu0 %3490 }
 0x41b   : > { %v3493_v40 = vsel %vm1221_vm12, %v3489_v36, %v3491_v11 }
 0x41c   : > { %7803 = vmatmul.mubr.msk.bf16.gmra.mxu0 %vm1572_vm15, %v8460_v21  ;;  %v3637_v18 = vpop.permute.xlu1 %3636 }
 0x41d   : > { %2873 = vmatprep.mubr.bf16.mxu0 %v11529_v39 }
 0x41e   : > { %v3487_v43 = vpop.permute.xlu0 %3486 }
 0x420   : > { %7822 = vmatmul.mubr.msk.bf16.vlgmr.msra.gmra.mxu1 %vm1572_vm15, %v8461_v51  ;;  %v3485_v50 = vpop.permute.xlu1 %3484 }
 0x421   : > { %3260 = vmatpush1.bf16.msra.mxu1 %v3197_v0  ;;  %3011 = vmatprep.mubr.bf16.mxu1 %v11529_v39  ;;  %v3492_v35 = vsel %vm1221_vm12, %v3485_v50, %v3487_v43 }
 0x422   : > { %7855 = vmatprep.subr.msk.bf16.mxu1 %vm1029_vm10, %v3191_v63  ;;  %v3639_v27 = vpop.permute.xlu0 %3638 }
 0x423   : > { %v3641_v44 = vsel %vm1317_vm13, %v3637_v18, %v3639_v27 }
 0x424   : > { %7804 = vmatmul.mubr.msk.bf16.gmra.mxu0 %vm1572_vm15, %v8462_v61  ;;  %v3633_v41 = vpop.permute.xlu1 %3632 }
 0x425   : > { %3262 = vmatpush1.bf16.msra.mxu1 %v3196_v20  ;;  %2883 = vmatprep.mubr.bf16.mxu0 %v11529_v39 }
 0x426   : > { %7890 = vmatprep.subr.msk.bf16.mxu1 %vm1221_vm12, %v3491_v11  ;;  %v3635_v46 = vpop.permute.xlu0 %3634 }
 0x427   : > { %v3640_v4 = vsel %vm1317_vm13, %v3633_v41, %v3635_v46 }
 0x428   : > { %7823 = vmatmul.mubr.msk.bf16.gmra.mxu1 %vm1572_vm15, %v8463_v16 }
 0x429   : > { %3021 = vmatprep.mubr.bf16.mxu1 %v11529_v39 }
 0x42c   : > { %7805 = vmatmul.mubr.msk.bf16.gmra.mxu0 %vm1572_vm15, %v8464_v60 }
 0x42d   : > { %3131 = vmatprep.mubr.bf16.mxu0 %v11529_v39 }
 0x430   : > { %7824 = vmatmul.mubr.msk.bf16.gmra.mxu1 %vm1572_vm15, %v8465_v28 }
 0x431   : > { %3031 = vmatprep.mubr.bf16.mxu1 %v11529_v39 }
 0x433   : > { %v9875_v12 = vpop.permute.xlu0 %3825 }
 0x434   : > { %7838 = vmatmul.mubr.msk.bf16.vlgmr.msra.gmra.mxu0 %vm1572_vm15, %v8466_v57  ;;  %11547 = vst [vmem:[#allocation24_spill] sm:$0xff] %v9875_v12 }
 0x435   : > { %3408 = vmatpush1.bf16.msra.mxu0 %v3345_v17  ;;  %3141 = vmatprep.mubr.bf16.mxu0 %v11529_v39 }
 0x436   : > { %7873 = vmatprep.subr.msk.bf16.mxu0 %vm1125_vm11, %v3339_v58 }
 0x438   : > { %7825 = vmatmul.mubr.msk.bf16.gmra.mxu1 %vm1572_vm15, %v8467_v23 }
 0x439   : > { %3410 = vmatpush1.bf16.msra.mxu0 %v3344_v25  ;;  %3279 = vmatprep.mubr.bf16.mxu1 %v11529_v39 }
 0x43a   : > { %7908 = vmatprep.subr.msk.bf16.mxu0 %vm1317_vm13, %v3639_v27 }
 0x43c   : > { %7839 = vmatmul.mubr.msk.bf16.gmra.mxu0 %vm1572_vm15, %v8468_v26 }
 0x43d   : > { %3151 = vmatprep.mubr.bf16.mxu0 %v11529_v39 }
 0x440   : > { %7856 = vmatmul.mubr.msk.bf16.vlgmr.msra.gmra.mxu1 %vm1572_vm15, %v8469_v38 }
 0x441   : > { %3556 = vmatpush1.bf16.msra.mxu1 %v3493_v40  ;;  %3289 = vmatprep.mubr.bf16.mxu1 %v11529_v39 }
 0x442   : > { %7891 = vmatprep.subr.msk.bf16.mxu1 %vm1221_vm12, %v3487_v43 }
 0x444   : > { %7840 = vmatmul.mubr.msk.bf16.gmra.mxu0 %vm1572_vm15, %v8470_v32 }
 0x445   : > { %3558 = vmatpush1.bf16.msra.mxu1 %v3492_v35  ;;  %3161 = vmatprep.mubr.bf16.mxu0 %v11529_v39 }
 0x448   : > { %7857 = vmatmul.mubr.msk.bf16.gmra.mxu1 %vm1572_vm15, %v8471_v13 }
 0x449   : > { %3299 = vmatprep.mubr.bf16.mxu1 %v11529_v39 }
 0x44c   : > { %7841 = vmatmul.mubr.msk.bf16.gmra.mxu0 %vm1572_vm15, %v8472_v9 }
 0x44d   : > { %3427 = vmatprep.mubr.bf16.mxu0 %v11529_v39 }
 0x450   : > { %7858 = vmatmul.mubr.msk.bf16.gmra.mxu1 %vm1572_vm15, %v8473_v54 }
 0x451   : > { %3309 = vmatprep.mubr.bf16.mxu1 %v11529_v39 }
 0x454   : > { %7874 = vmatmul.mubr.msk.bf16.vlgmr.msra.gmra.mxu0 %vm1572_vm15, %v8474_v31 }
 0x455   : > { %3704 = vmatpush1.bf16.msra.mxu0 %v3641_v44  ;;  %3437 = vmatprep.mubr.bf16.mxu0 %v11529_v39 }
 0x456   : > { %7909 = vmatprep.subr.msk.bf16.mxu0 %vm1317_vm13, %v3635_v46 }
 0x458   : > { %7859 = vmatmul.mubr.msk.bf16.gmra.mxu1 %vm1572_vm15, %v8475_v29 }
 0x459   : > { %3706 = vmatpush1.bf16.msra.mxu0 %v3640_v4  ;;  %3575 = vmatprep.mubr.bf16.mxu1 %v11529_v39 }
 0x45c   : > { %7875 = vmatmul.mubr.msk.bf16.gmra.mxu0 %vm1572_vm15, %v8476_v30 }
 0x45d   : > { %3447 = vmatprep.mubr.bf16.mxu0 %v11529_v39 }
 0x460   : > { %7892 = vmatmul.mubr.msk.bf16.vlgmr.msra.gmra.mxu1 %vm1572_vm15, %v8477_v56 }
 0x461   : > { %3585 = vmatprep.mubr.bf16.mxu1 %v11529_v39 }
 0x464   : > { %7876 = vmatmul.mubr.msk.bf16.gmra.mxu0 %vm1572_vm15, %v8478_v37 }
 0x465   : > { %3457 = vmatprep.mubr.bf16.mxu0 %v11529_v39 }
 0x468   : > { %7893 = vmatmul.mubr.msk.bf16.gmra.mxu1 %vm1572_vm15, %v8479_v48 }
 0x469   : > { %3595 = vmatprep.mubr.bf16.mxu1 %v11529_v39 }
 0x46c   : > { %7877 = vmatmul.mubr.msk.bf16.gmra.mxu0 %vm1572_vm15, %v8480_v42 }
 0x46d   : > { %3723 = vmatprep.mubr.bf16.mxu0 %v11529_v39 }
 0x470   : > { %7894 = vmatmul.mubr.msk.bf16.gmra.mxu1 %vm1572_vm15, %v8481_v8 }
 0x471   : > { %3605 = vmatprep.mubr.bf16.mxu1 %v11529_v39 }
 0x474   : > { %7910 = vmatmul.mubr.msk.bf16.vlgmr.msra.gmra.mxu0 %vm1572_vm15, %v8482_v1 }
 0x475   : > { %3733 = vmatprep.mubr.bf16.mxu0 %v11529_v39 }
 0x478   : > { %7895 = vmatmul.mubr.msk.bf16.gmra.mxu1 %vm1572_vm15, %v8483_v7 }
 0x479   : > { %4150 = vmatprep.mubr.bf16.mxu1 %v11529_v39 }
 0x47c   : > { %7911 = vmatmul.mubr.msk.bf16.gmra.mxu0 %vm1572_vm15, %v8484_v55 }
 0x47d   : > { %3743 = vmatprep.mubr.bf16.mxu0 %v11529_v39 }
 0x484   : > { %7912 = vmatmul.mubr.msk.bf16.gmra.mxu0 %vm1572_vm15, %v8485_v10 }
 0x485   : > { %3753 = vmatprep.mubr.bf16.mxu0 %v11529_v39 }
 0x48c   : > { %7913 = vmatmul.mubr.msk.bf16.gmra.mxu0 %vm1572_vm15, %v8486_v33 }
 0x48d   : > { %4255 = vmatprep.mubr.bf16.mxu0 %v11529_v39 }
 0x4b4   : > { %v2614_v59 = vpop.f32.mrf.mxu0 }
 0x4b6   : > { %v2616_v63 = vpop.f32.mrf.mxu0 }
 0x4b8   : > { %v2618_v3 = vpop.f32.mrf.mxu0 }
 0x4ba   : > { %v9763_v52 = vpop.f32.mrf.mxu0 }
 0x4bc   : > { %v2624_v53 = vpop.f32.mrf.mxu0 }
 0x4be   : > { %v2626_v14 = vpop.f32.mrf.mxu0 }
 0x4c0   : > { %v2628_v6 = vpop.f32.mrf.mxu0  ;;  %v2719_v21 = vpop.f32.mrf.mxu1 }
 0x4c1   : > { %v2720_v24 = vadd.f32 %v2719_v21, %v2614_v59 }
 0x4c2   : > { %v9765_v15 = vpop.f32.mrf.mxu0  ;;  %v2721_v51 = vpop.f32.mrf.mxu1 }
 0x4c3   : > { %v2722_v58 = vadd.f32 %v2721_v51, %v2616_v63 }
 0x4c4   : > { %v2634_v0 = vpop.f32.mrf.mxu0  ;;  %v2723_v61 = vpop.f32.mrf.mxu1 }
 0x4c5   : > { %v2724_v19 = vadd.f32 %v2723_v61, %v2618_v3 }
 0x4c6   : > { %v2636_v20 = vpop.f32.mrf.mxu0  ;;  %v9767_v16 = vpop.f32.mrf.mxu1 }
 0x4c8   : > { %v2638_v11 = vpop.f32.mrf.mxu0  ;;  %v2729_v60 = vpop.f32.mrf.mxu1 }
 0x4c9   : > { %v2730_v28 = vadd.f32 %v2729_v60, %v2624_v53 }
 0x4ca   : > { %v9769_v47 = vpop.f32.mrf.mxu0  ;;  %v2731_v57 = vpop.f32.mrf.mxu1 }
 0x4cb   : > { %v2732_v43 = vadd.f32 %v2731_v57, %v2626_v14 }
 0x4cc   : > { %v2644_v17 = vpop.f32.mrf.mxu0  ;;  %v2733_v23 = vpop.f32.mrf.mxu1 }
 0x4cd   : > { %v2734_v36 = vadd.f32 %v2733_v23, %v2628_v6 }
 0x4ce   : > { %v2646_v25 = vpop.f32.mrf.mxu0  ;;  %v9771_v26 = vpop.f32.mrf.mxu1 }
 0x4d0   : > { %v2648_v27 = vpop.f32.mrf.mxu0  ;;  %v2739_v18 = vpop.f32.mrf.mxu1 }
 0x4d1   : > { %v2740_v38 = vadd.f32 %v2739_v18, %v2634_v0 }
 0x4d2   : > { %v9773_v40 = vpop.f32.mrf.mxu0  ;;  %v2741_v32 = vpop.f32.mrf.mxu1 }
 0x4d3   : > { %v2742_v50 = vadd.f32 %v2741_v32, %v2636_v20 }
 0x4d4   : > { %v2743_v35 = vpop.f32.mrf.mxu1  ;;  %v2855_v13 = vpop.f32.mrf.mxu0 }
 0x4d5   : > { %v2744_v9 = vadd.f32 %v2743_v35, %v2638_v11  ;;  %v2894_v54 = vadd.f32 %v2855_v13, %v2720_v24 }
 0x4d6   : > { %v9775_v31 = vpop.f32.mrf.mxu1  ;;  %v2857_v44 = vpop.f32.mrf.mxu0 }
 0x4d7   : > { %v2895_v29 = vadd.f32 %v2857_v44, %v2722_v58 }
 0x4d8   : > { %v2749_v46 = vpop.f32.mrf.mxu1  ;;  %v2859_v41 = vpop.f32.mrf.mxu0 }
 0x4d9   : > { %v2750_v4 = vadd.f32 %v2749_v46, %v2644_v17  ;;  %v2896_v30 = vadd.f32 %v2859_v41, %v2724_v19 }
 0x4da   : > { %v2751_v56 = vpop.f32.mrf.mxu1  ;;  %v9777_v37 = vpop.f32.mrf.mxu0 }
 0x4db   : > { %v2752_v48 = vadd.f32 %v2751_v56, %v2646_v25 }
 0x4dc   : > { %v2753_v42 = vpop.f32.mrf.mxu1  ;;  %v2865_v8 = vpop.f32.mrf.mxu0 }
 0x4dd   : > { %v2754_v1 = vadd.f32 %v2753_v42, %v2648_v27  ;;  %v2898_v7 = vadd.f32 %v2865_v8, %v2730_v28 }
 0x4de   : > { %v9779_v55 = vpop.f32.mrf.mxu1  ;;  %v2867_v10 = vpop.f32.mrf.mxu0 }
 0x4df   : > { %v2899_v33 = vadd.f32 %v2867_v10, %v2732_v43 }
 0x4e0   : > { %v2869_v59 = vpop.f32.mrf.mxu0  ;;  %v3003_v63 = vpop.f32.mrf.mxu1 }
 0x4e1   : > { %v2900_v3 = vadd.f32 %v2869_v59, %v2734_v36  ;;  %v3042_v53 = vadd.f32 %v3003_v63, %v2894_v54 }
 0x4e2   : > { %v9781_v14 = vpop.f32.mrf.mxu0  ;;  %v3005_v6 = vpop.f32.mrf.mxu1 }
 0x4e3   : > { %v3043_v21 = vadd.f32 %v3005_v6, %v2895_v29 }
 0x4e4   : > { %v2875_v24 = vpop.f32.mrf.mxu0  ;;  %v3007_v51 = vpop.f32.mrf.mxu1 }
 0x4e5   : > { %v2902_v58 = vadd.f32 %v2875_v24, %v2740_v38  ;;  %v3044_v0 = vadd.f32 %v3007_v51, %v2896_v30 }
 0x4e6   : > { %v2877_v61 = vpop.f32.mrf.mxu0  ;;  %v9783_v19 = vpop.f32.mrf.mxu1 }
 0x4e7   : > { %v2903_v20 = vadd.f32 %v2877_v61, %v2742_v50 }
 0x4e8   : > { %v2879_v11 = vpop.f32.mrf.mxu0  ;;  %v3013_v60 = vpop.f32.mrf.mxu1 }
 0x4e9   : > { %v2904_v28 = vadd.f32 %v2879_v11, %v2744_v9  ;;  %v3046_v57 = vadd.f32 %v3013_v60, %v2898_v7 }
 0x4ea   : > { %v9785_v43 = vpop.f32.mrf.mxu0  ;;  %v3015_v17 = vpop.f32.mrf.mxu1 }
 0x4eb   : > { %v3047_v23 = vadd.f32 %v3015_v17, %v2899_v33 }
 0x4ec   : > { %v2885_v36 = vpop.f32.mrf.mxu0  ;;  %v3017_v25 = vpop.f32.mrf.mxu1 }
 0x4ed   : > { %v9787_v27 = vadd.f32 %v2885_v36, %v2750_v4  ;;  %v3048_v18 = vadd.f32 %v3017_v25, %v2900_v3 }
 0x4ee   : > { %v2887_v32 = vpop.f32.mrf.mxu0  ;;  %v9789_v38 = vpop.f32.mrf.mxu1 }
 0x4ef   : > { %v9791_v35 = vadd.f32 %v2887_v32, %v2752_v48 }
 0x4f0   : > { %v2889_v13 = vpop.f32.mrf.mxu0  ;;  %v3023_v50 = vpop.f32.mrf.mxu1 }
 0x4f1   : > { %v9793_v54 = vadd.f32 %v2889_v13, %v2754_v1  ;;  %v3050_v9 = vadd.f32 %v3023_v50, %v2902_v58 }
 0x4f2   : > { %v9795_v44 = vpop.f32.mrf.mxu0  ;;  %v3025_v29 = vpop.f32.mrf.mxu1 }
 0x4f3   : > { %v3051_v46 = vadd.f32 %v3025_v29, %v2903_v20 }
 0x4f4   : > { %v3027_v41 = vpop.f32.mrf.mxu1  ;;  %v3133_v30 = vpop.f32.mrf.mxu0 }
 0x4f5   : > { %v3052_v56 = vadd.f32 %v3027_v41, %v2904_v28  ;;  %v3172_v4 = vadd.f32 %v3133_v30, %v3042_v53 }
 0x4f6   : > { %v9797_v42 = vpop.f32.mrf.mxu1  ;;  %v3135_v8 = vpop.f32.mrf.mxu0 }
 0x4f7   : > { %v3173_v7 = vadd.f32 %v3135_v8, %v3043_v21 }
 0x4f8   : > { %v9799_v10 = vpop.f32.mrf.mxu1  ;;  %v3137_v48 = vpop.f32.mrf.mxu0 }
 0x4f9   : > { %v3174_v33 = vadd.f32 %v3137_v48, %v3044_v0 }
 0x4fa   : > { %v9801_v59 = vpop.f32.mrf.mxu1  ;;  %v9803_v1 = vpop.f32.mrf.mxu0 }
 0x4fc   : > { %v9805_v63 = vpop.f32.mrf.mxu1  ;;  %v3143_v3 = vpop.f32.mrf.mxu0 }
 0x4fd   : > { %v9807_v6 = vadd.f32 %v3143_v3, %v3046_v57 }
 0x4fe   : > { %v9809_v24 = vpop.f32.mrf.mxu1  ;;  %v3145_v53 = vpop.f32.mrf.mxu0 }
 0x4ff   : > { %v9811_v51 = vadd.f32 %v3145_v53, %v3047_v23 }
 0x500   : > { %v3147_v58 = vpop.f32.mrf.mxu0  ;;  %v3281_v21 = vpop.f32.mrf.mxu1 }
 0x501   : > { %v9813_v61 = vadd.f32 %v3147_v58, %v3048_v18  ;;  %v3320_v20 = vadd.f32 %v3281_v21, %v3172_v4 }
 0x502   : > { %v9815_v0 = vpop.f32.mrf.mxu0  ;;  %v3283_v11 = vpop.f32.mrf.mxu1 }
 0x503   : > { %v3321_v60 = vadd.f32 %v3283_v11, %v3173_v7 }
 0x504   : > { %v3153_v28 = vpop.f32.mrf.mxu0  ;;  %v3285_v17 = vpop.f32.mrf.mxu1 }
 0x505   : > { %v9817_v36 = vadd.f32 %v3153_v28, %v3050_v9  ;;  %v3322_v57 = vadd.f32 %v3285_v17, %v3174_v33 }
 0x506   : > { %v3155_v25 = vpop.f32.mrf.mxu0  ;;  %v9819_v32 = vpop.f32.mrf.mxu1 }
 0x507   : > { %v9821_v13 = vadd.f32 %v3155_v25, %v3051_v46 }
 0x508   : > { %v3157_v23 = vpop.f32.mrf.mxu0  ;;  %v3291_v50 = vpop.f32.mrf.mxu1 }
 0x509   : > { %v9823_v29 = vadd.f32 %v3157_v23, %v3052_v56 }
 0x50a   : > { %v9825_v18 = vpop.f32.mrf.mxu0  ;;  %v9827_v41 = vpop.f32.mrf.mxu1 }
 0x50b   : > { %11533 = vst [vmem:[#allocation11_spill] sm:$0xff] %v9823_v29 }
 0x50c   : > { %v9829_v30 = vpop.f32.mrf.mxu0  ;;  %v9831_v4 = vpop.f32.mrf.mxu1 }
 0x50e   : > { %v9833_v9 = vpop.f32.mrf.mxu0  ;;  %v9835_v8 = vpop.f32.mrf.mxu1 }
 0x510   : > { %v9837_v7 = vpop.f32.mrf.mxu0  ;;  %v9839_v46 = vpop.f32.mrf.mxu1 }
 0x512   : > { %v9841_v48 = vpop.f32.mrf.mxu0  ;;  %v9843_v56 = vpop.f32.mrf.mxu1 }
 0x514   : > { %v9845_v33 = vpop.f32.mrf.mxu1  ;;  %v3429_v3 = vpop.f32.mrf.mxu0 }
 0x515   : > { %11534 = vst [vmem:[#allocation10_spill] sm:$0xff] %v9845_v33  ;;  %v3468_v53 = vadd.f32 %v3429_v3, %v3320_v20 }
 0x516   : > { %v9847_v58 = vpop.f32.mrf.mxu1  ;;  %v3431_v21 = vpop.f32.mrf.mxu0 }
 0x517   : > { %11535 = vst [vmem:[#allocation12_spill] sm:$0xff] %v9847_v58  ;;  %v9849_v11 = vadd.f32 %v3431_v21, %v3321_v60  ;;  %v9867_v21 = vpop.permute.xlu1 %3820 }
 0x518   : > { %v9851_v28 = vpop.f32.mrf.mxu1  ;;  %v3433_v17 = vpop.f32.mrf.mxu0  ;;  %11545 = vst [vmem:[#allocation22_spill] sm:$0xff] %v9867_v21 }
 0x519   : > { %11536 = vst [vmem:[#allocation13_spill] sm:$0xff] %v9849_v11  ;;  %11537 = vst [vmem:[#allocation14_spill] sm:$0xff] %v9851_v28  ;;  %v3470_v25 = vadd.f32 %v3433_v17, %v3322_v57 }
 0x51a   : > { %v9853_v23 = vpop.f32.mrf.mxu1  ;;  %v9855_v49 = vpop.f32.mrf.mxu0 }
 0x51b   : > { %11538 = vst [vmem:[#allocation15_spill] sm:$0xff] %v9853_v23  ;;  %11539 = vst [vmem:[#allocation16_spill] sm:$0xff] %v9855_v49  ;;  %v9887_v49 = vpop.permute.xlu0 %3815 }
 0x51c   : > { %v9857_v45 = vpop.f32.mrf.mxu1  ;;  %v3439_v34 = vpop.f32.mrf.mxu0  ;;  %11553 = vst [vmem:[#allocation30_spill] sm:$0xff] %v9887_v49 }
 0x51d   : > { %11540 = vst [vmem:[#allocation17_spill] sm:$0xff] %v9857_v45 }
 0x51e   : > { %v9859_v39 = vpop.f32.mrf.mxu1  ;;  %v9861_v2 = vpop.f32.mrf.mxu0 }
 0x51f   : > { %11541 = vst [vmem:[#allocation18_spill] sm:$0xff] %v9859_v39  ;;  %11542 = vst [vmem:[#allocation19_spill] sm:$0xff] %v9861_v2  ;;  %v9879_v39 = vpop.permute.xlu1 %3810  ;;  %v9901_v58 = vpop.permute.xlu0 %3805 }
 0x520   : > { %v3443_v20 = vpop.f32.mrf.mxu0  ;;  %v3577_v3 = vpop.f32.mrf.mxu1  ;;  %11549 = vst [vmem:[#allocation26_spill] sm:$0xff] %v9879_v39 }
 0x522   : > { %v9863_v5 = vpop.f32.mrf.mxu0  ;;  %v9865_v60 = vpop.f32.mrf.mxu1 }
 0x523   : > { %11543 = vst [vmem:[#allocation20_spill] sm:$0xff] %v9863_v5  ;;  %11544 = vst [vmem:[#allocation21_spill] sm:$0xff] %v9865_v60 }
 0x524   : > { %v9869_v57 = vpop.f32.mrf.mxu0  ;;  %v3581_v17 = vpop.f32.mrf.mxu1 }
 0x525   : > { %v3618_v29 = vadd.f32 %v3581_v17, %v3470_v25 }
 0x526   : > { %v9871_v22 = vpop.f32.mrf.mxu0  ;;  %v9873_v62 = vpop.f32.mrf.mxu1 }
 0x527   : > { %11546 = vst [vmem:[#allocation23_spill] sm:$0xff] %v9873_v62  ;;  %v9893_v62 = vpop.permute.xlu1 %3800 }
 0x528   : > { %v9877_v11 = vpop.f32.mrf.mxu0  ;;  %v3587_v2 = vpop.f32.mrf.mxu1 }
 0x529   : > { %11548 = vst [vmem:[#allocation25_spill] sm:$0xff] %v9877_v11 }
 0x52a   : > { %v9881_v45 = vpop.f32.mrf.mxu0  ;;  %v9883_v5 = vpop.f32.mrf.mxu1 }
 0x52b   : > { %11550 = vst [vmem:[#allocation27_spill] sm:$0xff] %v9881_v45  ;;  %11551 = vst [vmem:[#allocation28_spill] sm:$0xff] %v9883_v5  ;;  %v3616_v45 = vadd.f32 %v3577_v3, %v3468_v53  ;;  %v9905_v49 = vpop.permute.xlu1 %3790  ;;  %v2736_v53 = vadd.f32 %v9771_v26, %v9765_v15  ;;  %v2746_v3 = vadd.f32 %v9775_v31, %v9769_v47 }
 0x52c   : > { %v9885_v60 = vpop.f32.mrf.mxu0  ;;  %v3591_v21 = vpop.f32.mrf.mxu1 }
 0x52d   : > { %11552 = vst [vmem:[#allocation29_spill] sm:$0xff] %v9885_v60  ;;  %v2905_v47 = vadd.f32 %v9785_v43, %v2746_v3  ;;  %v3055_v43 = vadd.f32 %v9801_v59, %v9791_v35 }
 0x52e   : > { %v9889_v23 = vpop.f32.mrf.mxu0  ;;  %v9891_v28 = vpop.f32.mrf.mxu1 }
 0x52f   : > { %11554 = vst [vmem:[#allocation31_spill] sm:$0xff] %v9889_v23  ;;  %11555 = vst [vmem:[#allocation32_spill] sm:$0xff] %v9891_v28  ;;  %v2726_v28 = vadd.f32 %v9767_v16, %v9763_v52 }
 0x530   : > { %v9895_v12 = vpop.f32.mrf.mxu0  ;;  %v9897_v11 = vpop.f32.mrf.mxu1 }
 0x531   : > { %11556 = vst [vmem:[#allocation33_spill] sm:$0xff] %v9895_v12  ;;  %11557 = vst [vmem:[#allocation34_spill] sm:$0xff] %v9897_v11  ;;  %v3324_v12 = vadd.f32 %v3291_v50, %v9807_v6  ;;  %v9923_v6 = vpop.permute.xlu0 %3795  ;;  %v2756_v50 = vadd.f32 %v9779_v55, %v9773_v40  ;;  %v3053_v55 = vadd.f32 %v9797_v42, %v2905_v47 }
 0x532   : > { %v9899_v39 = vpop.f32.mrf.mxu0  ;;  %v9903_v60 = vpop.f32.mrf.mxu1 }
 0x533   : > { %11558 = vst [vmem:[#allocation35_spill] sm:$0xff] %v9899_v39  ;;  %11559 = vst [vmem:[#allocation36_spill] sm:$0xff] %v9903_v60  ;;  %v3472_v39 = vadd.f32 %v3439_v34, %v3324_v12  ;;  %v3326_v12 = vadd.f32 %v9831_v4, %v9813_v61  ;;  %v2909_v40 = vadd.f32 %v9795_v44, %v2756_v50 }
 0x534   : > { %v3725_v5 = vpop.f32.mrf.mxu0  ;;  %v9920_v60 = vpop.f32.mrf.mxu1 }
 0x535   : > { %v3764_v33 = vadd.f32 %v3725_v5, %v3616_v45  ;;  %v2897_v5 = vadd.f32 %v9777_v37, %v2726_v28  ;;  %v3620_v34 = vadd.f32 %v3587_v2, %v3472_v39  ;;  %v3057_v44 = vadd.f32 %v9809_v24, %v2909_v40  ;;  %v11569_v40 = vld [vmem:[#allocation18_spill] sm:$0xff] }
 0x536   : > { %v9909_v23 = vpop.f32.mrf.mxu0  ;;  %v3603_v61 = vpop.f32.mrf.mxu1 }
 0x537   : > { %v9913_v11 = vadd.f32 %v9905_v49, %v3764_v33  ;;  %v2901_v33 = vadd.f32 %v9781_v14, %v2736_v53  ;;  %v3045_v15 = vadd.f32 %v9783_v19, %v2897_v5  ;;  %v3054_v14 = vadd.f32 %v9799_v10, %v9787_v27  ;;  %v11563_v5 = vld [vmem:[#allocation12_spill] sm:$0xff] }
 0x538   : > { %v3729_v45 = vpop.f32.mrf.mxu0  ;;  %v3328_v27 = vadd.f32 %v9839_v46, %v9817_v36  ;;  %v3607_v46 = vpop.f32.mrf.mxu1  ;;  %v11560_v17 = vld [vmem:[#allocation34_spill] sm:$0xff] }
 0x539   : > { %v7914_v52 = vmul.f32 -1.442695, %v9913_v11  ;;  %v3766_v16 = vadd.f32 %v3729_v45, %v3618_v29  ;;  %v3049_v37 = vadd.f32 %v9789_v38, %v2901_v33  ;;  %v3474_v29 = vadd.f32 %v3443_v20, %v3326_v12  ;;  %v11564_v45 = vld [vmem:[#allocation14_spill] sm:$0xff] }
 0x53a   : > { %v9930_v26 = vpop.f32.mrf.mxu0  ;;  %v3175_v4 = vadd.f32 %v9803_v1, %v3045_v15  ;;  %v3056_v38 = vadd.f32 %v9805_v63, %v9793_v54  ;;  %v3183_v1 = vadd.f32 %v9825_v18, %v3053_v55  ;;  %v3325_v54 = vadd.f32 %v9827_v41, %v9811_v51  ;;  %v11567_v33 = vld [vmem:[#allocation36_spill] sm:$0xff]  ;;  %v3609_v15 = vpop.f32.mrf.mxu1 }
 0x53b   : > { %8623 = vpow2.f32 %v7914_v52  ;;  %v9935_v31 = vadd.f32 %v9923_v6, %v3766_v16  ;;  %v3179_v42 = vadd.f32 %v9815_v0, %v3049_v37  ;;  %v3622_v35 = vadd.f32 %v3591_v21, %v3474_v29  ;;  %v11565_v52 = vld [vmem:[#allocation15_spill] sm:$0xff] }
 0x53c   : > { %v3735_v19 = vpop.f32.mrf.mxu0  ;;  %v3323_v59 = vadd.f32 %v9819_v32, %v3175_v4  ;;  %v3184_v63 = vadd.f32 %v9829_v30, %v3054_v14  ;;  %v3329_v0 = vadd.f32 %v9843_v56, %v9821_v13  ;;  %v3476_v36 = vadd.f32 %v9869_v57, %v3328_v27  ;;  %v11561_v56 = vld [vmem:[#allocation11_spill] sm:$0xff]  ;;  %v11562_v57 = vld [vmem:[#allocation10_spill] sm:$0xff] }
 0x53d   : > { %v7916_v2 = vmul.f32 -1.442695, %v9935_v31  ;;  %v3768_v39 = vadd.f32 %v3735_v19, %v3620_v34  ;;  %v3185_v21 = vadd.f32 %v9833_v9, %v3055_v43  ;;  %v3327_v32 = vadd.f32 %v9835_v8, %v3179_v42  ;;  %v11568_v34 = vld [vmem:[#allocation17_spill] sm:$0xff]  ;;  %v11570_v14 = vld [vmem:[#allocation19_spill] sm:$0xff] }
 0x53e   : > { %v9950_v28 = vpop.f32.mrf.mxu0  ;;  %v3186_v18 = vadd.f32 %v9837_v7, %v3056_v38  ;;  %v3187_v51 = vadd.f32 %v9841_v48, %v3057_v44  ;;  %v3477_v30 = vadd.f32 %v9871_v22, %v3329_v0  ;;  %v3624_v53 = vadd.f32 %v11560_v17, %v3476_v36  ;;  %v11566_v48 = vld [vmem:[#allocation16_spill] sm:$0xff]  ;;  %v11571_v43 = vld [vmem:[#allocation25_spill] sm:$0xff]  ;;  %v11573_v38 = vld [vmem:[#allocation26_spill] sm:$0xff] }
 0x53f   : > { %8625 = vpow2.f32 %v7916_v2  ;;  %v9955_v10 = vadd.f32 %v9893_v62, %v3768_v39  ;;  %v3330_v3 = vadd.f32 %v11562_v57, %v11561_v56  ;;  %v3331_v9 = vadd.f32 %v11563_v5, %v3183_v1  ;;  %v11572_v39 = vld [vmem:[#allocation27_spill] sm:$0xff]  ;;  %v11575_v1 = vld [vmem:[#allocation13_spill] sm:$0xff]  ;;  %v11580_v57 = vld [vmem:[#allocation32_spill] sm:$0xff] }
 0x540   : > { %v3739_v24 = vpop.f32.mrf.mxu0  ;;  %v3332_v8 = vadd.f32 %v11564_v45, %v3184_v63  ;;  %v3333_v7 = vadd.f32 %v11565_v52, %v3185_v21  ;;  %v3471_v50 = vadd.f32 %v11566_v48, %v3323_v59  ;;  %v3625_v22 = vadd.f32 %v11567_v33, %v3477_v30  ;;  %v11576_v63 = vld [vmem:[#allocation21_spill] sm:$0xff]  ;;  %v11577_v0 = vld [vmem:[#allocation23_spill] sm:$0xff]  ;;  %v3611_v30 = vpop.f32.mrf.mxu1  ;;  %v11581_v45 = vld [vmem:[#allocation28_spill] sm:$0xff] }
 0x541   : > { %v7918_v25 = vmul.f32 -1.442695, %v9955_v10  ;;  %v3770_v20 = vadd.f32 %v3739_v24, %v3622_v35  ;;  %v3334_v37 = vadd.f32 %v11568_v34, %v3186_v18  ;;  %v3335_v55 = vadd.f32 %v11569_v40, %v3187_v51  ;;  %v11574_v35 = vld [vmem:[#allocation20_spill] sm:$0xff] }
 0x542   : > { %v3741_v41 = vpop.f32.mrf.mxu0  ;;  %v3473_v19 = vadd.f32 %v11570_v14, %v3325_v54  ;;  %v3478_v29 = vadd.f32 %v11571_v43, %v3330_v3  ;;  %v3479_v4 = vadd.f32 %v11572_v39, %v3331_v9  ;;  %v3475_v59 = vadd.f32 %v11574_v35, %v3327_v32  ;;  %v3613_v34 = vpop.f32.mrf.mxu1 }
 0x543   : > { %8627 = vpow2.f32 %v7918_v25  ;;  %v9973_v13 = vadd.f32 %v9901_v58, %v3770_v20  ;;  %v3617_v24 = vadd.f32 %v11576_v63, %v11575_v1  ;;  %v3619_v36 = vadd.f32 %v11577_v0, %v3471_v50  ;;  %v11578_v20 = vld [vmem:[#allocation29_spill] sm:$0xff] }
 0x544   : > { %v3745_v16 = vpop.f32.mrf.mxu0  ;;  %v3626_v54 = vadd.f32 %v9920_v60, %v3478_v29  ;;  %v3480_v21 = vadd.f32 %v11578_v20, %v3332_v8  ;;  %v3627_v51 = vadd.f32 %v3603_v61, %v3479_v4  ;;  %v3623_v3 = vadd.f32 %v11580_v57, %v3475_v59  ;;  %v11582_v60 = vld [vmem:[#allocation33_spill] sm:$0xff] }
 0x545   : > { %v7920_v47 = vmul.f32 -1.442695, %v9973_v13  ;;  %v3772_v12 = vadd.f32 %v3745_v16, %v3624_v53  ;;  %v11579_v53 = vld [vmem:[#allocation31_spill] sm:$0xff]  ;;  %v3621_v52 = vadd.f32 %v11581_v45, %v3473_v19  ;;  %v3482_v16 = vadd.f32 %v11582_v60, %v3334_v37 }
 0x546   : > { %v3747_v2 = vpop.f32.mrf.mxu0  ;;  %v3481_v56 = vadd.f32 %v11579_v53, %v3333_v7  ;;  %v3628_v48 = vadd.f32 %v3607_v46, %v3480_v21  ;;  %v3771_v33 = vadd.f32 %v3741_v41, %v3623_v3  ;;  %v11584_v19 = vld [vmem:[#allocation35_spill] sm:$0xff]  ;;  %v3767_v46 = vadd.f32 %v9930_v26, %v3619_v36 }
 0x547   : > { %8629 = vpow2.f32 %v7920_v47  ;;  %v9989_v44 = vadd.f32 %v11573_v38, %v3772_v12  ;;  %v3773_v42 = vadd.f32 %v3747_v2, %v3625_v22  ;;  %v11583_v22 = vld [vmem:[#allocation30_spill] sm:$0xff]  ;;  %v3483_v43 = vadd.f32 %v11584_v19, %v3335_v55 }
 0x548   : > { %v8624_v27 = vpop.eup %8623  ;;  %v3749_v25 = vpop.f32.mrf.mxu0  ;;  %v3629_v61 = vadd.f32 %v3609_v15, %v3481_v56  ;;  %v11585_v2 = vld [vmem:[#allocation22_spill] sm:$0xff]  ;;  %v3769_v35 = vadd.f32 %v9950_v28, %v3621_v52  ;;  %v10021_v59 = vadd.f32 %v9901_v58, %v3771_v33  ;;  %v10030_v21 = vadd.f32 %v9923_v6, %v3767_v46 }
 0x549   : > { %v3892_v18 = vadd.f32 1.0, %v8624_v27  ;;  %v7922_v17 = vmul.f32 -1.442695, %v9989_v44  ;;  %v10001_v32 = vadd.f32 %v11573_v38, %v3773_v42  ;;  %v3774_v5 = vadd.f32 %v3749_v25, %v3626_v54 }
 0x54a   : > { %v3751_v9 = vpop.f32.mrf.mxu0  ;;  %v3630_v42 = vadd.f32 %v3611_v30, %v3482_v16  ;;  %v3631_v27 = vadd.f32 %v3613_v34, %v3483_v43  ;;  %v3765_v54 = vadd.f32 %v9909_v23, %v3617_v24  ;;  %v10033_v58 = vadd.f32 %v9893_v62, %v3769_v35 }
 0x54b   : > { %v3775_v8 = vadd.f32 %v3751_v9, %v3627_v51  ;;  %8631 = vpow2.f32 %v7922_v17  ;;  %v10006_v47 = vadd.f32 %v11583_v22, %v3774_v5  ;;  %v7923_v37 = vmul.f32 -1.442695, %v10001_v32 }
 0x54c   : > { %v8626_v50 = vpop.eup %8625  ;;  %v3755_v7 = vpop.f32.mrf.mxu0  ;;  %8633 = vrcp.f32 %v3892_v18  ;;  %v11586_v18 = vld [vmem:[#allocation24_spill] sm:$0xff]  ;;  %v7921_v17 = vmul.f32 -1.442695, %v10021_v59  ;;  %v10044_v6 = vadd.f32 %v9905_v49, %v3765_v54  ;;  %v7919_v53 = vmul.f32 -1.442695, %v10033_v58 }
 0x54d   : > { %v3894_v12 = vadd.f32 1.0, %v8626_v50  ;;  %v10009_v40 = vadd.f32 %v11583_v22, %v3775_v8  ;;  %v3776_v14 = vadd.f32 %v3755_v7, %v3628_v48  ;;  %v7924_v41 = vmul.f32 -1.442695, %v10006_v47 }
 0x54e   : > { %v3757_v15 = vpop.f32.mrf.mxu0  ;;  %v7917_v57 = vmul.f32 -1.442695, %v10030_v21  ;;  %v7915_v9 = vmul.f32 -1.442695, %v10044_v6 }
 0x54f   : > { %8635 = vrcp.f32 %v3894_v12  ;;  %v7925_v29 = vmul.f32 -1.442695, %v10009_v40  ;;  %v10017_v39 = vadd.f32 %v11585_v2, %v3776_v14  ;;  %v3777_v4 = vadd.f32 %v3757_v15, %v3629_v61 }
 0x550   : > { %v8628_v38 = vpop.eup %8627  ;;  %8637 = vpow2.f32 %v7924_v41  ;;  %v3759_v55 = vpop.f32.mrf.mxu0 }
 0x551   : > { %v3896_v26 = vadd.f32 1.0, %v8628_v38  ;;  %v7926_v1 = vmul.f32 -1.442695, %v10017_v39  ;;  %v10025_v63 = vadd.f32 %v11585_v2, %v3777_v4  ;;  %8639 = vpow2.f32 %v7923_v37 }
 0x552   : > { %v3778_v0 = vadd.f32 %v3759_v55, %v3630_v42  ;;  %v3761_v36 = vpop.f32.mrf.mxu0  ;;  %8641 = vpow2.f32 %v7925_v29 }
 0x553   : > { %v7927_v25 = vmul.f32 -1.442695, %v10025_v63  ;;  %v3779_v28 = vadd.f32 %v3761_v36, %v3631_v27  ;;  %8643 = vpow2.f32 %v7926_v1 }
 0x554   : > { %v8630_v20 = vpop.eup %8629  ;;  %v10036_v51 = vadd.f32 %v11586_v18, %v3778_v0  ;;  %8645 = vrcp.f32 %v3896_v26 }
 0x555   : > { %v3898_v30 = vadd.f32 1.0, %v8630_v20  ;;  %v10040_v23 = vadd.f32 %v11586_v18, %v3779_v28  ;;  %8647 = vpow2.f32 %v7927_v25 }
 0x556   : > { %v7928_v24 = vmul.f32 -1.442695, %v10036_v51 }
 0x557   : > { %8649 = vrcp.f32 %v3898_v30  ;;  %v7929_v62 = vmul.f32 -1.442695, %v10040_v23 }
 0x558   : > { %8651 = vpow2.f32 %v7928_v24  ;;  %v8632_v56 = vpop.eup %8631 }
 0x559   : > { %8653 = vpow2.f32 %v7921_v17  ;;  %v8634_v3 = vpop.eup %8633  ;;  %v3900_v5 = vadd.f32 1.0, %v8632_v56 }
 0x55a   : > { %8655 = vpow2.f32 %v7929_v62  ;;  %v3940_v49 = vmul.f32 %v8634_v3, %v9913_v11 }
 0x55b   : > { %8657 = vpow2.f32 %v7919_v53 }
 0x55c   : > { %v8636_v45 = vpop.eup %8635  ;;  %8659 = vpow2.f32 %v7917_v57 }
 0x55d   : > { %v8638_v52 = vpop.eup %8637  ;;  %v3942_v60 = vmul.f32 %v8636_v45, %v9935_v31  ;;  %8661 = vrcp.f32 %v3900_v5  ;;  %v11589_v45 = vld [vmem:[#allocation4_spill] sm:$0xff] }
 0x55e   : > { %v3902_v16 = vadd.f32 1.0, %v8638_v52  ;;  %v8640_v48 = vpop.eup %8639  ;;  %8663 = vpow2.f32 %v7915_v9 }
 0x55f   : > { %v10052_v8 = vpack.c.bf16 %v3942_v60, %v3940_v49  ;;  %v8642_v50 = vpop.eup %8641  ;;  %v3901_v15 = vadd.f32 1.0, %v8640_v48  ;;  %v11591_v60 = vld [vmem:[#allocation2_spill] sm:$0xff] }
 0x560   : > { %8665 = vrcp.f32 %v3902_v16  ;;  %v8644_v61 = vpop.eup %8643  ;;  %v3903_v19 = vadd.f32 1.0, %v8642_v50 }
 0x561   : > { %v8646_v33 = vpop.eup %8645  ;;  %v3904_v22 = vadd.f32 1.0, %v8644_v61 }
 0x562   : > { %v8648_v7 = vpop.eup %8647  ;;  %v3944_v11 = vmul.f32 %v8646_v33, %v9955_v10 }
 0x563   : > { %v3905_v34 = vadd.f32 1.0, %v8648_v7  ;;  %8667 = vrcp.f32 %v3904_v22 }
 0x564   : > { %v8650_v12 = vpop.eup %8649 }
 0x565   : > { %v8652_v14 = vpop.eup %8651  ;;  %v3946_v31 = vmul.f32 %v8650_v12, %v9973_v13  ;;  %8669 = vrcp.f32 %v3905_v34 }
 0x566   : > { %v8654_v43 = vpop.eup %8653  ;;  %v3906_v46 = vadd.f32 1.0, %v8652_v14 }
 0x567   : > { %v8656_v37 = vpop.eup %8655  ;;  %v10056_v41 = vpack.c.bf16 %v3946_v31, %v3944_v11  ;;  %v3899_v38 = vadd.f32 1.0, %v8654_v43 }
 0x568   : > { %8671 = vrcp.f32 %v3906_v46  ;;  %v3907_v29 = vadd.f32 1.0, %v8656_v37  ;;  %v8658_v2 = vpop.eup %8657 }
 0x569   : > { %8673 = vrcp.f32 %v3903_v19  ;;  %v8660_v4 = vpop.eup %8659  ;;  %v3897_v27 = vadd.f32 1.0, %v8658_v2 }
 0x56a   : > { %8675 = vrcp.f32 %v3907_v29  ;;  %v8662_v42 = vpop.eup %8661  ;;  %v3895_v35 = vadd.f32 1.0, %v8660_v4 }
 0x56b   : > { %v8664_v10 = vpop.eup %8663  ;;  %8677 = vrcp.f32 %v3901_v15  ;;  %v3948_v55 = vmul.f32 %v8662_v42, %v9989_v44 }
 0x56c   : > { %8679 = vrcp.f32 %v3899_v38  ;;  %v3893_v1 = vadd.f32 1.0, %v8664_v10 }
 0x56d   : > { %v8666_v13 = vpop.eup %8665  ;;  %8681 = vrcp.f32 %v3897_v27  ;;  %v5436_v27 = vld [vmem:[%s11413_s8 + $0x30] sm:$0xff] }
 0x56e   : > { %v3950_v26 = vmul.f32 %v8666_v13, %v10006_v47  ;;  %8683 = vrcp.f32 %v3895_v35  ;;  %v5437_v35 = vld [vmem:[%s11413_s8 + $0x38] sm:$0xff] }
 0x56f   : > { %8685 = vrcp.f32 %v3893_v1  ;;  %v5434_v1 = vld [vmem:[%s11413_s8 + $0x20] sm:$0xff] }
 0x570   : > { %v10060_v0 = vpack.c.bf16 %v3950_v26, %v3948_v55  ;;  %v8668_v36 = vpop.eup %8667 }
 0x571   : > { %v3952_v20 = vmul.f32 %v8668_v36, %v10017_v39 }
 0x572   : > { %v8670_v54 = vpop.eup %8669 }
 0x573   : > { %v3953_v17 = vmul.f32 %v8670_v54, %v10025_v63  ;;  %v8487_v54 = vld [vmem:[%s11412_s7 + $0x20] sm:$0xff]  }
 0x575   : > { %v8672_v25 = vpop.eup %8671 }
 0x576   : > { %v8674_v28 = vpop.eup %8673  ;;  %v3954_v18 = vmul.f32 %v8672_v25, %v10036_v51  ;;  %v5435_v25 = vld [vmem:[%s11413_s8 + $0x28] sm:$0xff] }
 0x577   : > { %v8676_v30 = vpop.eup %8675  ;;  %v3951_v62 = vmul.f32 %v8674_v28, %v10009_v40 }
 0x578   : > { %v10065_v44 = vpack.c.bf16 %v3954_v18, %v3952_v20  ;;  %v3955_v47 = vmul.f32 %v8676_v30, %v10040_v23  ;;  %v8678_v24 = vpop.eup %8677  ;;  %v5432_v20 = vld [vmem:[%s11413_s8 + $0x10] sm:$0xff]  ;;  %v5433_v30 = vld [vmem:[%s11413_s8 + $0x18] sm:$0xff] }
 0x579   : > { %v8680_v56 = vpop.eup %8679  ;;  %v3949_v39 = vmul.f32 %v8678_v24, %v10001_v32  ;;  %v5430_v24 = vld [vmem:[%s11413_s8] sm:$0xff] }
 0x57a   : > { %v10069_v53 = vpack.c.bf16 %v3955_v47, %v3953_v17  ;;  %4052 = vrot.lane.b32.xlu1 %v10065_v44, %s11587_s2  ;;  %v8682_v51 = vpop.eup %8681  ;;  %v3947_v63 = vmul.f32 %v8680_v56, %v10021_v59  ;;  %v11594_v17 = vmov 0   ;;  %v8488_v56 = vld [vmem:[%s11412_s7 + $0x28] sm:$0xff]  }
 0x57b   : > { %v10077_v57 = vpack.c.bf16 %v3951_v62, %v3949_v39  ;;  %v8684_v40 = vpop.eup %8683  ;;  %v3945_v23 = vmul.f32 %v8682_v51, %v10033_v58  ;;  %v11588_v58 = vld [vmem:[#allocation3_spill] sm:$0xff] }
 0x57c   : > { %4054 = vrot.lane.b32.xlu0 %v10069_v53, %s11587_s2  ;;  %v8686_v3 = vpop.eup %8685  ;;  %v3943_v32 = vmul.f32 %v8684_v40, %v10030_v21  ;;  %v3968_v21 = vmul.bf16 %v10060_v0, %v11588_v58  ;;  %v3966_v48 = vmul.bf16 %v10056_v41, %v11588_v58  ;;  %v3970_v61 = vmul.bf16 %v10065_v44, %v11588_v58  ;;  %v5431_v39 = vld [vmem:[%s11413_s8 + $0x8] sm:$0xff] }
 0x57d   : > { %v10085_v5 = vpack.c.bf16 %v3947_v63, %v3945_v23  ;;  %v3941_v59 = vmul.f32 %v8686_v3, %v10044_v6  ;;  %v3969_v52 = vmul.bf16 %v10077_v57, %v11589_v45  ;;  %v11590_v6 = vld [vmem:[#allocation5_spill] sm:$0xff]  ;;  %v3977_v16 = vmul.bf16 %v10077_v57, %v11591_v60 }
 0x57e   : > { %4048 = vrot.lane.b32.xlu1 %v10060_v0, %s11587_s2  ;;  %v3976_v49 = vmul.bf16 %v10060_v0, %v11590_v6  ;;  %v3971_v33 = vmul.bf16 %v10069_v53, %v11589_v45  ;;  %v3978_v22 = vmul.bf16 %v10065_v44, %v11590_v6  ;;  %v3979_v7 = vmul.bf16 %v10069_v53, %v11591_v60 }
 0x57f   : > { %v10092_v9 = vpack.c.bf16 %v3943_v32, %v3941_v59  ;;  %v3967_v50 = vmul.bf16 %v10085_v5, %v11589_v45  ;;  %v3974_v12 = vmul.bf16 %v10056_v41, %v11590_v6  ;;  %v3975_v34 = vmul.bf16 %v10085_v5, %v11591_v60  ;;  %v8489_v32 = vld [vmem:[%s11412_s7 + $0x30] sm:$0xff]  }
 0x580   : > { %4050 = vrot.lane.b32.xlu0 %v10077_v57, %s11587_s2  ;;  %v3964_v14 = vmul.bf16 %v10052_v8, %v11588_v58  ;;  %v3972_v31 = vmul.bf16 %v10052_v8, %v11590_v6 }
 0x581   : > { %v3965_v11 = vmul.bf16 %v10092_v9, %v11589_v45  ;;  %v3973_v19 = vmul.bf16 %v10092_v9, %v11591_v60 }
 0x582   : > { %4044 = vrot.lane.b32.xlu1 %v10056_v41, %s11587_s2 }
 0x584   : > { %4046 = vrot.lane.b32.xlu0 %v10085_v5, %s11587_s2 }
 0x586   : > { %4040 = vrot.lane.b32.xlu1 %v10052_v8, %s11587_s2 }
 0x588   : > { %4042 = vrot.lane.b32.xlu0 %v10092_v9, %s11587_s2 }
 0x58a   : > { %3996 = vrot.lane.b32.xlu1 %v3968_v21, %s11522_s20 }
 0x58c   : > { %3998 = vrot.lane.b32.xlu0 %v3969_v52, %s11522_s20 }
 0x58e   : > { %4312 = vrot.lane.b32.xlu1 %v3976_v49, %s11525_s28 }
 0x590   : > { %4314 = vrot.lane.b32.xlu0 %v3977_v16, %s11525_s28 }
 0x592   : > { %3992 = vrot.lane.b32.xlu1 %v3966_v48, %s11522_s20 }
 0x594   : > { %3994 = vrot.lane.b32.xlu0 %v3967_v50, %s11522_s20 }
 0x596   : > { %4000 = vrot.lane.b32.xlu1 %v3970_v61, %s11522_s20 }
 0x598   : > { %4002 = vrot.lane.b32.xlu0 %v3971_v33, %s11522_s20 }
 0x59a   : > { %4316 = vrot.lane.b32.xlu1 %v3978_v22, %s11525_s28 }
 0x59c   : > { %4318 = vrot.lane.b32.xlu0 %v3979_v7, %s11525_s28 }
 0x59e   : > { %4308 = vrot.lane.b32.xlu1 %v3974_v12, %s11525_s28 }
 0x5a0   : > { %4310 = vrot.lane.b32.xlu0 %v3975_v34, %s11525_s28 }
 0x5a2   : > { %3988 = vrot.lane.b32.xlu1 %v3964_v14, %s11522_s20 }
 0x5a4   : > { %3990 = vrot.lane.b32.xlu0 %v3965_v11, %s11522_s20 }
 0x5a6   : > { %4304 = vrot.lane.b32.xlu1 %v3972_v31, %s11525_s28 }
 0x5a8   : > { %4306 = vrot.lane.b32.xlu0 %v3973_v19, %s11525_s28 }
 0x5aa   : > { %4482 = vrot.lane.b32.xlu1 %v3970_v61, %s11501_s17 }
 0x5ac   : > { %4484 = vrot.lane.b32.xlu0 %v3971_v33, %s11501_s17 }
 0x5ae   : > { %4478 = vrot.lane.b32.xlu1 %v3968_v21, %s11501_s17 }
 0x5b0   : > { %4480 = vrot.lane.b32.xlu0 %v3969_v52, %s11501_s17 }
 0x5b2   : > { %4474 = vrot.lane.b32.xlu1 %v3966_v48, %s11501_s17 }
 0x5b4   : > { %4476 = vrot.lane.b32.xlu0 %v3967_v50, %s11501_s17 }
 0x5b6   : > { %4470 = vrot.lane.b32.xlu1 %v3964_v14, %s11501_s17 }
 0x5b8   : > { %4472 = vrot.lane.b32.xlu0 %v3965_v11, %s11501_s17 }
 0x5ba   : > { %4778 = vrot.lane.b32.xlu1 %v3978_v22, %s11502_s21 }
 0x5bc   : > { %4776 = vrot.lane.b32.xlu0 %v3977_v16, %s11502_s21 }
 0x5be   : > { %4944 = vrot.lane.b32.xlu1 %v3970_v61, %s11503_s22 }
 0x5c0   : > { %4942 = vrot.lane.b32.xlu0 %v3969_v52, %s11503_s22 }
 0x5c2   : > { %4774 = vrot.lane.b32.xlu1 %v3976_v49, %s11502_s21 }
 0x5c4   : > { %4772 = vrot.lane.b32.xlu0 %v3975_v34, %s11502_s21 }
 0x5c6   : > { %4940 = vrot.lane.b32.xlu1 %v3968_v21, %s11503_s22 }
 0x5c8   : > { %4780 = vrot.lane.b32.xlu0 %v3979_v7, %s11502_s21 }
 0x5ca   : > { %4770 = vrot.lane.b32.xlu1 %v3974_v12, %s11502_s21 }
 0x5cc   : > { %4946 = vrot.lane.b32.xlu0 %v3971_v33, %s11503_s22 }
 0x5ce   : > { %4936 = vrot.lane.b32.xlu1 %v3966_v48, %s11503_s22 }
 0x5d0   : > { %4938 = vrot.lane.b32.xlu0 %v3967_v50, %s11503_s22 }
 0x5d2   : > { %4766 = vrot.lane.b32.xlu1 %v3972_v31, %s11502_s21 }
 0x5d4   : > { %4768 = vrot.lane.b32.xlu0 %v3973_v19, %s11502_s21 }
 0x5d6   : > { %4932 = vrot.lane.b32.xlu1 %v3964_v14, %s11503_s22 }
 0x5d8   : > { %4934 = vrot.lane.b32.xlu0 %v3965_v11, %s11503_s22 }
 0x5da   : > { %5110 = vrot.lane.b32.xlu1 %v10065_v44, %s11527_s27 }
 0x5dc   : > { %5112 = vrot.lane.b32.xlu0 %v10069_v53, %s11527_s27 }
 0x5de   : > { %5276 = vrot.lane.b32.xlu1 %v3978_v22, %s11592_s16 }
 0x5e0   : > { %5108 = vrot.lane.b32.xlu0 %v10077_v57, %s11527_s27 }
 0x5e2   : > { %5106 = vrot.lane.b32.xlu1 %v10060_v0, %s11527_s27 }
 0x5e4   : > { %5274 = vrot.lane.b32.xlu0 %v3977_v16, %s11592_s16 }
 0x5e6   : > { %5272 = vrot.lane.b32.xlu1 %v3976_v49, %s11592_s16 }
 0x5e8   : > { %5104 = vrot.lane.b32.xlu0 %v10085_v5, %s11527_s27 }
 0x5ea   : > { %5102 = vrot.lane.b32.xlu1 %v10056_v41, %s11527_s27 }
 0x5ec   : > { %5278 = vrot.lane.b32.xlu0 %v3979_v7, %s11592_s16  ;;  %v4053_v43 = vpop.permute.xlu1 %4052  ;;  %v8490_v7 = vld [vmem:[%s11412_s7 + $0x38] sm:$0xff]  }
 0x5ee   : > { %v4055_v46 = vpop.permute.xlu0 %4054  ;;  %5268 = vrot.lane.b32.xlu1 %v3974_v12, %s11592_s16 }
 0x5ef   : > { %v4059_v37 = vsel %vm580_vm4, %v4053_v43, %v4055_v46 }
 0x5f0   : > { %5270 = vrot.lane.b32.xlu0 %v3975_v34, %s11592_s16  ;;  %4126 = vmatprep.subr.bf16.mxu1 %v4059_v37  ;;  %v4049_v15 = vpop.permute.xlu1 %4048  ;;  %v8492_v37 = vld [vmem:[%s11412_s7 + $0x40] sm:$0xff]  }
 0x5f1   : > { %7943 = vmatpush1.bf16.msk.msra.mxu1 %vm9235_vm14, %v4053_v43 }
 0x5f2   : > { %v4051_v2 = vpop.permute.xlu0 %4050  ;;  %5098 = vrot.lane.b32.xlu1 %v10052_v8, %s11527_s27 }
 0x5f3   : > { %v4058_v4 = vsel %vm580_vm4, %v4049_v15, %v4051_v2 }
 0x5f4   : > { %5100 = vrot.lane.b32.xlu0 %v10092_v9, %s11527_s27  ;;  %4128 = vmatprep.subr.bf16.mxu1 %v4058_v4  ;;  %v4045_v38 = vpop.permute.xlu1 %4044 }
 0x5f5   : > { %7945 = vmatpush1.bf16.msk.msra.mxu1 %vm9235_vm14, %v4049_v15 }
 0x5f6   : > { %v4047_v42 = vpop.permute.xlu0 %4046  ;;  %5264 = vrot.lane.b32.xlu1 %v3972_v31, %s11592_s16  ;;  %v8491_v31 = vld [vmem:[%s11412_s7] sm:$0xff]  }
 0x5f7   : > { %v4057_v10 = vsel %vm580_vm4, %v4045_v38, %v4047_v42 }
 0x5f8   : > { %5266 = vrot.lane.b32.xlu0 %v3973_v19, %s11592_s16  ;;  %4130 = vmatprep.subr.bf16.mxu1 %v4057_v10  ;;  %v4041_v13 = vpop.permute.xlu1 %4040 }
 0x5f9   : > { %7947 = vmatpush1.bf16.msk.msra.mxu1 %vm9235_vm14, %v4045_v38  ;;  %v8493_v38 = vld [vmem:[%s11412_s7 + $0x8] sm:$0xff]  }
 0x5fa   : > { %v4043_v55 = vpop.permute.xlu0 %4042  ;;  %5470 = vperm.xlu1 %8412, %v5436_v27  }
 0x5fb   : > { %v4056_v26 = vsel %vm580_vm4, %v4041_v13, %v4043_v55  ;;  %v8495_v55 = vld [vmem:[%s11412_s7 + $0x10] sm:$0xff]  }
 0x5fc   : > { %5475 = vperm.xlu0 %8411, %v5437_v35   ;;  %4132 = vmatprep.subr.bf16.mxu1 %v4056_v26  ;;  %v3997_v36 = vpop.permute.xlu1 %3996 }
 0x5fd   : > { %7949 = vmatpush1.bf16.msk.msra.mxu1 %vm9235_vm14, %v4041_v13  ;;  %v8494_v13 = vld [vmem:[%s11412_s7 + $0x48] sm:$0xff]  }
 0x5fe   : > { %v3999_v28 = vpop.permute.xlu0 %3998  ;;  %5460 = vperm.xlu1 %8412, %v5434_v1   ;;  %v8496_v1 = vld [vmem:[%s11412_s7 + $0x50] sm:$0xff]  }
 0x5ff   : > { %v4006_v21 = vsel %vm561_vm6, %v3997_v36, %v3999_v28 }
 0x600   : > { %5465 = vperm.xlu0 %8411, %v5435_v25   ;;  %7950 = vmatmul.mubr.msk.bf16.vlgmr.msra.gmra.mxu1 %vm4105_vm3, %v8487_v54  ;;  %v4313_v18 = vpop.permute.xlu1 %4312 }
 0x601   : > { %4160 = vmatprep.mubr.bf16.mxu1 %v11594_v17 }
 0x602   : > { %v4315_v47 = vpop.permute.xlu0 %4314  ;;  %5450 = vperm.xlu1 %8412, %v5432_v20  }
 0x603   : > { %v4322_v61 = vsel %vm749_vm8, %v4313_v18, %v4315_v47 }
 0x604   : > { %5455 = vperm.xlu0 %8411, %v5433_v30   ;;  %v3993_v62 = vpop.permute.xlu1 %3992 }
 0x606   : > { %v3995_v51 = vpop.permute.xlu0 %3994  ;;  %5440 = vperm.xlu1 %8412, %v5430_v24  }
 0x607   : > { %v4005_v50 = vsel %vm561_vm6, %v3993_v62, %v3995_v51 }
 0x608   : > { %5445 = vperm.xlu0 %8411, %v5431_v39   ;;  %7951 = vmatmul.mubr.msk.bf16.gmra.mxu1 %vm4105_vm3, %v8488_v56  ;;  %v4001_v63 = vpop.permute.xlu1 %4000 }
 0x609   : > { %4170 = vmatprep.mubr.bf16.mxu1 %v11594_v17 }
 0x60a   : > { %v4003_v40 = vpop.permute.xlu0 %4002 }
 0x60b   : > { %v4007_v23 = vsel %vm561_vm6, %v4001_v63, %v4003_v40  ;;  %v8501_v40 = vld [vmem:[%s11412_s7 + $0x68] sm:$0xff]  }
 0x60c   : > { %4231 = vmatprep.subr.bf16.mxu0 %v4007_v23  ;;  %v4317_v3 = vpop.permute.xlu1 %4316 }
 0x60d   : > { %7959 = vmatpush1.bf16.msk.msra.mxu0 %vm9251_vm0, %v4001_v63 }
 0x60e   : > { %v4319_v52 = vpop.permute.xlu0 %4318  ;;  %4233 = vmatprep.subr.bf16.mxu0 %v4006_v21 }
 0x60f   : > { %v4323_v49 = vsel %vm749_vm8, %v4317_v3, %v4319_v52  ;;  %v8502_v52 = vld [vmem:[%s11412_s7 + $0x88] sm:$0xff]  }
 0x610   : > { %7952 = vmatmul.mubr.msk.bf16.gmra.mxu1 %vm4105_vm3, %v8489_v32  ;;  %4389 = vmatprep.subr.bf16.mxu1 %v4323_v49  ;;  %v4309_v16 = vpop.permute.xlu1 %4308 }
 0x611   : > { %7961 = vmatpush1.bf16.msk.msra.mxu0 %vm9251_vm0, %v3997_v36  ;;  %7983 = vmatpush1.bf16.msk.msra.mxu1 %vm9263_vm1, %v4317_v3  ;;  %v8497_v36 = vld [vmem:[%s11412_s7 + $0x18] sm:$0xff]  }
 0x612   : > { %v4311_v33 = vpop.permute.xlu0 %4310  ;;  %4235 = vmatprep.subr.bf16.mxu0 %v4005_v50  ;;  %4391 = vmatprep.subr.bf16.mxu1 %v4322_v61 }
 0x613   : > { %4180 = vmatprep.mubr.bf16.mxu1 %v11594_v17  ;;  %v4321_v12 = vsel %vm749_vm8, %v4309_v16, %v4311_v33  ;;  %v8503_v33 = vld [vmem:[%s11412_s7 + $0x70] sm:$0xff]  }
 0x614   : > { %v3989_v22 = vpop.permute.xlu1 %3988 }
 0x615   : > { %7963 = vmatpush1.bf16.msk.msra.mxu0 %vm9251_vm0, %v3993_v62  ;;  %7985 = vmatpush1.bf16.msk.msra.mxu1 %vm9263_vm1, %v4313_v18  ;;  %v8499_v18 = vld [vmem:[%s11412_s7 + $0x60] sm:$0xff]  }
 0x616   : > { %v3991_v34 = vpop.permute.xlu0 %3990  ;;  %4393 = vmatprep.subr.bf16.mxu1 %v4321_v12  ;;  %v8500_v62 = vld [vmem:[%s11412_s7 + $0x80] sm:$0xff]  }
 0x617   : > { %v4004_v14 = vsel %vm561_vm6, %v3989_v22, %v3991_v34  ;;  %v8504_v34 = vld [vmem:[%s11412_s7 + $0x90] sm:$0xff]  }
 0x618   : > { %7953 = vmatmul.mubr.msk.bf16.gmra.mxu1 %vm4105_vm3, %v8490_v7  ;;  %4237 = vmatprep.subr.bf16.mxu0 %v4004_v14  ;;  %v4305_v11 = vpop.permute.xlu1 %4304 }
 0x619   : > { %7965 = vmatpush1.bf16.msk.msra.mxu0 %vm9251_vm0, %v3989_v22  ;;  %7987 = vmatpush1.bf16.msk.msra.mxu1 %vm9263_vm1, %v4309_v16 }
 0x61a   : > { %v4307_v19 = vpop.permute.xlu0 %4306  ;;  %4413 = vmatprep.mubr.bf16.mxu1 %v11594_v17 }
 0x61b   : > { %v4320_v43 = vsel %vm749_vm8, %v4305_v11, %v4307_v19 }
 0x61c   : > { %7966 = vmatmul.mubr.msk.bf16.vlgmr.msra.gmra.mxu0 %vm4105_vm3, %v8491_v31  ;;  %4395 = vmatprep.subr.bf16.mxu1 %v4320_v43  ;;  %v4483_v46 = vpop.permute.xlu1 %4482  ;;  %v8505_v31 = vld [vmem:[%s11412_s7 + $0x78] sm:$0xff]  }
 0x61d   : > { %7989 = vmatpush1.bf16.msk.msra.mxu1 %vm9263_vm1, %v4305_v11  ;;  %4265 = vmatprep.mubr.bf16.mxu0 %v11594_v17 }
 0x61e   : > { %v4485_v15 = vpop.permute.xlu0 %4484  ;;  %4685 = vmatprep.subr.bf16.mxu1 %v10069_v53 }
 0x61f   : > { %v4489_v2 = vsel %vm845_vm9, %v4483_v46, %v4485_v15 }
 0x620   : > { %7990 = vmatmul.mubr.msk.bf16.vlgmr.msra.gmra.mxu1 %vm4105_vm3, %v8492_v37  ;;  %4555 = vmatprep.subr.bf16.mxu0 %v4489_v2  ;;  %v4479_v4 = vpop.permute.xlu1 %4478  ;;  %v8507_v2 = vld [vmem:[%s11412_s7 + $0xa0] sm:$0xff]  }
 0x621   : > { %8007 = vmatpush1.bf16.msk.msra.mxu0 %vm9287_vm2, %v4483_v46  ;;  %4686 = vmatpush1.bf16.msra.mxu1 %v10065_v44  ;;  %v8506_v46 = vld [vmem:[%s11412_s7 + $0x98] sm:$0xff]  }
 0x622   : > { %v4481_v10 = vpop.permute.xlu0 %4480  ;;  %4687 = vmatprep.subr.bf16.mxu1 %v10077_v57  ;;  %4423 = vmatprep.mubr.bf16.mxu1 %v11594_v17 }
 0x623   : > { %v4488_v53 = vsel %vm845_vm9, %v4479_v4, %v4481_v10 }
 0x624   : > { %7967 = vmatmul.mubr.msk.bf16.gmra.mxu0 %vm4105_vm3, %v8493_v38  ;;  %4557 = vmatprep.subr.bf16.mxu0 %v4488_v53  ;;  %v4475_v27 = vpop.permute.xlu1 %4474  ;;  %v8508_v53 = vld [vmem:[%s11412_s7 + $0xc0] sm:$0xff]  }
 0x625   : > { %8009 = vmatpush1.bf16.msk.msra.mxu0 %vm9287_vm2, %v4479_v4  ;;  %4688 = vmatpush1.bf16.msra.mxu1 %v10060_v0 }
 0x626   : > { %v4477_v44 = vpop.permute.xlu0 %4476  ;;  %4689 = vmatprep.subr.bf16.mxu1 %v10085_v5  ;;  %4275 = vmatprep.mubr.bf16.mxu0 %v11594_v17 }
 0x627   : > { %v4487_v57 = vsel %vm845_vm9, %v4475_v27, %v4477_v44 }
 0x628   : > { %7991 = vmatmul.mubr.msk.bf16.gmra.mxu1 %vm4105_vm3, %v8494_v13  ;;  %4559 = vmatprep.subr.bf16.mxu0 %v4487_v57  ;;  %v4471_v35 = vpop.permute.xlu1 %4470 }
 0x629   : > { %8011 = vmatpush1.bf16.msk.msra.mxu0 %vm9287_vm2, %v4475_v27  ;;  %4690 = vmatpush1.bf16.msra.mxu1 %v10056_v41 }
 0x62a   : > { %v4473_v0 = vpop.permute.xlu0 %4472  ;;  %4691 = vmatprep.subr.bf16.mxu1 %v10092_v9  ;;  %4433 = vmatprep.mubr.bf16.mxu1 %v11594_v17 }
 0x62b   : > { %v4486_v5 = vsel %vm845_vm9, %v4471_v35, %v4473_v0 }
 0x62c   : > { %7968 = vmatmul.mubr.msk.bf16.gmra.mxu0 %vm4105_vm3, %v8495_v55  ;;  %4561 = vmatprep.subr.bf16.mxu0 %v4486_v5  ;;  %v4779_v26 = vpop.permute.xlu1 %4778 }
 0x62d   : > { %8013 = vmatpush1.bf16.msk.msra.mxu0 %vm9287_vm2, %v4471_v35  ;;  %4692 = vmatpush1.bf16.msra.mxu1 %v10052_v8  ;;  %v8498_v8 = vld [vmem:[%s11412_s7 + $0x58] sm:$0xff]   ;;  %v8509_v35 = vld [vmem:[%s11412_s7 + $0xa8] sm:$0xff]  }
 0x62e   : > { %v4777_v41 = vpop.permute.xlu0 %4776  ;;  %4285 = vmatprep.mubr.bf16.mxu0 %v11594_v17 }
 0x630   : > { %7992 = vmatmul.mubr.msk.bf16.gmra.mxu1 %vm4105_vm3, %v8496_v1  ;;  %v4945_v9 = vpop.permute.xlu1 %4944  ;;  %v8510_v1 = vld [vmem:[%s11412_s7 + $0xc8] sm:$0xff]  }
 0x631   : > { %4443 = vmatprep.mubr.bf16.mxu1 %v11594_v17 }
 0x632   : > { %v4943_v54 = vpop.permute.xlu0 %4942 }
 0x634   : > { %7969 = vmatmul.mubr.msk.bf16.gmra.mxu0 %vm4105_vm3, %v8497_v36  ;;  %v4775_v25 = vpop.permute.xlu1 %4774 }
 0x635   : > { %4579 = vmatprep.mubr.bf16.mxu0 %v11594_v17  ;;  %v4784_v51 = vsel %vm1029_vm10, %v4775_v25, %v4777_v41 }
 0x636   : > { %v4773_v28 = vpop.permute.xlu0 %4772 }
 0x638   : > { %7993 = vmatmul.mubr.msk.bf16.gmra.mxu1 %vm4105_vm3, %v8498_v8  ;;  %v4941_v20 = vpop.permute.xlu1 %4940 }
 0x639   : > { %4709 = vmatprep.mubr.bf16.mxu1 %v11594_v17  ;;  %v4950_v3 = vsel %vm1125_vm11, %v4941_v20, %v4943_v54  ;;  %v8512_v20 = vld [vmem:[%s11412_s7 + $0xd0] sm:$0xff]  }
 0x63a   : > { %v4781_v30 = vpop.permute.xlu0 %4780 }
 0x63b   : > { %8046 = vmatprep.subr.msk.bf16.mxu0 %vm1029_vm10, %v4781_v30  ;;  %v4785_v47 = vsel %vm1029_vm10, %v4779_v26, %v4781_v30  ;;  %v8514_v30 = vld [vmem:[%s11412_s7 + $0xd8] sm:$0xff]  }
 0x63c   : > { %8014 = vmatmul.mubr.msk.bf16.vlgmr.msra.gmra.mxu0 %vm4105_vm3, %v8499_v18  ;;  %v4771_v24 = vpop.permute.xlu1 %4770  ;;  %v8513_v18 = vld [vmem:[%s11412_s7 + $0xb8] sm:$0xff]  }
 0x63d   : > { %4852 = vmatpush1.bf16.msra.mxu0 %v4785_v47  ;;  %4589 = vmatprep.mubr.bf16.mxu0 %v11594_v17  ;;  %v4783_v32 = vsel %vm1029_vm10, %v4771_v24, %v4773_v28  ;;  %v8515_v47 = vld [vmem:[%s11412_s7 + $0xe0] sm:$0xff]  }
 0x63e   : > { %8047 = vmatprep.subr.msk.bf16.mxu0 %vm1029_vm10, %v4777_v41  ;;  %v4947_v56 = vpop.permute.xlu0 %4946  ;;  %v8516_v24 = vld [vmem:[%s11412_s7 + $0x100] sm:$0xff]  }
 0x63f   : > { %8066 = vmatprep.subr.msk.bf16.mxu1 %vm1125_vm11, %v4947_v56  ;;  %v4951_v39 = vsel %vm1125_vm11, %v4945_v9, %v4947_v56  ;;  %v8518_v56 = vld [vmem:[%s11412_s7 + $0x108] sm:$0xff]  }
 0x640   : > { %8030 = vmatmul.mubr.msk.bf16.vlgmr.msra.gmra.mxu1 %vm4105_vm3, %v8500_v62  ;;  %v4937_v63 = vpop.permute.xlu1 %4936  ;;  %v8517_v62 = vld [vmem:[%s11412_s7 + $0xe8] sm:$0xff]  }
 0x641   : > { %4854 = vmatpush1.bf16.msra.mxu0 %v4784_v51  ;;  %5018 = vmatpush1.bf16.msra.mxu1 %v4951_v39  ;;  %v8519_v39 = vld [vmem:[%s11412_s7 + $0xf0] sm:$0xff]  }
 0x642   : > { %8048 = vmatprep.subr.msk.bf16.mxu0 %vm1029_vm10, %v4773_v28  ;;  %8067 = vmatprep.subr.msk.bf16.mxu1 %vm1125_vm11, %v4943_v54  ;;  %v4939_v23 = vpop.permute.xlu0 %4938  ;;  %v8511_v54 = vld [vmem:[%s11412_s7 + $0xb0] sm:$0xff]  }
 0x643   : > { %4719 = vmatprep.mubr.bf16.mxu1 %v11594_v17  ;;  %v4949_v50 = vsel %vm1125_vm11, %v4937_v63, %v4939_v23  ;;  %v8520_v51 = vld [vmem:[%s11412_s7 + $0x110] sm:$0xff]   ;;  %v8521_v63 = vld [vmem:[%s11412_s7 + $0xf8] sm:$0xff]  }
 0x644   : > { %8015 = vmatmul.mubr.msk.bf16.gmra.mxu0 %vm4105_vm3, %v8501_v40  ;;  %v4767_v21 = vpop.permute.xlu1 %4766  ;;  %v8522_v40 = vld [vmem:[%s11412_s7 + $0x118] sm:$0xff]  }
 0x645   : > { %4856 = vmatpush1.bf16.msra.mxu0 %v4783_v32  ;;  %5020 = vmatpush1.bf16.msra.mxu1 %v4950_v3 }
 0x646   : > { %8068 = vmatprep.subr.msk.bf16.mxu1 %vm1125_vm11, %v4939_v23  ;;  %v4769_v49 = vpop.permute.xlu0 %4768  ;;  %4599 = vmatprep.mubr.bf16.mxu0 %v11594_v17 }
 0x647   : > { %8049 = vmatprep.subr.msk.bf16.mxu0 %vm1029_vm10, %v4769_v49  ;;  %v4782_v16 = vsel %vm1029_vm10, %v4767_v21, %v4769_v49 }
 0x648   : > { %8031 = vmatmul.mubr.msk.bf16.gmra.mxu1 %vm4105_vm3, %v8502_v52  ;;  %v4933_v61 = vpop.permute.xlu1 %4932 }
 0x649   : > { %4858 = vmatpush1.bf16.msra.mxu0 %v4782_v16  ;;  %5022 = vmatpush1.bf16.msra.mxu1 %v4949_v50 }
 0x64a   : > { %v4935_v22 = vpop.permute.xlu0 %4934  ;;  %4729 = vmatprep.mubr.bf16.mxu1 %v11594_v17 }
 0x64b   : > { %8069 = vmatprep.subr.msk.bf16.mxu1 %vm1125_vm11, %v4935_v22  ;;  %v4948_v7 = vsel %vm1125_vm11, %v4933_v61, %v4935_v22 }
 0x64c   : > { %8016 = vmatmul.mubr.msk.bf16.gmra.mxu0 %vm4105_vm3, %v8503_v33  ;;  %v5111_v12 = vpop.permute.xlu1 %5110 }
 0x64d   : > { %5024 = vmatpush1.bf16.msra.mxu1 %v4948_v7  ;;  %4609 = vmatprep.mubr.bf16.mxu0 %v11594_v17 }
 0x64e   : > { %v5113_v14 = vpop.permute.xlu0 %5112 }
 0x64f   : > { %8086 = vmatprep.subr.msk.bf16.mxu0 %vm1221_vm12, %v5113_v14  ;;  %v5117_v38 = vsel %vm1221_vm12, %v5111_v12, %v5113_v14 }
 0x650   : > { %8032 = vmatmul.mubr.msk.bf16.gmra.mxu1 %vm4105_vm3, %v8504_v34  ;;  %v5277_v11 = vpop.permute.xlu1 %5276 }
 0x651   : > { %4739 = vmatprep.mubr.bf16.mxu1 %v11594_v17 }
 0x652   : > { %v5109_v19 = vpop.permute.xlu0 %5108 }
 0x654   : > { %8017 = vmatmul.mubr.msk.bf16.gmra.mxu0 %vm4105_vm3, %v8505_v31  ;;  %v5107_v43 = vpop.permute.xlu1 %5106 }
 0x655   : > { %4875 = vmatprep.mubr.bf16.mxu0 %v11594_v17  ;;  %v5116_v44 = vsel %vm1221_vm12, %v5107_v43, %v5109_v19 }
 0x656   : > { %v5275_v37 = vpop.permute.xlu0 %5274 }
 0x658   : > { %8033 = vmatmul.mubr.msk.bf16.gmra.mxu1 %vm4105_vm3, %v8506_v46  ;;  %v5273_v15 = vpop.permute.xlu1 %5272 }
 0x659   : > { %5041 = vmatprep.mubr.bf16.mxu1 %v11594_v17  ;;  %v5282_v0 = vsel %vm1317_vm13, %v5273_v15, %v5275_v37 }
 0x65a   : > { %v5105_v4 = vpop.permute.xlu0 %5104 }
 0x65c   : > { %8050 = vmatmul.mubr.msk.bf16.vlgmr.msra.gmra.mxu0 %vm4105_vm3, %v8507_v2  ;;  %v5103_v10 = vpop.permute.xlu1 %5102 }
 0x65d   : > { %5184 = vmatpush1.bf16.msra.mxu0 %v5117_v38  ;;  %4885 = vmatprep.mubr.bf16.mxu0 %v11594_v17  ;;  %v5115_v5 = vsel %vm1221_vm12, %v5103_v10, %v5105_v4 }
 0x65e   : > { %8087 = vmatprep.subr.msk.bf16.mxu0 %vm1221_vm12, %v5109_v19  ;;  %v5279_v27 = vpop.permute.xlu0 %5278 }
 0x65f   : > { %v5283_v13 = vsel %vm1317_vm13, %v5277_v11, %v5279_v27  ;;  %8106 = vmatprep.subr.msk.bf16.mxu1 %vm1317_vm13, %v5279_v27 }
 0x660   : > { %8070 = vmatmul.mubr.msk.bf16.vlgmr.msra.gmra.mxu1 %vm4105_vm3, %v8508_v53  ;;  %v5269_v57 = vpop.permute.xlu1 %5268 }
 0x661   : > { %5186 = vmatpush1.bf16.msra.mxu0 %v5116_v44  ;;  %5350 = vmatpush1.bf16.msra.mxu1 %v5283_v13 }
 0x662   : > { %8088 = vmatprep.subr.msk.bf16.mxu0 %vm1221_vm12, %v5105_v4  ;;  %8107 = vmatprep.subr.msk.bf16.mxu1 %vm1317_vm13, %v5275_v37  ;;  %v5271_v55 = vpop.permute.xlu0 %5270 }
 0x663   : > { %5051 = vmatprep.mubr.bf16.mxu1 %v11594_v17  ;;  %v5281_v36 = vsel %vm1317_vm13, %v5269_v57, %v5271_v55 }
 0x664   : > { %8051 = vmatmul.mubr.msk.bf16.gmra.mxu0 %vm4105_vm3, %v8509_v35  ;;  %v5099_v26 = vpop.permute.xlu1 %5098 }
 0x665   : > { %5188 = vmatpush1.bf16.msra.mxu0 %v5115_v5  ;;  %5352 = vmatpush1.bf16.msra.mxu1 %v5282_v0 }
 0x666   : > { %8108 = vmatprep.subr.msk.bf16.mxu1 %vm1317_vm13, %v5271_v55  ;;  %v5101_v41 = vpop.permute.xlu0 %5100  ;;  %4895 = vmatprep.mubr.bf16.mxu0 %v11594_v17 }
 0x667   : > { %v5114_v9 = vsel %vm1221_vm12, %v5099_v26, %v5101_v41  ;;  %8089 = vmatprep.subr.msk.bf16.mxu0 %vm1221_vm12, %v5101_v41 }
 0x668   : > { %8071 = vmatmul.mubr.msk.bf16.gmra.mxu1 %vm4105_vm3, %v8510_v1  ;;  %v5265_v25 = vpop.permute.xlu1 %5264 }
 0x669   : > { %5190 = vmatpush1.bf16.msra.mxu0 %v5114_v9  ;;  %5354 = vmatpush1.bf16.msra.mxu1 %v5281_v36 }
 0x66a   : > { %v5267_v8 = vpop.permute.xlu0 %5266  ;;  %5061 = vmatprep.mubr.bf16.mxu1 %v11594_v17 }
 0x66b   : > { %v5280_v28 = vsel %vm1317_vm13, %v5265_v25, %v5267_v8  ;;  %8109 = vmatprep.subr.msk.bf16.mxu1 %vm1317_vm13, %v5267_v8 }
 0x66c   : > { %8052 = vmatmul.mubr.msk.bf16.gmra.mxu0 %vm4105_vm3, %v8511_v54 }
 0x66d   : > { %5356 = vmatpush1.bf16.msra.mxu1 %v5280_v28  ;;  %4905 = vmatprep.mubr.bf16.mxu0 %v11594_v17 }
 0x670   : > { %8072 = vmatmul.mubr.msk.bf16.gmra.mxu1 %vm4105_vm3, %v8512_v20 }
 0x671   : > { %5071 = vmatprep.mubr.bf16.mxu1 %v11594_v17 }
 0x674   : > { %8053 = vmatmul.mubr.msk.bf16.gmra.mxu0 %vm4105_vm3, %v8513_v18 }
 0x675   : > { %5207 = vmatprep.mubr.bf16.mxu0 %v11594_v17 }
 0x678   : > { %8073 = vmatmul.mubr.msk.bf16.gmra.mxu1 %vm4105_vm3, %v8514_v30 }
 0x679   : > { %5373 = vmatprep.mubr.bf16.mxu1 %v11594_v17 }
 0x67c   : > { %8090 = vmatmul.mubr.msk.bf16.vlgmr.msra.gmra.mxu0 %vm4105_vm3, %v8515_v47 }
 0x67d   : > { %5217 = vmatprep.mubr.bf16.mxu0 %v11594_v17 }
 0x680   : > { %8110 = vmatmul.mubr.msk.bf16.vlgmr.msra.gmra.mxu1 %vm4105_vm3, %v8516_v24 }
 0x681   : > { %5383 = vmatprep.mubr.bf16.mxu1 %v11594_v17 }
 0x684   : > { %8091 = vmatmul.mubr.msk.bf16.gmra.mxu0 %vm4105_vm3, %v8517_v62 }
 0x685   : > { %5227 = vmatprep.mubr.bf16.mxu0 %v11594_v17 }
 0x688   : > { %8111 = vmatmul.mubr.msk.bf16.gmra.mxu1 %vm4105_vm3, %v8518_v56 }
 0x689   : > { %5393 = vmatprep.mubr.bf16.mxu1 %v11594_v17 }
 0x68c   : > { %8092 = vmatmul.mubr.msk.bf16.gmra.mxu0 %vm4105_vm3, %v8519_v39 }
 0x68d   : > { %5237 = vmatprep.mubr.bf16.mxu0 %v11594_v17 }
 0x690   : > { %8112 = vmatmul.mubr.msk.bf16.gmra.mxu1 %vm4105_vm3, %v8520_v51 }
 0x691   : > { %5403 = vmatprep.mubr.bf16.mxu1 %v11594_v17 }
 0x694   : > { %8093 = vmatmul.mubr.msk.bf16.gmra.mxu0 %vm4105_vm3, %v8521_v63 }
 0x695   : > { %5799 = vmatprep.mubr.bf16.mxu0 %v11594_v17 }
 0x698   : > { %8113 = vmatmul.mubr.msk.bf16.gmra.mxu1 %vm4105_vm3, %v8522_v40 }
 0x699   : > { %5904 = vmatprep.mubr.bf16.mxu1 %v11594_v17 }
 0x6c0   : > { %v4152_v23 = vpop.f32.mrf.mxu1 }
 0x6c2   : > { %v4154_v3 = vpop.f32.mrf.mxu1 }
 0x6c4   : > { %v4156_v32 = vpop.f32.mrf.mxu1 }
 0x6c6   : > { %v10486_v21 = vpop.f32.mrf.mxu1 }
 0x6c8   : > { %v4162_v52 = vpop.f32.mrf.mxu1 }
 0x6ca   : > { %v4164_v49 = vpop.f32.mrf.mxu1 }
 0x6cc   : > { %v4166_v16 = vpop.f32.mrf.mxu1 }
 0x6ce   : > { %v10488_v50 = vpop.f32.mrf.mxu1 }
 0x6d0   : > { %v4172_v61 = vpop.f32.mrf.mxu1 }
 0x6d2   : > { %v4174_v33 = vpop.f32.mrf.mxu1 }
 0x6d4   : > { %v4176_v22 = vpop.f32.mrf.mxu1 }
 0x6d6   : > { %v10490_v7 = vpop.f32.mrf.mxu1 }
 0x6d8   : > { %v4182_v12 = vpop.f32.mrf.mxu1 }
 0x6da   : > { %v4184_v34 = vpop.f32.mrf.mxu1 }
 0x6dc   : > { %v4186_v14 = vpop.f32.mrf.mxu1  ;;  %v4257_v11 = vpop.f32.mrf.mxu0 }
 0x6dd   : > { %v4258_v31 = vadd.f32 %v4257_v11, %v4152_v23 }
 0x6de   : > { %v10492_v19 = vpop.f32.mrf.mxu1  ;;  %v4259_v43 = vpop.f32.mrf.mxu0 }
 0x6df   : > { %v4260_v46 = vadd.f32 %v4259_v43, %v4154_v3 }
 0x6e0   : > { %v4261_v37 = vpop.f32.mrf.mxu0  ;;  %v4415_v15 = vpop.f32.mrf.mxu1 }
 0x6e1   : > { %v4262_v2 = vadd.f32 %v4261_v37, %v4156_v32  ;;  %v4454_v4 = vadd.f32 %v4415_v15, %v4258_v31 }
 0x6e2   : > { %v10494_v38 = vpop.f32.mrf.mxu0  ;;  %v4417_v10 = vpop.f32.mrf.mxu1 }
 0x6e3   : > { %v4455_v53 = vadd.f32 %v4417_v10, %v4260_v46 }
 0x6e4   : > { %v4267_v27 = vpop.f32.mrf.mxu0  ;;  %v4419_v13 = vpop.f32.mrf.mxu1 }
 0x6e5   : > { %v4268_v44 = vadd.f32 %v4267_v27, %v4162_v52  ;;  %v4456_v57 = vadd.f32 %v4419_v13, %v4262_v2 }
 0x6e6   : > { %v4269_v35 = vpop.f32.mrf.mxu0  ;;  %v10496_v55 = vpop.f32.mrf.mxu1 }
 0x6e7   : > { %v4270_v0 = vadd.f32 %v4269_v35, %v4164_v49 }
 0x6e8   : > { %v4271_v5 = vpop.f32.mrf.mxu0  ;;  %v4425_v26 = vpop.f32.mrf.mxu1 }
 0x6e9   : > { %v4272_v1 = vadd.f32 %v4271_v5, %v4166_v16  ;;  %v4458_v41 = vadd.f32 %v4425_v26, %v4268_v44 }
 0x6ea   : > { %v10498_v9 = vpop.f32.mrf.mxu0  ;;  %v4427_v36 = vpop.f32.mrf.mxu1 }
 0x6eb   : > { %v4459_v54 = vadd.f32 %v4427_v36, %v4270_v0 }
 0x6ec   : > { %v4277_v25 = vpop.f32.mrf.mxu0  ;;  %v4429_v8 = vpop.f32.mrf.mxu1 }
 0x6ed   : > { %v4278_v28 = vadd.f32 %v4277_v25, %v4172_v61  ;;  %v4460_v20 = vadd.f32 %v4429_v8, %v4272_v1 }
 0x6ee   : > { %v4279_v18 = vpop.f32.mrf.mxu0  ;;  %v10500_v30 = vpop.f32.mrf.mxu1 }
 0x6ef   : > { %v4280_v47 = vadd.f32 %v4279_v18, %v4174_v33 }
 0x6f0   : > { %v4281_v24 = vpop.f32.mrf.mxu0  ;;  %v4435_v62 = vpop.f32.mrf.mxu1 }
 0x6f1   : > { %v4282_v56 = vadd.f32 %v4281_v24, %v4176_v22  ;;  %v4462_v39 = vadd.f32 %v4435_v62, %v4278_v28 }
 0x6f2   : > { %v10502_v51 = vpop.f32.mrf.mxu0  ;;  %v4437_v63 = vpop.f32.mrf.mxu1 }
 0x6f3   : > { %v4463_v40 = vadd.f32 %v4437_v63, %v4280_v47 }
 0x6f4   : > { %v4287_v23 = vpop.f32.mrf.mxu0  ;;  %v4439_v3 = vpop.f32.mrf.mxu1 }
 0x6f5   : > { %v4288_v32 = vadd.f32 %v4287_v23, %v4182_v12  ;;  %v4464_v52 = vadd.f32 %v4439_v3, %v4282_v56 }
 0x6f6   : > { %v4289_v49 = vpop.f32.mrf.mxu0  ;;  %v10504_v16 = vpop.f32.mrf.mxu1 }
 0x6f7   : > { %v4290_v61 = vadd.f32 %v4289_v49, %v4184_v34 }
 0x6f8   : > { %v4291_v11 = vpop.f32.mrf.mxu0  ;;  %v4445_v31 = vpop.f32.mrf.mxu1 }
 0x6f9   : > { %v4292_v43 = vadd.f32 %v4291_v11, %v4186_v14  ;;  %v10506_v33 = vadd.f32 %v4445_v31, %v4288_v32 }
 0x6fa   : > { %v10508_v46 = vpop.f32.mrf.mxu0  ;;  %v4447_v22 = vpop.f32.mrf.mxu1 }
 0x6fb   : > { %v10510_v37 = vadd.f32 %v4447_v22, %v4290_v61 }
 0x6fc   : > { %v4449_v15 = vpop.f32.mrf.mxu1  ;;  %v4581_v2 = vpop.f32.mrf.mxu0 }
 0x6fd   : > { %v10512_v10 = vadd.f32 %v4449_v15, %v4292_v43  ;;  %v4620_v12 = vadd.f32 %v4581_v2, %v4454_v4 }
 0x6fe   : > { %v10514_v27 = vpop.f32.mrf.mxu1  ;;  %v4583_v13 = vpop.f32.mrf.mxu0 }
 0x6ff   : > { %v4621_v44 = vadd.f32 %v4583_v13, %v4455_v53 }
 0x700   : > { %v4585_v34 = vpop.f32.mrf.mxu0  ;;  %v4711_v35 = vpop.f32.mrf.mxu1 }
 0x701   : > { %v4622_v0 = vadd.f32 %v4585_v34, %v4456_v57  ;;  %v4750_v14 = vadd.f32 %v4711_v35, %v4620_v12 }
 0x702   : > { %v4587_v5 = vpop.f32.mrf.mxu0  ;;  %v4713_v26 = vpop.f32.mrf.mxu1 }
 0x704   : > { %v4591_v1 = vpop.f32.mrf.mxu0  ;;  %v4715_v36 = vpop.f32.mrf.mxu1 }
 0x705   : > { %v4624_v25 = vadd.f32 %v4591_v1, %v4458_v41  ;;  %v4752_v8 = vadd.f32 %v4715_v36, %v4622_v0 }
 0x706   : > { %v4593_v28 = vpop.f32.mrf.mxu0  ;;  %v4717_v18 = vpop.f32.mrf.mxu1 }
 0x707   : > { %v10516_v47 = vadd.f32 %v4593_v28, %v4459_v54  ;;  %v4751_v28 = vadd.f32 %v4713_v26, %v4621_v44 }
 0x708   : > { %v4595_v24 = vpop.f32.mrf.mxu0  ;;  %v4721_v4 = vpop.f32.mrf.mxu1 }
 0x709   : > { %v4626_v62 = vadd.f32 %v4595_v24, %v4460_v20  ;;  %v10518_v56 = vadd.f32 %v4721_v4, %v4624_v25  ;;  %v4264_v25 = vadd.f32 %v10494_v38, %v10486_v21 }
 0x70a   : > { %v10520_v53 = vpop.f32.mrf.mxu0  ;;  %v10522_v63 = vpop.f32.mrf.mxu1 }
 0x70c   : > { %v4601_v57 = vpop.f32.mrf.mxu0  ;;  %v4725_v23 = vpop.f32.mrf.mxu1 }
 0x70d   : > { %v4628_v3 = vadd.f32 %v4601_v57, %v4462_v39  ;;  %v10524_v32 = vadd.f32 %v4725_v23, %v4626_v62  ;;  %v4457_v57 = vadd.f32 %v10496_v55, %v4264_v25 }
 0x70e   : > { %v4603_v41 = vpop.f32.mrf.mxu0  ;;  %v10526_v49 = vpop.f32.mrf.mxu1 }
 0x70f   : > { %v4629_v61 = vadd.f32 %v4603_v41, %v4463_v40 }
 0x710   : > { %v4605_v54 = vpop.f32.mrf.mxu0  ;;  %v4731_v11 = vpop.f32.mrf.mxu1 }
 0x711   : > { %v4630_v31 = vadd.f32 %v4605_v54, %v4464_v52  ;;  %v10528_v43 = vadd.f32 %v4731_v11, %v4628_v3 }
 0x712   : > { %v10530_v20 = vpop.f32.mrf.mxu0  ;;  %v4733_v22 = vpop.f32.mrf.mxu1 }
 0x713   : > { %v10532_v15 = vadd.f32 %v4733_v22, %v4629_v61  ;;  %v4623_v61 = vadd.f32 %v4587_v5, %v4457_v57 }
 0x714   : > { %v10534_v2 = vpop.f32.mrf.mxu0  ;;  %v4735_v12 = vpop.f32.mrf.mxu1 }
 0x715   : > { %v10536_v39 = vadd.f32 %v4735_v12, %v4630_v31  ;;  %v4753_v12 = vadd.f32 %v4717_v18, %v4623_v61 }
 0x716   : > { %v10538_v13 = vpop.f32.mrf.mxu0  ;;  %v10540_v34 = vpop.f32.mrf.mxu1 }
 0x718   : > { %v10542_v40 = vpop.f32.mrf.mxu0  ;;  %v10544_v35 = vpop.f32.mrf.mxu1 }
 0x71a   : > { %v10546_v52 = vpop.f32.mrf.mxu0  ;;  %v10548_v0 = vpop.f32.mrf.mxu1 }
 0x71c   : > { %v10550_v1 = vpop.f32.mrf.mxu1  ;;  %v4877_v36 = vpop.f32.mrf.mxu0 }
 0x71d   : > { %v4916_v24 = vadd.f32 %v4877_v36, %v4750_v14 }
 0x71e   : > { %v10554_v4 = vpop.f32.mrf.mxu1  ;;  %v4879_v62 = vpop.f32.mrf.mxu0 }
 0x71f   : > { %v4917_v23 = vadd.f32 %v4879_v62, %v4751_v28  ;;  %v10569_v62 = vpop.permute.xlu1 %5470 }
 0x720   : > { %v4881_v3 = vpop.f32.mrf.mxu0  ;;  %v5043_v41 = vpop.f32.mrf.mxu1  ;;  %11598 = vst [vmem:[#allocation34_spill] sm:$0xff] %v10569_v62 }
 0x721   : > { %v4918_v54 = vadd.f32 %v4881_v3, %v4752_v8  ;;  %v5082_v11 = vadd.f32 %v5043_v41, %v4916_v24  ;;  %v10579_v41 = vpop.permute.xlu0 %5475 }
 0x722   : > { %v4883_v31 = vpop.f32.mrf.mxu0  ;;  %v5045_v22 = vpop.f32.mrf.mxu1  ;;  %11599 = vst [vmem:[#allocation11_spill] sm:$0xff] %v10579_v41  ;;  %v4274_v41 = vadd.f32 %v10498_v9, %v10488_v50 }
 0x723   : > { %v5083_v42 = vadd.f32 %v5045_v22, %v4917_v23  ;;  %v4919_v21 = vadd.f32 %v4883_v31, %v4753_v12  ;;  %v10585_v31 = vpop.permute.xlu1 %5460 }
 0x724   : > { %v4887_v48 = vpop.f32.mrf.mxu0  ;;  %v5047_v59 = vpop.f32.mrf.mxu1  ;;  %11602 = vst [vmem:[#allocation14_spill] sm:$0xff] %v10585_v31 }
 0x725   : > { %v5084_v38 = vadd.f32 %v5047_v59, %v4918_v54  ;;  %v10595_v17 = vpop.permute.xlu0 %5465 }
 0x726   : > { %v4889_v44 = vpop.f32.mrf.mxu0  ;;  %v5049_v14 = vpop.f32.mrf.mxu1  ;;  %11607 = vst [vmem:[#allocation18_spill] sm:$0xff] %v10595_v17  ;;  %v4461_v17 = vadd.f32 %v10500_v30, %v4274_v41 }
 0x727   : > { %v10557_v26 = vadd.f32 %v5049_v14, %v4919_v21  ;;  %v10601_v6 = vpop.permute.xlu1 %5450 }
 0x728   : > { %v4891_v36 = vpop.f32.mrf.mxu0  ;;  %v5053_v55 = vpop.f32.mrf.mxu1 }
 0x72a   : > { %v10559_v25 = vpop.f32.mrf.mxu0  ;;  %v5055_v28 = vpop.f32.mrf.mxu1 }
 0x72c   : > { %v10561_v5 = vpop.f32.mrf.mxu0  ;;  %v10563_v8 = vpop.f32.mrf.mxu1 }
 0x72e   : > { %v10565_v24 = vpop.f32.mrf.mxu0  ;;  %v10567_v18 = vpop.f32.mrf.mxu1 }
 0x730   : > { %v10571_v59 = vpop.f32.mrf.mxu0  ;;  %v10573_v57 = vpop.f32.mrf.mxu1 }
 0x732   : > { %v10575_v23 = vpop.f32.mrf.mxu0  ;;  %v10577_v3 = vpop.f32.mrf.mxu1 }
 0x734   : > { %v10581_v61 = vpop.f32.mrf.mxu0  ;;  %v10583_v54 = vpop.f32.mrf.mxu1 }
 0x735   : > { %11600 = vst [vmem:[#allocation10_spill] sm:$0xff] %v10581_v61  ;;  %11601 = vst [vmem:[#allocation12_spill] sm:$0xff] %v10583_v54 }
 0x736   : > { %v10587_v22 = vpop.f32.mrf.mxu0  ;;  %v10589_v12 = vpop.f32.mrf.mxu1 }
 0x737   : > { %11603 = vst [vmem:[#allocation15_spill] sm:$0xff] %v10587_v22  ;;  %11604 = vst [vmem:[#allocation16_spill] sm:$0xff] %v10589_v12  ;;  %v5441_v22 = vpop.permute.xlu1 %5440 }
 0x738   : > { %v10591_v21 = vpop.f32.mrf.mxu0  ;;  %v10593_v14 = vpop.f32.mrf.mxu1 }
 0x739   : > { %11605 = vst [vmem:[#allocation36_spill] sm:$0xff] %v10591_v21  ;;  %11606 = vst [vmem:[#allocation17_spill] sm:$0xff] %v10593_v14  ;;  %v10609_v21 = vpop.permute.xlu0 %5455 }
 0x73a   : > { %v10597_v29 = vpop.f32.mrf.mxu0  ;;  %v10599_v60 = vpop.f32.mrf.mxu1 }
 0x73b   : > { %11608 = vst [vmem:[#allocation19_spill] sm:$0xff] %v10597_v29  ;;  %11609 = vst [vmem:[#allocation25_spill] sm:$0xff] %v10599_v60  ;;  %v4284_v29 = vadd.f32 %v10502_v51, %v10490_v7  ;;  %v4294_v60 = vadd.f32 %v10508_v46, %v10492_v19  ;;  %v4920_v7 = vadd.f32 %v4887_v48, %v10518_v56 }
 0x73c   : > { %v10603_v45 = vpop.f32.mrf.mxu1  ;;  %v5209_v58 = vpop.f32.mrf.mxu0  ;;  %v4633_v56 = vadd.f32 %v10538_v13, %v10510_v37 }
 0x73d   : > { %11610 = vst [vmem:[#allocation27_spill] sm:$0xff] %v10603_v45  ;;  %v5248_v14 = vadd.f32 %v5209_v58, %v5082_v11  ;;  %v4465_v50 = vadd.f32 %v10504_v16, %v4284_v29  ;;  %v4469_v9 = vadd.f32 %v10514_v27, %v4294_v60  ;;  %v4755_v58 = vadd.f32 %v10522_v63, %v10516_v47  ;;  %v5446_v27 = vpop.permute.xlu0 %5445 }
 0x73e   : > { %v10607_v62 = vpop.f32.mrf.mxu1  ;;  %v5211_v12 = vpop.f32.mrf.mxu0  ;;  %v4632_v60 = vadd.f32 %v10534_v2, %v10506_v33  ;;  %v5086_v47 = vadd.f32 %v5053_v55, %v4920_v7 }
 0x73f   : > { %11611 = vst [vmem:[#allocation26_spill] sm:$0xff] %v10607_v62  ;;  %v5249_v54 = vadd.f32 %v5211_v12, %v5083_v42  ;;  %v4627_v62 = vadd.f32 %v10520_v53, %v4461_v17  ;;  %v4921_v29 = vadd.f32 %v4889_v44, %v4755_v58  ;;  %v4635_v58 = vadd.f32 %v10546_v52, %v4469_v9 }
 0x740   : > { %v5213_v31 = vpop.f32.mrf.mxu0  ;;  %v5375_v45 = vpop.f32.mrf.mxu1 }
 0x741   : > { %v5414_v61 = vadd.f32 %v5375_v45, %v5248_v14  ;;  %v5250_v51 = vadd.f32 %v5213_v31, %v5084_v38  ;;  %v4757_v42 = vadd.f32 %v10526_v49, %v4627_v62  ;;  %v4631_v45 = vadd.f32 %v10530_v20, %v4465_v50 }
 0x742   : > { %v5215_v30 = vpop.f32.mrf.mxu0  ;;  %v5377_v11 = vpop.f32.mrf.mxu1  ;;  %v4922_v49 = vadd.f32 %v4891_v36, %v10524_v32  ;;  %v5087_v38 = vadd.f32 %v5055_v28, %v4921_v29  ;;  %v4762_v31 = vadd.f32 %v10544_v35, %v4632_v60  ;;  %v4925_v35 = vadd.f32 %v10565_v24, %v10532_v15 }
 0x743   : > { %v10622_v19 = vadd.f32 %v5441_v22, %v5414_v61  ;;  %v5415_v46 = vadd.f32 %v5377_v11, %v5249_v54  ;;  %v5251_v20 = vadd.f32 %v5215_v30, %v10557_v26  ;;  %v4761_v41 = vadd.f32 %v10540_v34, %v4631_v45 }
 0x744   : > { %v5219_v17 = vpop.f32.mrf.mxu0  ;;  %v5379_v16 = vpop.f32.mrf.mxu1  ;;  %v4634_v61 = vadd.f32 %v10542_v40, %v10512_v10  ;;  %v5088_v37 = vadd.f32 %v10563_v8, %v4922_v49  ;;  %v4924_v34 = vadd.f32 %v10561_v5, %v10528_v43  ;;  %v5091_v52 = vadd.f32 %v10577_v3, %v4925_v35  ;;  %v11613_v49 = vld [vmem:[#allocation12_spill] sm:$0xff] }
 0x745   : > { %v8114_v53 = vmul.f32 -1.442695, %v10622_v19  ;;  %v10629_v63 = vadd.f32 %v5441_v22, %v5415_v46  ;;  %v5416_v48 = vadd.f32 %v5379_v16, %v5250_v51  ;;  %v5252_v44 = vadd.f32 %v5219_v17, %v5086_v47 }
 0x746   : > { %v5221_v62 = vpop.f32.mrf.mxu0  ;;  %v5381_v33 = vpop.f32.mrf.mxu1  ;;  %v4923_v22 = vadd.f32 %v10559_v25, %v4757_v42  ;;  %v5090_v11 = vadd.f32 %v10573_v57, %v4924_v34  ;;  %v4763_v42 = vadd.f32 %v10548_v0, %v4633_v56  ;;  %v4764_v60 = vadd.f32 %v10550_v1, %v4634_v61  ;;  %v11616_v61 = vld [vmem:[#allocation16_spill] sm:$0xff] }
 0x747   : > { %8687 = vpow2.f32 %v8114_v53  ;;  %v8115_v2 = vmul.f32 -1.442695, %v10629_v63  ;;  %v10636_v55 = vadd.f32 %v5446_v27, %v5416_v48  ;;  %v5417_v13 = vadd.f32 %v5381_v33, %v5251_v20  ;;  %v11612_v48 = vld [vmem:[#allocation10_spill] sm:$0xff] }
 0x748   : > { %v5223_v32 = vpop.f32.mrf.mxu0  ;;  %v5385_v36 = vpop.f32.mrf.mxu1  ;;  %v5253_v28 = vadd.f32 %v5221_v62, %v5087_v38  ;;  %v5089_v25 = vadd.f32 %v10567_v18, %v4923_v22  ;;  %v4926_v0 = vadd.f32 %v10571_v59, %v10536_v39  ;;  %v4927_v53 = vadd.f32 %v10575_v23, %v4761_v41  ;;  %v11614_v39 = vld [vmem:[#allocation15_spill] sm:$0xff]  ;;  %v11615_v62 = vld [vmem:[#allocation14_spill] sm:$0xff]  ;;  %v11617_v23 = vld [vmem:[#allocation36_spill] sm:$0xff] }
 0x749   : > { %8689 = vpow2.f32 %v8115_v2  ;;  %v8116_v26 = vmul.f32 -1.442695, %v10636_v55  ;;  %v5418_v54 = vadd.f32 %v5385_v36, %v5252_v44  ;;  %v10647_v12 = vadd.f32 %v5446_v27, %v5417_v13 }
 0x74a   : > { %v5225_v10 = vpop.f32.mrf.mxu0  ;;  %v5387_v40 = vpop.f32.mrf.mxu1  ;;  %v5254_v8 = vadd.f32 %v5223_v32, %v5088_v37  ;;  %v4928_v56 = vadd.f32 %v11612_v48, %v4762_v31  ;;  %v5092_v38 = vadd.f32 %v11613_v49, %v4926_v0  ;;  %v4929_v59 = vadd.f32 %v11614_v39, %v4763_v42 }
 0x74b   : > { %8691 = vpow2.f32 %v8116_v26  ;;  %v10650_v14 = vadd.f32 %v10601_v6, %v5418_v54  ;;  %v5419_v50 = vadd.f32 %v5387_v40, %v5253_v28  ;;  %v8117_v30 = vmul.f32 -1.442695, %v10647_v12  ;;  %v11618_v26 = vld [vmem:[#allocation17_spill] sm:$0xff] }
 0x74c   : > { %v5229_v43 = vpop.f32.mrf.mxu0  ;;  %v5389_v5 = vpop.f32.mrf.mxu1  ;;  %v5255_v15 = vadd.f32 %v5225_v10, %v5089_v25  ;;  %v5093_v37 = vadd.f32 %v11616_v61, %v4927_v53  ;;  %v4930_v41 = vadd.f32 %v11617_v23, %v4764_v60  ;;  %v5094_v28 = vadd.f32 %v11618_v26, %v4928_v56  ;;  %v11619_v10 = vld [vmem:[#allocation25_spill] sm:$0xff]  ;;  %v11622_v60 = vld [vmem:[#allocation19_spill] sm:$0xff] }
 0x74d   : > { %v8118_v7 = vmul.f32 -1.442695, %v10650_v14  ;;  %v10660_v51 = vadd.f32 %v10601_v6, %v5419_v50  ;;  %v5420_v46 = vadd.f32 %v5389_v5, %v5254_v8  ;;  %8693 = vpow2.f32 %v8117_v30 }
 0x74e   : > { %v5231_v24 = vpop.f32.mrf.mxu0  ;;  %v5391_v18 = vpop.f32.mrf.mxu1  ;;  %v5256_v45 = vadd.f32 %v5229_v43, %v5090_v11  ;;  %v4765_v6 = vadd.f32 %v10554_v4, %v4635_v58  ;;  %v5095_v40 = vadd.f32 %v11619_v10, %v4929_v59  ;;  %v11620_v11 = vld [vmem:[#allocation27_spill] sm:$0xff] }
 0x74f   : > { %8695 = vpow2.f32 %v8118_v7  ;;  %v8119_v9 = vmul.f32 -1.442695, %v10660_v51  ;;  %v10666_v57 = vadd.f32 %v10609_v21, %v5420_v46  ;;  %v5421_v29 = vadd.f32 %v5391_v18, %v5255_v15  ;;  %v11621_v46 = vld [vmem:[#allocation18_spill] sm:$0xff] }
 0x750   : > { %v5233_v3 = vpop.f32.mrf.mxu0  ;;  %v5395_v17 = vpop.f32.mrf.mxu1  ;;  %v5257_v27 = vadd.f32 %v5231_v24, %v5091_v52  ;;  %v5096_v7 = vadd.f32 %v11620_v11, %v4930_v41  ;;  %v4931_v0 = vadd.f32 %v11622_v60, %v4765_v6 }
 0x751   : > { %8697 = vpow2.f32 %v8119_v9  ;;  %v8120_v16 = vmul.f32 -1.442695, %v10666_v57  ;;  %v5422_v47 = vadd.f32 %v5395_v17, %v5256_v45  ;;  %v10677_v1 = vadd.f32 %v10609_v21, %v5421_v29 }
 0x752   : > { %v5235_v4 = vpop.f32.mrf.mxu0  ;;  %v5397_v20 = vpop.f32.mrf.mxu1  ;;  %v5258_v32 = vadd.f32 %v5233_v3, %v5092_v38  ;;  %v11624_v38 = vld [vmem:[#allocation26_spill] sm:$0xff] }
 0x753   : > { %8699 = vpow2.f32 %v8120_v16  ;;  %v10681_v33 = vadd.f32 %v11615_v62, %v5422_v47  ;;  %v5423_v2 = vadd.f32 %v5397_v20, %v5257_v27  ;;  %v8121_v13 = vmul.f32 -1.442695, %v10677_v1  ;;  %v11623_v47 = vld [vmem:[#allocation34_spill] sm:$0xff] }
 0x754   : > { %v8688_v44 = vpop.eup %8687  ;;  %v5239_v36 = vpop.f32.mrf.mxu0  ;;  %v5259_v8 = vadd.f32 %v5235_v4, %v5093_v37  ;;  %v5097_v4 = vadd.f32 %v11624_v38, %v4931_v0 }
 0x755   : > { %v5399_v21 = vpop.f32.mrf.mxu1  ;;  %v5542_v54 = vadd.f32 1.0, %v8688_v44  ;;  %v8122_v31 = vmul.f32 -1.442695, %v10681_v33  ;;  %v10689_v22 = vadd.f32 %v11615_v62, %v5423_v2  ;;  %8701 = vpow2.f32 %v8121_v13  ;;  %v11625_v13 = vld [vmem:[#allocation11_spill] sm:$0xff] }
 0x756   : > { %v8690_v34 = vpop.eup %8689  ;;  %v5424_v50 = vadd.f32 %v5399_v21, %v5258_v32  ;;  %v5241_v58 = vpop.f32.mrf.mxu0  ;;  %v5260_v43 = vadd.f32 %v5239_v36, %v5094_v28 }
 0x757   : > { %v5401_v35 = vpop.f32.mrf.mxu1  ;;  %8703 = vrcp.f32 %v5542_v54  ;;  %v5543_v25 = vadd.f32 1.0, %v8690_v34  ;;  %v8123_v30 = vmul.f32 -1.442695, %v10689_v22  ;;  %v5261_v9 = vadd.f32 %v5241_v58, %v5095_v40 }
 0x758   : > { %v8692_v5 = vpop.eup %8691  ;;  %8705 = vpow2.f32 %v8122_v31  ;;  %v10695_v42 = vadd.f32 %v11621_v46, %v5424_v50  ;;  %v5425_v52 = vadd.f32 %v5401_v35, %v5259_v8  ;;  %v5243_v15 = vpop.f32.mrf.mxu0 }
 0x759   : > { %v5405_v24 = vpop.f32.mrf.mxu1  ;;  %8707 = vrcp.f32 %v5543_v25  ;;  %v5544_v18 = vadd.f32 1.0, %v8692_v5  ;;  %v5262_v27 = vadd.f32 %v5243_v15, %v5096_v7 }
 0x75a   : > { %v5426_v45 = vadd.f32 %v5405_v24, %v5260_v43  ;;  %8709 = vpow2.f32 %v8123_v30  ;;  %v8124_v29 = vmul.f32 -1.442695, %v10695_v42  ;;  %v10700_v3 = vadd.f32 %v11621_v46, %v5425_v52  ;;  %v8694_v16 = vpop.eup %8693  ;;  %v5245_v48 = vpop.f32.mrf.mxu0 }
 0x75b   : > { %v5407_v17 = vpop.f32.mrf.mxu1  ;;  %8711 = vrcp.f32 %v5544_v18  ;;  %v5545_v20 = vadd.f32 1.0, %v8694_v16  ;;  %v5263_v37 = vadd.f32 %v5245_v48, %v5097_v4 }
 0x75c   : > { %v10703_v53 = vadd.f32 %v11623_v47, %v5426_v45  ;;  %v5427_v56 = vadd.f32 %v5407_v17, %v5261_v9  ;;  %v8696_v49 = vpop.eup %8695  ;;  %8713 = vpow2.f32 %v8124_v29  ;;  %v8125_v6 = vmul.f32 -1.442695, %v10700_v3 }
 0x75d   : > { %v5409_v39 = vpop.f32.mrf.mxu1  ;;  %v5546_v59 = vadd.f32 1.0, %v8696_v49  ;;  %8715 = vrcp.f32 %v5545_v20 }
 0x75e   : > { %v10708_v62 = vadd.f32 %v11623_v47, %v5427_v56  ;;  %v5428_v2 = vadd.f32 %v5409_v39, %v5262_v27  ;;  %v8698_v44 = vpop.eup %8697  ;;  %v8126_v61 = vmul.f32 -1.442695, %v10703_v53 }
 0x75f   : > { %v5411_v23 = vpop.f32.mrf.mxu1  ;;  %8717 = vrcp.f32 %v5546_v59  ;;  %v5547_v41 = vadd.f32 1.0, %v8698_v44 }
 0x760   : > { %v10712_v32 = vadd.f32 %v11625_v13, %v5428_v2  ;;  %v8700_v36 = vpop.eup %8699  ;;  %8719 = vpow2.f32 %v8125_v6  ;;  %v8127_v21 = vmul.f32 -1.442695, %v10708_v62  ;;  %v5429_v26 = vadd.f32 %v5411_v23, %v5263_v37 }
 0x761   : > { %8721 = vrcp.f32 %v5547_v41  ;;  %v5548_v28 = vadd.f32 1.0, %v8700_v36 }
 0x762   : > { %v8128_v54 = vmul.f32 -1.442695, %v10712_v32  ;;  %8723 = vpow2.f32 %v8126_v61  ;;  %v10717_v31 = vadd.f32 %v11625_v13, %v5429_v26  ;;  %v8702_v34 = vpop.eup %8701 }
 0x763   : > { %8725 = vrcp.f32 %v5548_v28  ;;  %v5549_v40 = vadd.f32 1.0, %v8702_v34 }
 0x764   : > { %v8704_v10 = vpop.eup %8703  ;;  %8727 = vpow2.f32 %v8127_v21  ;;  %v8129_v8 = vmul.f32 -1.442695, %v10717_v31 }
 0x765   : > { %v8706_v50 = vpop.eup %8705  ;;  %8729 = vpow2.f32 %v8128_v54  ;;  %v5590_v5 = vmul.f32 %v8704_v10, %v10622_v19  ;;  %v11629_v10 = vld [vmem:[#allocation2_spill] sm:$0xff] }
 0x766   : > { %v8708_v58 = vpop.eup %8707  ;;  %8731 = vrcp.f32 %v5549_v40  ;;  %v5550_v35 = vadd.f32 1.0, %v8706_v50 }
 0x767   : > { %v8710_v25 = vpop.eup %8709  ;;  %8733 = vpow2.f32 %v8129_v8  ;;  %v5591_v18 = vmul.f32 %v8708_v58, %v10629_v63 }
 0x768   : > { %v8712_v30 = vpop.eup %8711  ;;  %8735 = vrcp.f32 %v5550_v35  ;;  %v5551_v7 = vadd.f32 1.0, %v8710_v25 }
 0x769   : > { %v8714_v43 = vpop.eup %8713  ;;  %v5592_v11 = vmul.f32 %v8712_v30, %v10636_v55 }
 0x76a   : > { %v5552_v46 = vadd.f32 1.0, %v8714_v43  ;;  %v8716_v52 = vpop.eup %8715 }
 0x76b   : > { %v10722_v15 = vpack.c.bf16 %v5592_v11, %v5590_v5  ;;  %v5593_v9 = vmul.f32 %v8716_v52, %v10647_v12 }
 0x76c   : > { %v8718_v24 = vpop.eup %8717  ;;  %8737 = vrcp.f32 %v5552_v46 }
 0x76d   : > { %v8720_v45 = vpop.eup %8719  ;;  %v10726_v0 = vpack.c.bf16 %v5593_v9, %v5591_v18  ;;  %8739 = vrcp.f32 %v5551_v7  ;;  %v5594_v27 = vmul.f32 %v8718_v24, %v10650_v14 }
 0x76e   : > { %v8722_v60 = vpop.eup %8721  ;;  %v5553_v19 = vadd.f32 1.0, %v8720_v45 }
 0x76f   : > { %v8724_v29 = vpop.eup %8723  ;;  %v5595_v4 = vmul.f32 %v8722_v60, %v10660_v51  ;;  %v5623_v52 = vmul.bf16 %v10726_v0, %v11629_v10 }
 0x770   : > { %v8726_v55 = vpop.eup %8725  ;;  %8741 = vrcp.f32 %v5553_v19  ;;  %v5554_v17 = vadd.f32 1.0, %v8724_v29 }
 0x771   : > { %v8728_v16 = vpop.eup %8727  ;;  %v5596_v47 = vmul.f32 %v8726_v55, %v10666_v57 }
 0x772   : > { %v8730_v48 = vpop.eup %8729  ;;  %v5555_v63 = vadd.f32 1.0, %v8728_v16  ;;  %8743 = vrcp.f32 %v5554_v17 }
 0x773   : > { %v8732_v56 = vpop.eup %8731  ;;  %v10730_v12 = vpack.c.bf16 %v5596_v47, %v5594_v27  ;;  %v5556_v49 = vadd.f32 1.0, %v8730_v48  ;;  %v7085_v27 = vld [vmem:[%s11415_s10 + $0x30] sm:$0xff]  ;;  %v7086_v48 = vld [vmem:[%s11415_s10 + $0x38] sm:$0xff] }
 0x774   : > { %v8734_v38 = vpop.eup %8733  ;;  %v5597_v20 = vmul.f32 %v8732_v56, %v10677_v1  ;;  %8745 = vrcp.f32 %v5555_v63 }
 0x775   : > { %8747 = vrcp.f32 %v5556_v49  ;;  %v5557_v6 = vadd.f32 1.0, %v8734_v38  ;;  %v8736_v14 = vpop.eup %8735  ;;  %v7083_v49 = vld [vmem:[%s11415_s10 + $0x20] sm:$0xff] }
 0x776   : > { %v10734_v39 = vpack.c.bf16 %v5597_v20, %v5595_v4  ;;  %v5598_v59 = vmul.f32 %v8736_v14, %v10681_v33  ;;  %v8523_v4 = vld [vmem:[%s11414_s9 + $0x20] sm:$0xff]   ;;  %v7084_v20 = vld [vmem:[%s11415_s10 + $0x28] sm:$0xff]  ;;  %v7081_v14 = vld [vmem:[%s11415_s10 + $0x10] sm:$0xff] }
 0x777   : > { %8749 = vrcp.f32 %v5557_v6 }
 0x778   : > { %v5625_v5 = vmul.bf16 %v10734_v39, %v11629_v10 }
 0x779   : > { %v8738_v57 = vpop.eup %8737 }
 0x77a   : > { %v5600_v2 = vmul.f32 %v8738_v57, %v10695_v42  ;;  %v8740_v44 = vpop.eup %8739 }
 0x77b   : > { %v5599_v51 = vmul.f32 %v8740_v44, %v10689_v22  ;;  %v11626_v22 = vld [vmem:[#allocation3_spill] sm:$0xff] }
 0x77c   : > { %v10738_v61 = vpack.c.bf16 %v5600_v2, %v5598_v59  ;;  %v5616_v8 = vmul.bf16 %v10730_v12, %v11626_v22  ;;  %v5614_v11 = vmul.bf16 %v10722_v15, %v11626_v22  ;;  %v7082_v59 = vld [vmem:[%s11415_s10 + $0x18] sm:$0xff]  ;;  %v11631_v2 = vmov 0  }
 0x77d   : > { %v8742_v37 = vpop.eup %8741 }
 0x77e   : > { %v5601_v1 = vmul.f32 %v8742_v37, %v10700_v3  ;;  %v5618_v3 = vmul.bf16 %v10738_v61, %v11626_v22  ;;  %v7079_v37 = vld [vmem:[%s11415_s10] sm:$0xff] }
 0x77f   : > { %v8744_v23 = vpop.eup %8743 }
 0x780   : > { %v10742_v41 = vpack.c.bf16 %v5601_v1, %v5599_v51  ;;  %v5602_v21 = vmul.f32 %v8744_v23, %v10703_v53  ;;  %v11627_v53 = vld [vmem:[#allocation4_spill] sm:$0xff]  ;;  %v8524_v1 = vld [vmem:[%s11414_s9 + $0x28] sm:$0xff]  }
 0x781   : > { %v8746_v13 = vpop.eup %8745  ;;  %v5617_v50 = vmul.bf16 %v10734_v39, %v11627_v53  ;;  %v5615_v7 = vmul.bf16 %v10726_v0, %v11627_v53  ;;  %v7080_v23 = vld [vmem:[%s11415_s10 + $0x8] sm:$0xff] }
 0x782   : > { %v8748_v36 = vpop.eup %8747  ;;  %v5603_v42 = vmul.f32 %v8746_v13, %v10708_v62  ;;  %v5619_v62 = vmul.bf16 %v10742_v41, %v11627_v53  ;;  %v5627_v40 = vmul.bf16 %v10742_v41, %v11629_v10 }
 0x783   : > { %v5604_v26 = vmul.f32 %v8748_v36, %v10712_v32  ;;  %v11628_v32 = vld [vmem:[#allocation5_spill] sm:$0xff] }
 0x784   : > { %v8750_v33 = vpop.eup %8749  ;;  %v5624_v43 = vmul.bf16 %v10730_v12, %v11628_v32  ;;  %v5622_v46 = vmul.bf16 %v10722_v15, %v11628_v32 }
 0x785   : > { %v10747_v28 = vpack.c.bf16 %v5604_v26, %v5602_v21  ;;  %v5605_v54 = vmul.f32 %v8750_v33, %v10717_v31  ;;  %v5626_v31 = vmul.bf16 %v10738_v61, %v11628_v32 }
 0x787   : > { %v10750_v34 = vpack.c.bf16 %v5605_v54, %v5603_v42  ;;  %5702 = vrot.lane.b32.xlu1 %v10747_v28, %s11587_s2  ;;  %v5620_v58 = vmul.bf16 %v10747_v28, %v11626_v22  ;;  %v5628_v25 = vmul.bf16 %v10747_v28, %v11628_v32  ;;  %v8525_v42 = vld [vmem:[%s11414_s9 + $0x30] sm:$0xff]  }
 0x788   : > { %v8540_v32 = vld [vmem:[%s11414_s9 + $0x90] sm:$0xff]  }
 0x789   : > { %5704 = vrot.lane.b32.xlu0 %v10750_v34, %s11587_s2  ;;  %v5621_v35 = vmul.bf16 %v10750_v34, %v11627_v53  ;;  %v5629_v30 = vmul.bf16 %v10750_v34, %v11629_v10 }
 0x78b   : > { %5698 = vrot.lane.b32.xlu1 %v10738_v61, %s11587_s2 }
 0x78d   : > { %5700 = vrot.lane.b32.xlu0 %v10742_v41, %s11587_s2 }
 0x78f   : > { %5694 = vrot.lane.b32.xlu1 %v10730_v12, %s11587_s2 }
 0x791   : > { %5696 = vrot.lane.b32.xlu0 %v10734_v39, %s11587_s2 }
 0x793   : > { %5690 = vrot.lane.b32.xlu1 %v10722_v15, %s11587_s2 }
 0x795   : > { %5692 = vrot.lane.b32.xlu0 %v10726_v0, %s11587_s2 }
 0x797   : > { %5646 = vrot.lane.b32.xlu1 %v5618_v3, %s11522_s20 }
 0x799   : > { %5648 = vrot.lane.b32.xlu0 %v5619_v62, %s11522_s20 }
 0x79b   : > { %5961 = vrot.lane.b32.xlu1 %v5626_v31, %s11525_s28 }
 0x79d   : > { %5963 = vrot.lane.b32.xlu0 %v5627_v40, %s11525_s28 }
 0x79f   : > { %5642 = vrot.lane.b32.xlu1 %v5616_v8, %s11522_s20 }
 0x7a1   : > { %5644 = vrot.lane.b32.xlu0 %v5617_v50, %s11522_s20 }
 0x7a3   : > { %5650 = vrot.lane.b32.xlu1 %v5620_v58, %s11522_s20 }
 0x7a5   : > { %5652 = vrot.lane.b32.xlu0 %v5621_v35, %s11522_s20 }
 0x7a7   : > { %5965 = vrot.lane.b32.xlu1 %v5628_v25, %s11525_s28 }
 0x7a9   : > { %5967 = vrot.lane.b32.xlu0 %v5629_v30, %s11525_s28 }
 0x7ab   : > { %5957 = vrot.lane.b32.xlu1 %v5624_v43, %s11525_s28 }
 0x7ad   : > { %5959 = vrot.lane.b32.xlu0 %v5625_v5, %s11525_s28 }
 0x7af   : > { %5638 = vrot.lane.b32.xlu1 %v5614_v11, %s11522_s20 }
 0x7b1   : > { %5640 = vrot.lane.b32.xlu0 %v5615_v7, %s11522_s20 }
 0x7b3   : > { %5953 = vrot.lane.b32.xlu1 %v5622_v46, %s11525_s28 }
 0x7b5   : > { %5955 = vrot.lane.b32.xlu0 %v5623_v52, %s11525_s28 }
 0x7b7   : > { %6131 = vrot.lane.b32.xlu1 %v5620_v58, %s11501_s17 }
 0x7b9   : > { %6133 = vrot.lane.b32.xlu0 %v5621_v35, %s11501_s17 }
 0x7bb   : > { %6127 = vrot.lane.b32.xlu1 %v5618_v3, %s11501_s17 }
 0x7bd   : > { %6129 = vrot.lane.b32.xlu0 %v5619_v62, %s11501_s17 }
 0x7bf   : > { %6123 = vrot.lane.b32.xlu1 %v5616_v8, %s11501_s17 }
 0x7c1   : > { %6125 = vrot.lane.b32.xlu0 %v5617_v50, %s11501_s17 }
 0x7c3   : > { %6119 = vrot.lane.b32.xlu1 %v5614_v11, %s11501_s17 }
 0x7c5   : > { %6121 = vrot.lane.b32.xlu0 %v5615_v7, %s11501_s17 }
 0x7c7   : > { %6427 = vrot.lane.b32.xlu1 %v5628_v25, %s11502_s21 }
 0x7c9   : > { %6425 = vrot.lane.b32.xlu0 %v5627_v40, %s11502_s21 }
 0x7cb   : > { %6593 = vrot.lane.b32.xlu1 %v5620_v58, %s11503_s22 }
 0x7cd   : > { %6591 = vrot.lane.b32.xlu0 %v5619_v62, %s11503_s22 }
 0x7cf   : > { %6423 = vrot.lane.b32.xlu1 %v5626_v31, %s11502_s21 }
 0x7d1   : > { %6421 = vrot.lane.b32.xlu0 %v5625_v5, %s11502_s21 }
 0x7d3   : > { %6589 = vrot.lane.b32.xlu1 %v5618_v3, %s11503_s22 }
 0x7d5   : > { %6429 = vrot.lane.b32.xlu0 %v5629_v30, %s11502_s21 }
 0x7d7   : > { %6419 = vrot.lane.b32.xlu1 %v5624_v43, %s11502_s21 }
 0x7d9   : > { %6595 = vrot.lane.b32.xlu0 %v5621_v35, %s11503_s22 }
 0x7db   : > { %6585 = vrot.lane.b32.xlu1 %v5616_v8, %s11503_s22 }
 0x7dd   : > { %6587 = vrot.lane.b32.xlu0 %v5617_v50, %s11503_s22  ;;  %v8526_v50 = vld [vmem:[%s11414_s9 + $0x38] sm:$0xff]  }
 0x7df   : > { %6415 = vrot.lane.b32.xlu1 %v5622_v46, %s11502_s21 }
 0x7e1   : > { %6417 = vrot.lane.b32.xlu0 %v5623_v52, %s11502_s21 }
 0x7e3   : > { %6581 = vrot.lane.b32.xlu1 %v5614_v11, %s11503_s22 }
 0x7e5   : > { %6583 = vrot.lane.b32.xlu0 %v5615_v7, %s11503_s22 }
 0x7e7   : > { %6759 = vrot.lane.b32.xlu1 %v10747_v28, %s11527_s27 }
 0x7e9   : > { %6761 = vrot.lane.b32.xlu0 %v10750_v34, %s11527_s27 }
 0x7eb   : > { %6925 = vrot.lane.b32.xlu1 %v5628_v25, %s11592_s16 }
 0x7ed   : > { %6757 = vrot.lane.b32.xlu0 %v10742_v41, %s11527_s27 }
 0x7ef   : > { %6755 = vrot.lane.b32.xlu1 %v10738_v61, %s11527_s27 }
 0x7f1   : > { %6923 = vrot.lane.b32.xlu0 %v5627_v40, %s11592_s16 }
 0x7f3   : > { %6921 = vrot.lane.b32.xlu1 %v5626_v31, %s11592_s16 }
 0x7f5   : > { %6753 = vrot.lane.b32.xlu0 %v10734_v39, %s11527_s27 }
 0x7f7   : > { %6751 = vrot.lane.b32.xlu1 %v10730_v12, %s11527_s27 }
 0x7f9   : > { %6927 = vrot.lane.b32.xlu0 %v5629_v30, %s11592_s16  ;;  %v5703_v24 = vpop.permute.xlu1 %5702 }
 0x7fb   : > { %v5705_v18 = vpop.permute.xlu0 %5704  ;;  %6917 = vrot.lane.b32.xlu1 %v5624_v43, %s11592_s16  ;;  %v8527_v43 = vld [vmem:[%s11414_s9] sm:$0xff]  }
 0x7fc   : > { %v5709_v9 = vsel %vm580_vm4, %v5703_v24, %v5705_v18 }
 0x7fd   : > { %6919 = vrot.lane.b32.xlu0 %v5625_v5, %s11592_s16  ;;  %5775 = vmatprep.subr.bf16.mxu0 %v5709_v9  ;;  %v5699_v45 = vpop.permute.xlu1 %5698  ;;  %v8529_v9 = vld [vmem:[%s11414_s9 + $0x8] sm:$0xff]  }
 0x7fe   : > { %8143 = vmatpush1.bf16.msk.msra.mxu0 %vm9235_vm14, %v5703_v24 }
 0x7ff   : > { %v5701_v19 = vpop.permute.xlu0 %5700  ;;  %6747 = vrot.lane.b32.xlu1 %v10722_v15, %s11527_s27 }
 0x800   : > { %v5708_v29 = vsel %vm580_vm4, %v5699_v45, %v5701_v19 }
 0x801   : > { %6749 = vrot.lane.b32.xlu0 %v10726_v0, %s11527_s27  ;;  %5777 = vmatprep.subr.bf16.mxu0 %v5708_v29  ;;  %v5695_v55 = vpop.permute.xlu1 %5694  ;;  %v8530_v29 = vld [vmem:[%s11414_s9 + $0x48] sm:$0xff]  }
 0x802   : > { %8145 = vmatpush1.bf16.msk.msra.mxu0 %vm9235_vm14, %v5699_v45 }
 0x803   : > { %v5697_v17 = vpop.permute.xlu0 %5696  ;;  %6913 = vrot.lane.b32.xlu1 %v5622_v46, %s11592_s16  ;;  %v8528_v46 = vld [vmem:[%s11414_s9 + $0x40] sm:$0xff]  }
 0x804   : > { %v5707_v16 = vsel %vm580_vm4, %v5695_v55, %v5697_v17  ;;  %v8531_v17 = vld [vmem:[%s11414_s9 + $0x10] sm:$0xff]  }
 0x805   : > { %6915 = vrot.lane.b32.xlu0 %v5623_v52, %s11592_s16  ;;  %5779 = vmatprep.subr.bf16.mxu0 %v5707_v16  ;;  %v5691_v47 = vpop.permute.xlu1 %5690 }
 0x806   : > { %8147 = vmatpush1.bf16.msk.msra.mxu0 %vm9235_vm14, %v5695_v55 }
 0x807   : > { %v5693_v63 = vpop.permute.xlu0 %5692  ;;  %7119 = vperm.xlu1 %8412, %v7085_v27   ;;  %v8532_v27 = vld [vmem:[%s11414_s9 + $0x50] sm:$0xff]  }
 0x808   : > { %v5706_v56 = vsel %vm580_vm4, %v5691_v47, %v5693_v63  ;;  %vm8833_vm4 = vmmov 0  }
 0x809   : > { %7124 = vperm.xlu0 %8411, %v7086_v48   ;;  %5781 = vmatprep.subr.bf16.mxu0 %v5706_v56  ;;  %v5647_v38 = vpop.permute.xlu1 %5646 }
 0x80a   : > { %8149 = vmatpush1.bf16.msk.msra.mxu0 %vm9235_vm14, %v5691_v47  ;;  %v8533_v47 = vld [vmem:[%s11414_s9 + $0x18] sm:$0xff]  }
 0x80b   : > { %v5649_v6 = vpop.permute.xlu0 %5648  ;;  %7109 = vperm.xlu1 %8412, %v7083_v49  }
 0x80c   : > { %v5656_v22 = vsel %vm561_vm6, %v5647_v38, %v5649_v6 }
 0x80d   : > { %7114 = vperm.xlu0 %8411, %v7084_v20   ;;  %8150 = vmatmul.mubr.msk.bf16.vlgmr.msra.gmra.mxu0 %vm4105_vm3, %v8523_v4  ;;  %v5962_v57 = vpop.permute.xlu1 %5961 }
 0x80e   : > { %5809 = vmatprep.mubr.bf16.mxu0 %v11631_v2 }
 0x80f   : > { %v5964_v44 = vpop.permute.xlu0 %5963  ;;  %7099 = vperm.xlu1 %8412, %v7081_v14   ;;  %v8536_v14 = vld [vmem:[%s11414_s9 + $0x80] sm:$0xff]  }
 0x810   : > { %v5971_v10 = vsel %vm749_vm8, %v5962_v57, %v5964_v44 }
 0x811   : > { %7104 = vperm.xlu0 %8411, %v7082_v59   ;;  %v5643_v51 = vpop.permute.xlu1 %5642 }
 0x813   : > { %v5645_v13 = vpop.permute.xlu0 %5644  ;;  %7089 = vperm.xlu1 %8412, %v7079_v37  }
 0x814   : > { %v5655_v31 = vsel %vm561_vm6, %v5643_v51, %v5645_v13 }
 0x815   : > { %7094 = vperm.xlu0 %8411, %v7080_v23   ;;  %8151 = vmatmul.mubr.msk.bf16.gmra.mxu0 %vm4105_vm3, %v8524_v1  ;;  %v5651_v36 = vpop.permute.xlu1 %5650 }
 0x816   : > { %5819 = vmatprep.mubr.bf16.mxu0 %v11631_v2 }
 0x817   : > { %v5653_v21 = vpop.permute.xlu0 %5652 }
 0x818   : > { %v5657_v26 = vsel %vm561_vm6, %v5651_v36, %v5653_v21  ;;  %v8538_v21 = vld [vmem:[%s11414_s9 + $0x88] sm:$0xff]  }
 0x819   : > { %5880 = vmatprep.subr.bf16.mxu1 %v5657_v26  ;;  %v5966_v33 = vpop.permute.xlu1 %5965 }
 0x81a   : > { %8159 = vmatpush1.bf16.msk.msra.mxu1 %vm9251_vm0, %v5651_v36 }
 0x81b   : > { %v5968_v3 = vpop.permute.xlu0 %5967  ;;  %5882 = vmatprep.subr.bf16.mxu1 %v5656_v22  ;;  %v8539_v22 = vld [vmem:[%s11414_s9 + $0x70] sm:$0xff]  }
 0x81c   : > { %v5972_v53 = vsel %vm749_vm8, %v5966_v33, %v5968_v3 }
 0x81d   : > { %8152 = vmatmul.mubr.msk.bf16.gmra.mxu0 %vm4105_vm3, %v8525_v42  ;;  %6038 = vmatprep.subr.bf16.mxu0 %v5972_v53  ;;  %v5958_v62 = vpop.permute.xlu1 %5957 }
 0x81e   : > { %8161 = vmatpush1.bf16.msk.msra.mxu1 %vm9251_vm0, %v5647_v38  ;;  %8183 = vmatpush1.bf16.msk.msra.mxu0 %vm9263_vm1, %v5966_v33  ;;  %v8535_v38 = vld [vmem:[%s11414_s9 + $0x60] sm:$0xff]  }
 0x81f   : > { %v5960_v40 = vpop.permute.xlu0 %5959  ;;  %5884 = vmatprep.subr.bf16.mxu1 %v5655_v31  ;;  %6040 = vmatprep.subr.bf16.mxu0 %v5971_v10 }
 0x820   : > { %5829 = vmatprep.mubr.bf16.mxu0 %v11631_v2  ;;  %v5970_v58 = vsel %vm749_vm8, %v5958_v62, %v5960_v40  ;;  %v8541_v40 = vld [vmem:[%s11414_s9 + $0x78] sm:$0xff]  }
 0x821   : > { %v5639_v8 = vpop.permute.xlu1 %5638 }
 0x822   : > { %8163 = vmatpush1.bf16.msk.msra.mxu1 %vm9251_vm0, %v5643_v51  ;;  %8185 = vmatpush1.bf16.msk.msra.mxu0 %vm9263_vm1, %v5962_v57  ;;  %v8537_v51 = vld [vmem:[%s11414_s9 + $0x68] sm:$0xff]  }
 0x823   : > { %v5641_v35 = vpop.permute.xlu0 %5640  ;;  %6042 = vmatprep.subr.bf16.mxu0 %v5970_v58  ;;  %v8542_v58 = vld [vmem:[%s11414_s9 + $0x98] sm:$0xff]  }
 0x824   : > { %v5654_v25 = vsel %vm561_vm6, %v5639_v8, %v5641_v35 }
 0x825   : > { %8153 = vmatmul.mubr.msk.bf16.gmra.mxu0 %vm4105_vm3, %v8526_v50  ;;  %5886 = vmatprep.subr.bf16.mxu1 %v5654_v25  ;;  %v5954_v30 = vpop.permute.xlu1 %5953 }
 0x826   : > { %8165 = vmatpush1.bf16.msk.msra.mxu1 %vm9251_vm0, %v5639_v8  ;;  %8187 = vmatpush1.bf16.msk.msra.mxu0 %vm9263_vm1, %v5958_v62 }
 0x827   : > { %v5956_v5 = vpop.permute.xlu0 %5955  ;;  %6062 = vmatprep.mubr.bf16.mxu0 %v11631_v2 }
 0x828   : > { %v5969_v11 = vsel %vm749_vm8, %v5954_v30, %v5956_v5 }
 0x829   : > { %8166 = vmatmul.mubr.msk.bf16.vlgmr.msra.gmra.mxu1 %vm4105_vm3, %v8527_v43  ;;  %6044 = vmatprep.subr.bf16.mxu0 %v5969_v11  ;;  %v6132_v7 = vpop.permute.xlu1 %6131 }
 0x82a   : > { %8189 = vmatpush1.bf16.msk.msra.mxu0 %vm9263_vm1, %v5954_v30  ;;  %5914 = vmatprep.mubr.bf16.mxu1 %v11631_v2  ;;  %v8543_v30 = vld [vmem:[%s11414_s9 + $0xa0] sm:$0xff]  }
 0x82b   : > { %v6134_v52 = vpop.permute.xlu0 %6133  ;;  %6334 = vmatprep.subr.bf16.mxu0 %v10750_v34 }
 0x82c   : > { %v6138_v24 = vsel %vm845_vm9, %v6132_v7, %v6134_v52 }
 0x82d   : > { %8190 = vmatmul.mubr.msk.bf16.vlgmr.msra.gmra.mxu0 %vm4105_vm3, %v8528_v46  ;;  %6204 = vmatprep.subr.bf16.mxu1 %v6138_v24  ;;  %v6128_v18 = vpop.permute.xlu1 %6127 }
 0x82e   : > { %8207 = vmatpush1.bf16.msk.msra.mxu1 %vm9287_vm2, %v6132_v7  ;;  %6335 = vmatpush1.bf16.msra.mxu0 %v10747_v28  ;;  %v8544_v7 = vld [vmem:[%s11414_s9 + $0xc0] sm:$0xff]  }
 0x82f   : > { %v6130_v60 = vpop.permute.xlu0 %6129  ;;  %6336 = vmatprep.subr.bf16.mxu0 %v10742_v41  ;;  %6072 = vmatprep.mubr.bf16.mxu0 %v11631_v2 }
 0x830   : > { %v6137_v34 = vsel %vm845_vm9, %v6128_v18, %v6130_v60 }
 0x831   : > { %8167 = vmatmul.mubr.msk.bf16.gmra.mxu1 %vm4105_vm3, %v8529_v9  ;;  %6206 = vmatprep.subr.bf16.mxu1 %v6137_v34  ;;  %v6124_v19 = vpop.permute.xlu1 %6123  ;;  %v8545_v9 = vld [vmem:[%s11414_s9 + $0xa8] sm:$0xff]  }
 0x832   : > { %8209 = vmatpush1.bf16.msk.msra.mxu1 %vm9287_vm2, %v6128_v18  ;;  %6337 = vmatpush1.bf16.msra.mxu0 %v10738_v61 }
 0x833   : > { %v6126_v28 = vpop.permute.xlu0 %6125  ;;  %6338 = vmatprep.subr.bf16.mxu0 %v10734_v39  ;;  %5924 = vmatprep.mubr.bf16.mxu1 %v11631_v2 }
 0x834   : > { %v6136_v41 = vsel %vm845_vm9, %v6124_v19, %v6126_v28 }
 0x835   : > { %8191 = vmatmul.mubr.msk.bf16.gmra.mxu0 %vm4105_vm3, %v8530_v29  ;;  %6208 = vmatprep.subr.bf16.mxu1 %v6136_v41  ;;  %v6120_v55 = vpop.permute.xlu1 %6119  ;;  %v8546_v29 = vld [vmem:[%s11414_s9 + $0xc8] sm:$0xff]  }
 0x836   : > { %8211 = vmatpush1.bf16.msk.msra.mxu1 %vm9287_vm2, %v6124_v19  ;;  %6339 = vmatpush1.bf16.msra.mxu0 %v10730_v12 }
 0x837   : > { %v6122_v61 = vpop.permute.xlu0 %6121  ;;  %6340 = vmatprep.subr.bf16.mxu0 %v10726_v0  ;;  %6082 = vmatprep.mubr.bf16.mxu0 %v11631_v2 }
 0x838   : > { %v6135_v39 = vsel %vm845_vm9, %v6120_v55, %v6122_v61 }
 0x839   : > { %8168 = vmatmul.mubr.msk.bf16.gmra.mxu1 %vm4105_vm3, %v8531_v17  ;;  %6210 = vmatprep.subr.bf16.mxu1 %v6135_v39  ;;  %v6428_v16 = vpop.permute.xlu1 %6427  ;;  %v8547_v17 = vld [vmem:[%s11414_s9 + $0xb0] sm:$0xff]  }
 0x83a   : > { %8213 = vmatpush1.bf16.msk.msra.mxu1 %vm9287_vm2, %v6120_v55  ;;  %6341 = vmatpush1.bf16.msra.mxu0 %v10722_v15  ;;  %v8534_v15 = vld [vmem:[%s11414_s9 + $0x58] sm:$0xff]  }
 0x83b   : > { %v6426_v12 = vpop.permute.xlu0 %6425  ;;  %5934 = vmatprep.mubr.bf16.mxu1 %v11631_v2 }
 0x83d   : > { %8192 = vmatmul.mubr.msk.bf16.gmra.mxu0 %vm4105_vm3, %v8532_v27  ;;  %v6594_v0 = vpop.permute.xlu1 %6593  ;;  %v8548_v27 = vld [vmem:[%s11414_s9 + $0xd0] sm:$0xff]  }
 0x83e   : > { %6092 = vmatprep.mubr.bf16.mxu0 %v11631_v2 }
 0x83f   : > { %v6592_v48 = vpop.permute.xlu0 %6591 }
 0x841   : > { %8169 = vmatmul.mubr.msk.bf16.gmra.mxu1 %vm4105_vm3, %v8533_v47  ;;  %v6424_v63 = vpop.permute.xlu1 %6423  ;;  %v8551_v47 = vld [vmem:[%s11414_s9 + $0xe0] sm:$0xff]  }
 0x842   : > { %6228 = vmatprep.mubr.bf16.mxu1 %v11631_v2  ;;  %v6433_v44 = vsel %vm1029_vm10, %v6424_v63, %v6426_v12  ;;  %v8553_v63 = vld [vmem:[%s11414_s9 + $0xe8] sm:$0xff]  }
 0x843   : > { %v6422_v56 = vpop.permute.xlu0 %6421 }
 0x845   : > { %8193 = vmatmul.mubr.msk.bf16.gmra.mxu0 %vm4105_vm3, %v8534_v15  ;;  %v6590_v49 = vpop.permute.xlu1 %6589  ;;  %v8554_v15 = vld [vmem:[%s11414_s9 + $0x108] sm:$0xff]  }
 0x846   : > { %6358 = vmatprep.mubr.bf16.mxu0 %v11631_v2  ;;  %v6599_v23 = vsel %vm1125_vm11, %v6590_v49, %v6592_v48  ;;  %v8556_v49 = vld [vmem:[%s11414_s9 + $0x110] sm:$0xff]  }
 0x847   : > { %v6430_v4 = vpop.permute.xlu0 %6429 }
 0x848   : > { %v6434_v20 = vsel %vm1029_vm10, %v6428_v16, %v6430_v4  ;;  %8246 = vmatprep.subr.msk.bf16.mxu1 %vm1029_vm10, %v6430_v4  ;;  %v8558_v4 = vld [vmem:[%s11414_s9 + $0x118] sm:$0xff]  }
 0x849   : > { %8214 = vmatmul.mubr.msk.bf16.vlgmr.msra.gmra.mxu1 %vm4105_vm3, %v8535_v38  ;;  %v6420_v6 = vpop.permute.xlu1 %6419  ;;  %v8557_v38 = vld [vmem:[%s11414_s9 + $0xf8] sm:$0xff]  }
 0x84a   : > { %6501 = vmatpush1.bf16.msra.mxu1 %v6434_v20  ;;  %6238 = vmatprep.mubr.bf16.mxu1 %v11631_v2  ;;  %v6432_v13 = vsel %vm1029_vm10, %v6420_v6, %v6422_v56 }
 0x84b   : > { %8247 = vmatprep.subr.msk.bf16.mxu1 %vm1029_vm10, %v6426_v12  ;;  %v6596_v57 = vpop.permute.xlu0 %6595  ;;  %v8549_v12 = vld [vmem:[%s11414_s9 + $0xb8] sm:$0xff]  }
 0x84c   : > { %v6600_v59 = vsel %vm1125_vm11, %v6594_v0, %v6596_v57  ;;  %8266 = vmatprep.subr.msk.bf16.mxu0 %vm1125_vm11, %v6596_v57  ;;  %v8550_v0 = vld [vmem:[%s11414_s9 + $0xd8] sm:$0xff]  }
 0x84d   : > { %8230 = vmatmul.mubr.msk.bf16.vlgmr.msra.gmra.mxu0 %vm4105_vm3, %v8536_v14  ;;  %v6586_v37 = vpop.permute.xlu1 %6585 }
 0x84e   : > { %6503 = vmatpush1.bf16.msra.mxu1 %v6433_v44  ;;  %6667 = vmatpush1.bf16.msra.mxu0 %v6600_v59 }
 0x84f   : > { %8248 = vmatprep.subr.msk.bf16.mxu1 %vm1029_vm10, %v6422_v56  ;;  %8267 = vmatprep.subr.msk.bf16.mxu0 %vm1125_vm11, %v6592_v48  ;;  %v6588_v1 = vpop.permute.xlu0 %6587  ;;  %v8552_v48 = vld [vmem:[%s11414_s9 + $0x100] sm:$0xff]   ;;  %v8555_v56 = vld [vmem:[%s11414_s9 + $0xf0] sm:$0xff]  }
 0x850   : > { %6368 = vmatprep.mubr.bf16.mxu0 %v11631_v2  ;;  %v6598_v42 = vsel %vm1125_vm11, %v6586_v37, %v6588_v1 }
 0x851   : > { %8215 = vmatmul.mubr.msk.bf16.gmra.mxu1 %vm4105_vm3, %v8537_v51  ;;  %v6416_v36 = vpop.permute.xlu1 %6415 }
 0x852   : > { %6505 = vmatpush1.bf16.msra.mxu1 %v6432_v13  ;;  %6669 = vmatpush1.bf16.msra.mxu0 %v6599_v23 }
 0x853   : > { %8268 = vmatprep.subr.msk.bf16.mxu0 %vm1125_vm11, %v6588_v1  ;;  %v6418_v26 = vpop.permute.xlu0 %6417  ;;  %6248 = vmatprep.mubr.bf16.mxu1 %v11631_v2 }
 0x854   : > { %v6431_v33 = vsel %vm1029_vm10, %v6416_v36, %v6418_v26  ;;  %8249 = vmatprep.subr.msk.bf16.mxu1 %vm1029_vm10, %v6418_v26 }
 0x855   : > { %8231 = vmatmul.mubr.msk.bf16.gmra.mxu0 %vm4105_vm3, %v8538_v21  ;;  %v6582_v54 = vpop.permute.xlu1 %6581 }
 0x856   : > { %6507 = vmatpush1.bf16.msra.mxu1 %v6431_v33  ;;  %6671 = vmatpush1.bf16.msra.mxu0 %v6598_v42 }
 0x857   : > { %v6584_v3 = vpop.permute.xlu0 %6583  ;;  %6378 = vmatprep.mubr.bf16.mxu0 %v11631_v2 }
 0x858   : > { %v6597_v53 = vsel %vm1125_vm11, %v6582_v54, %v6584_v3  ;;  %8269 = vmatprep.subr.msk.bf16.mxu0 %vm1125_vm11, %v6584_v3 }
 0x859   : > { %8216 = vmatmul.mubr.msk.bf16.gmra.mxu1 %vm4105_vm3, %v8539_v22  ;;  %v6760_v62 = vpop.permute.xlu1 %6759 }
 0x85a   : > { %6673 = vmatpush1.bf16.msra.mxu0 %v6597_v53  ;;  %6258 = vmatprep.mubr.bf16.mxu1 %v11631_v2 }
 0x85b   : > { %v6762_v31 = vpop.permute.xlu0 %6761 }
 0x85c   : > { %8286 = vmatprep.subr.msk.bf16.mxu1 %vm1221_vm12, %v6762_v31  ;;  %v6766_v5 = vsel %vm1221_vm12, %v6760_v62, %v6762_v31 }
 0x85d   : > { %8232 = vmatmul.mubr.msk.bf16.gmra.mxu0 %vm4105_vm3, %v8540_v32  ;;  %v6926_v10 = vpop.permute.xlu1 %6925 }
 0x85e   : > { %6388 = vmatprep.mubr.bf16.mxu0 %v11631_v2 }
 0x85f   : > { %v6758_v8 = vpop.permute.xlu0 %6757 }
 0x861   : > { %8217 = vmatmul.mubr.msk.bf16.gmra.mxu1 %vm4105_vm3, %v8541_v40  ;;  %v6756_v50 = vpop.permute.xlu1 %6755 }
 0x862   : > { %6524 = vmatprep.mubr.bf16.mxu1 %v11631_v2  ;;  %v6765_v24 = vsel %vm1221_vm12, %v6756_v50, %v6758_v8 }
 0x863   : > { %v6924_v35 = vpop.permute.xlu0 %6923 }
 0x865   : > { %8233 = vmatmul.mubr.msk.bf16.gmra.mxu0 %vm4105_vm3, %v8542_v58  ;;  %v6922_v25 = vpop.permute.xlu1 %6921 }
 0x866   : > { %6690 = vmatprep.mubr.bf16.mxu0 %v11631_v2  ;;  %v6931_v60 = vsel %vm1317_vm13, %v6922_v25, %v6924_v35 }
 0x867   : > { %v6754_v43 = vpop.permute.xlu0 %6753 }
 0x869   : > { %8250 = vmatmul.mubr.msk.bf16.vlgmr.msra.gmra.mxu1 %vm4105_vm3, %v8543_v30  ;;  %v6752_v11 = vpop.permute.xlu1 %6751 }
 0x86a   : > { %6833 = vmatpush1.bf16.msra.mxu1 %v6766_v5  ;;  %6534 = vmatprep.mubr.bf16.mxu1 %v11631_v2  ;;  %v6764_v34 = vsel %vm1221_vm12, %v6752_v11, %v6754_v43 }
 0x86b   : > { %8287 = vmatprep.subr.msk.bf16.mxu1 %vm1221_vm12, %v6758_v8  ;;  %v6928_v46 = vpop.permute.xlu0 %6927 }
 0x86c   : > { %v6932_v52 = vsel %vm1317_vm13, %v6926_v10, %v6928_v46  ;;  %8306 = vmatprep.subr.msk.bf16.mxu0 %vm1317_vm13, %v6928_v46 }
 0x86d   : > { %8270 = vmatmul.mubr.msk.bf16.vlgmr.msra.gmra.mxu0 %vm4105_vm3, %v8544_v7  ;;  %v6918_v18 = vpop.permute.xlu1 %6917 }
 0x86e   : > { %6835 = vmatpush1.bf16.msra.mxu1 %v6765_v24  ;;  %6999 = vmatpush1.bf16.msra.mxu0 %v6932_v52 }
 0x86f   : > { %8288 = vmatprep.subr.msk.bf16.mxu1 %vm1221_vm12, %v6754_v43  ;;  %8307 = vmatprep.subr.msk.bf16.mxu0 %vm1317_vm13, %v6924_v35  ;;  %v6920_v45 = vpop.permute.xlu0 %6919 }
 0x870   : > { %6700 = vmatprep.mubr.bf16.mxu0 %v11631_v2  ;;  %v6930_v55 = vsel %vm1317_vm13, %v6918_v18, %v6920_v45 }
 0x871   : > { %8251 = vmatmul.mubr.msk.bf16.gmra.mxu1 %vm4105_vm3, %v8545_v9  ;;  %v6748_v19 = vpop.permute.xlu1 %6747 }
 0x872   : > { %6837 = vmatpush1.bf16.msra.mxu1 %v6764_v34  ;;  %7001 = vmatpush1.bf16.msra.mxu0 %v6931_v60 }
 0x873   : > { %8308 = vmatprep.subr.msk.bf16.mxu0 %vm1317_vm13, %v6920_v45  ;;  %v6750_v28 = vpop.permute.xlu0 %6749  ;;  %6544 = vmatprep.mubr.bf16.mxu1 %v11631_v2 }
 0x874   : > { %v6763_v41 = vsel %vm1221_vm12, %v6748_v19, %v6750_v28  ;;  %8289 = vmatprep.subr.msk.bf16.mxu1 %vm1221_vm12, %v6750_v28 }
 0x875   : > { %8271 = vmatmul.mubr.msk.bf16.gmra.mxu0 %vm4105_vm3, %v8546_v29  ;;  %v6914_v61 = vpop.permute.xlu1 %6913 }
 0x876   : > { %6839 = vmatpush1.bf16.msra.mxu1 %v6763_v41  ;;  %7003 = vmatpush1.bf16.msra.mxu0 %v6930_v55 }
 0x877   : > { %v6916_v39 = vpop.permute.xlu0 %6915  ;;  %6710 = vmatprep.mubr.bf16.mxu0 %v11631_v2 }
 0x878   : > { %v6929_v16 = vsel %vm1317_vm13, %v6914_v61, %v6916_v39  ;;  %8309 = vmatprep.subr.msk.bf16.mxu0 %vm1317_vm13, %v6916_v39 }
 0x879   : > { %8252 = vmatmul.mubr.msk.bf16.gmra.mxu1 %vm4105_vm3, %v8547_v17 }
 0x87a   : > { %7005 = vmatpush1.bf16.msra.mxu0 %v6929_v16  ;;  %6554 = vmatprep.mubr.bf16.mxu1 %v11631_v2 }
 0x87d   : > { %8272 = vmatmul.mubr.msk.bf16.gmra.mxu0 %vm4105_vm3, %v8548_v27 }
 0x87e   : > { %6720 = vmatprep.mubr.bf16.mxu0 %v11631_v2 }
 0x881   : > { %8253 = vmatmul.mubr.msk.bf16.gmra.mxu1 %vm4105_vm3, %v8549_v12 }
 0x882   : > { %6856 = vmatprep.mubr.bf16.mxu1 %v11631_v2 }
 0x885   : > { %8273 = vmatmul.mubr.msk.bf16.gmra.mxu0 %vm4105_vm3, %v8550_v0 }
 0x886   : > { %7022 = vmatprep.mubr.bf16.mxu0 %v11631_v2 }
 0x889   : > { %8290 = vmatmul.mubr.msk.bf16.vlgmr.msra.gmra.mxu1 %vm4105_vm3, %v8551_v47 }
 0x88a   : > { %6866 = vmatprep.mubr.bf16.mxu1 %v11631_v2 }
 0x88d   : > { %8310 = vmatmul.mubr.msk.bf16.vlgmr.msra.gmra.mxu0 %vm4105_vm3, %v8552_v48 }
 0x88e   : > { %7032 = vmatprep.mubr.bf16.mxu0 %v11631_v2 }
 0x891   : > { %8291 = vmatmul.mubr.msk.bf16.gmra.mxu1 %vm4105_vm3, %v8553_v63 }
 0x892   : > { %6876 = vmatprep.mubr.bf16.mxu1 %v11631_v2 }
 0x895   : > { %8311 = vmatmul.mubr.msk.bf16.gmra.mxu0 %vm4105_vm3, %v8554_v15 }
 0x896   : > { %7042 = vmatprep.mubr.bf16.mxu0 %v11631_v2 }
 0x899   : > { %8292 = vmatmul.mubr.msk.bf16.gmra.mxu1 %vm4105_vm3, %v8555_v56 }
 0x89a   : > { %6886 = vmatprep.mubr.bf16.mxu1 %v11631_v2 }
 0x89d   : > { %8312 = vmatmul.mubr.msk.bf16.gmra.mxu0 %vm4105_vm3, %v8556_v49 }
 0x89e   : > { %7052 = vmatprep.mubr.bf16.mxu0 %v11631_v2 }
 0x8a1   : > { %8293 = vmatmul.mubr.msk.bf16.gmra.mxu1 %vm4105_vm3, %v8557_v38 }
 0x8a5   : > { %8313 = vmatmul.mubr.msk.bf16.gmra.mxu0 %vm4105_vm3, %v8558_v4 }
 0x8cd   : > { %v5801_v20 = vpop.f32.mrf.mxu0 }
 0x8cf   : > { %v5803_v6 = vpop.f32.mrf.mxu0 }
 0x8d1   : > { %v5805_v14 = vpop.f32.mrf.mxu0 }
 0x8d3   : > { %v5807_v57 = vpop.f32.mrf.mxu0 }
 0x8d5   : > { %v5811_v59 = vpop.f32.mrf.mxu0 }
 0x8d7   : > { %v5813_v44 = vpop.f32.mrf.mxu0 }
 0x8d9   : > { %v5815_v37 = vpop.f32.mrf.mxu0 }
 0x8db   : > { %v5817_v51 = vpop.f32.mrf.mxu0 }
 0x8dd   : > { %v5821_v1 = vpop.f32.mrf.mxu0 }
 0x8df   : > { %v5823_v23 = vpop.f32.mrf.mxu0 }
 0x8e1   : > { %v5825_v13 = vpop.f32.mrf.mxu0 }
 0x8e3   : > { %v5827_v2 = vpop.f32.mrf.mxu0 }
 0x8e5   : > { %v5831_v36 = vpop.f32.mrf.mxu0 }
 0x8e7   : > { %v5833_v21 = vpop.f32.mrf.mxu0 }
 0x8e9   : > { %v5835_v26 = vpop.f32.mrf.mxu0  ;;  %v5906_v33 = vpop.f32.mrf.mxu1 }
 0x8ea   : > { %v5907_v42 = vadd.f32 %v5906_v33, %v5801_v20 }
 0x8eb   : > { %v5837_v54 = vpop.f32.mrf.mxu0  ;;  %v5908_v22 = vpop.f32.mrf.mxu1 }
 0x8ec   : > { %v5909_v3 = vadd.f32 %v5908_v22, %v5803_v6 }
 0x8ed   : > { %v5910_v53 = vpop.f32.mrf.mxu1  ;;  %v6064_v62 = vpop.f32.mrf.mxu0 }
 0x8ee   : > { %v5911_v32 = vadd.f32 %v5910_v53, %v5805_v14  ;;  %v6103_v31 = vadd.f32 %v6064_v62, %v5907_v42 }
 0x8ef   : > { %v5912_v10 = vpop.f32.mrf.mxu1  ;;  %v6066_v40 = vpop.f32.mrf.mxu0 }
 0x8f0   : > { %v5913_v8 = vadd.f32 %v5912_v10, %v5807_v57  ;;  %v6104_v50 = vadd.f32 %v6066_v40, %v5909_v3 }
 0x8f1   : > { %v5916_v58 = vpop.f32.mrf.mxu1  ;;  %v6068_v35 = vpop.f32.mrf.mxu0 }
 0x8f2   : > { %v5917_v25 = vadd.f32 %v5916_v58, %v5811_v59  ;;  %v6105_v30 = vadd.f32 %v6068_v35, %v5911_v32 }
 0x8f3   : > { %v5918_v43 = vpop.f32.mrf.mxu1  ;;  %v6070_v5 = vpop.f32.mrf.mxu0 }
 0x8f4   : > { %v5919_v11 = vadd.f32 %v5918_v43, %v5813_v44  ;;  %v6106_v7 = vadd.f32 %v6070_v5, %v5913_v8 }
 0x8f5   : > { %v5920_v46 = vpop.f32.mrf.mxu1  ;;  %v6074_v52 = vpop.f32.mrf.mxu0 }
 0x8f6   : > { %v5921_v24 = vadd.f32 %v5920_v46, %v5815_v37  ;;  %v6107_v18 = vadd.f32 %v6074_v52, %v5917_v25 }
 0x8f7   : > { %v5922_v9 = vpop.f32.mrf.mxu1  ;;  %v6076_v45 = vpop.f32.mrf.mxu0 }
 0x8f8   : > { %v5923_v60 = vadd.f32 %v5922_v9, %v5817_v51  ;;  %v6108_v34 = vadd.f32 %v6076_v45, %v5919_v11 }
 0x8f9   : > { %v5926_v19 = vpop.f32.mrf.mxu1  ;;  %v6078_v29 = vpop.f32.mrf.mxu0 }
 0x8fa   : > { %v5927_v28 = vadd.f32 %v5926_v19, %v5821_v1  ;;  %v6109_v41 = vadd.f32 %v6078_v29, %v5921_v24 }
 0x8fb   : > { %v5928_v55 = vpop.f32.mrf.mxu1  ;;  %v6080_v17 = vpop.f32.mrf.mxu0 }
 0x8fc   : > { %v5929_v61 = vadd.f32 %v5928_v55, %v5823_v23  ;;  %v6110_v39 = vadd.f32 %v6080_v17, %v5923_v60 }
 0x8fd   : > { %v5930_v16 = vpop.f32.mrf.mxu1  ;;  %v6084_v27 = vpop.f32.mrf.mxu0 }
 0x8fe   : > { %v5931_v12 = vadd.f32 %v5930_v16, %v5825_v13  ;;  %v6111_v0 = vadd.f32 %v6084_v27, %v5927_v28 }
 0x8ff   : > { %v5932_v47 = vpop.f32.mrf.mxu1  ;;  %v6086_v48 = vpop.f32.mrf.mxu0 }
 0x900   : > { %v5933_v63 = vadd.f32 %v5932_v47, %v5827_v2  ;;  %v6112_v15 = vadd.f32 %v6086_v48, %v5929_v61 }
 0x901   : > { %v5936_v56 = vpop.f32.mrf.mxu1  ;;  %v6088_v49 = vpop.f32.mrf.mxu0 }
 0x902   : > { %v5937_v38 = vadd.f32 %v5936_v56, %v5831_v36  ;;  %v6113_v4 = vadd.f32 %v6088_v49, %v5931_v12 }
 0x903   : > { %v5938_v20 = vpop.f32.mrf.mxu1  ;;  %v6090_v6 = vpop.f32.mrf.mxu0 }
 0x904   : > { %v5939_v14 = vadd.f32 %v5938_v20, %v5833_v21  ;;  %v6114_v57 = vadd.f32 %v6090_v6, %v5933_v63 }
 0x905   : > { %v5940_v59 = vpop.f32.mrf.mxu1  ;;  %v6094_v44 = vpop.f32.mrf.mxu0 }
 0x906   : > { %v5941_v37 = vadd.f32 %v5940_v59, %v5835_v26  ;;  %v11154_v51 = vadd.f32 %v6094_v44, %v5937_v38 }
 0x907   : > { %v5942_v1 = vpop.f32.mrf.mxu1  ;;  %v6096_v23 = vpop.f32.mrf.mxu0 }
 0x908   : > { %v5943_v13 = vadd.f32 %v5942_v1, %v5837_v54  ;;  %v11156_v33 = vadd.f32 %v6096_v23, %v5939_v14 }
 0x909   : > { %v6098_v2 = vpop.f32.mrf.mxu0  ;;  %v6230_v42 = vpop.f32.mrf.mxu1 }
 0x90a   : > { %v11158_v22 = vadd.f32 %v6098_v2, %v5941_v37  ;;  %v6269_v36 = vadd.f32 %v6230_v42, %v6103_v31 }
 0x90b   : > { %v6100_v3 = vpop.f32.mrf.mxu0  ;;  %v6232_v53 = vpop.f32.mrf.mxu1 }
 0x90c   : > { %v11160_v62 = vadd.f32 %v6100_v3, %v5943_v13  ;;  %v6270_v21 = vadd.f32 %v6232_v53, %v6104_v50 }
 0x90d   : > { %v6234_v32 = vpop.f32.mrf.mxu1  ;;  %v6360_v10 = vpop.f32.mrf.mxu0 }
 0x90e   : > { %v6271_v26 = vadd.f32 %v6234_v32, %v6105_v30  ;;  %v6399_v40 = vadd.f32 %v6360_v10, %v6269_v36 }
 0x90f   : > { %v6236_v8 = vpop.f32.mrf.mxu1  ;;  %v6362_v58 = vpop.f32.mrf.mxu0 }
 0x910   : > { %v6272_v35 = vadd.f32 %v6236_v8, %v6106_v7  ;;  %v6400_v54 = vadd.f32 %v6362_v58, %v6270_v21 }
 0x911   : > { %v6240_v25 = vpop.f32.mrf.mxu1  ;;  %v6364_v43 = vpop.f32.mrf.mxu0 }
 0x912   : > { %v6273_v5 = vadd.f32 %v6240_v25, %v6107_v18  ;;  %v6401_v11 = vadd.f32 %v6364_v43, %v6271_v26 }
 0x913   : > { %v6242_v46 = vpop.f32.mrf.mxu1  ;;  %v6366_v52 = vpop.f32.mrf.mxu0 }
 0x914   : > { %v6274_v31 = vadd.f32 %v6242_v46, %v6108_v34  ;;  %v6402_v24 = vadd.f32 %v6366_v52, %v6272_v35 }
 0x915   : > { %v6244_v9 = vpop.f32.mrf.mxu1  ;;  %v6370_v45 = vpop.f32.mrf.mxu0 }
 0x916   : > { %v6275_v60 = vadd.f32 %v6244_v9, %v6109_v41  ;;  %v11162_v50 = vadd.f32 %v6370_v45, %v6273_v5 }
 0x917   : > { %v6246_v19 = vpop.f32.mrf.mxu1  ;;  %v6372_v30 = vpop.f32.mrf.mxu0 }
 0x918   : > { %v6276_v29 = vadd.f32 %v6246_v19, %v6110_v39  ;;  %v11164_v28 = vadd.f32 %v6372_v30, %v6274_v31 }
 0x919   : > { %v6250_v7 = vpop.f32.mrf.mxu1  ;;  %v6374_v55 = vpop.f32.mrf.mxu0 }
 0x91a   : > { %v6277_v17 = vadd.f32 %v6250_v7, %v6111_v0  ;;  %v11166_v61 = vadd.f32 %v6374_v55, %v6275_v60  ;;  %v11212_v55 = vpop.permute.xlu0 %7124 }
 0x91b   : > { %v6252_v18 = vpop.f32.mrf.mxu1  ;;  %v6376_v16 = vpop.f32.mrf.mxu0  ;;  %11636 = vst [vmem:[#allocation13_spill] sm:$0xff] %v11212_v55 }
 0x91c   : > { %v6278_v27 = vadd.f32 %v6252_v18, %v6112_v15  ;;  %v11168_v34 = vadd.f32 %v6376_v16, %v6276_v29 }
 0x91d   : > { %v6254_v12 = vpop.f32.mrf.mxu1  ;;  %v6380_v47 = vpop.f32.mrf.mxu0 }
 0x91e   : > { %v6279_v41 = vadd.f32 %v6254_v12, %v6113_v4  ;;  %v11170_v48 = vadd.f32 %v6380_v47, %v6277_v17 }
 0x91f   : > { %v6256_v63 = vpop.f32.mrf.mxu1  ;;  %v6382_v56 = vpop.f32.mrf.mxu0 }
 0x920   : > { %v6280_v39 = vadd.f32 %v6256_v63, %v6114_v57  ;;  %v11172_v49 = vadd.f32 %v6382_v56, %v6278_v27  ;;  %v11228_v63 = vpop.permute.xlu0 %7114 }
 0x921   : > { %v11174_v38 = vpop.f32.mrf.mxu1  ;;  %v6384_v0 = vpop.f32.mrf.mxu0  ;;  %11639 = vst [vmem:[#allocation29_spill] sm:$0xff] %v11228_v63 }
 0x922   : > { %v11176_v20 = vadd.f32 %v6384_v0, %v6279_v41 }
 0x923   : > { %v11178_v6 = vpop.f32.mrf.mxu1  ;;  %v6386_v15 = vpop.f32.mrf.mxu0 }
 0x924   : > { %v11180_v14 = vadd.f32 %v6386_v15, %v6280_v39 }
 0x925   : > { %v11182_v59 = vpop.f32.mrf.mxu1  ;;  %v11184_v4 = vpop.f32.mrf.mxu0 }
 0x927   : > { %v11186_v44 = vpop.f32.mrf.mxu1  ;;  %v11188_v37 = vpop.f32.mrf.mxu0 }
 0x929   : > { %v11190_v57 = vpop.f32.mrf.mxu0  ;;  %v6526_v1 = vpop.f32.mrf.mxu1 }
 0x92a   : > { %v6565_v23 = vadd.f32 %v6526_v1, %v6399_v40 }
 0x92b   : > { %v11192_v13 = vpop.f32.mrf.mxu0  ;;  %v6528_v2 = vpop.f32.mrf.mxu1 }
 0x92c   : > { %v6566_v42 = vadd.f32 %v6528_v2, %v6400_v54 }
 0x92d   : > { %v6530_v36 = vpop.f32.mrf.mxu1  ;;  %v6692_v3 = vpop.f32.mrf.mxu0 }
 0x92e   : > { %v6567_v53 = vadd.f32 %v6530_v36, %v6401_v11  ;;  %v6731_v21 = vadd.f32 %v6692_v3, %v6565_v23 }
 0x92f   : > { %v6532_v32 = vpop.f32.mrf.mxu1  ;;  %v6694_v10 = vpop.f32.mrf.mxu0 }
 0x930   : > { %v6568_v26 = vadd.f32 %v6532_v32, %v6402_v24  ;;  %v6732_v8 = vadd.f32 %v6694_v10, %v6566_v42  ;;  %v11202_v24 = vpop.permute.xlu1 %7119  ;;  %v11240_v42 = vpop.permute.xlu0 %7104 }
 0x931   : > { %v6536_v58 = vpop.f32.mrf.mxu1  ;;  %v6696_v35 = vpop.f32.mrf.mxu0  ;;  %11635 = vst [vmem:[#allocation20_spill] sm:$0xff] %v11202_v24 }
 0x932   : > { %v6733_v25 = vadd.f32 %v6696_v35, %v6567_v53  ;;  %v6569_v55 = vadd.f32 %v6536_v58, %v11162_v50 }
 0x933   : > { %v6538_v43 = vpop.f32.mrf.mxu1  ;;  %v6698_v5 = vpop.f32.mrf.mxu0 }
 0x934   : > { %v6734_v46 = vadd.f32 %v6698_v5, %v6568_v26  ;;  %v11218_v16 = vpop.permute.xlu1 %7109 }
 0x935   : > { %v6540_v52 = vpop.f32.mrf.mxu1  ;;  %v6702_v40 = vpop.f32.mrf.mxu0 }
 0x936   : > { %v6571_v50 = vadd.f32 %v6540_v52, %v11166_v61 }
 0x937   : > { %v11194_v31 = vpop.f32.mrf.mxu1  ;;  %v6704_v9 = vpop.f32.mrf.mxu0 }
 0x938   : > { %v11234_v0 = vpop.permute.xlu1 %7099 }
 0x939   : > { %v11196_v54 = vpop.f32.mrf.mxu1  ;;  %v6706_v45 = vpop.f32.mrf.mxu0 }
 0x93b   : > { %v11198_v11 = vpop.f32.mrf.mxu1  ;;  %v11200_v60 = vpop.f32.mrf.mxu0 }
 0x93c   : > { %v7090_v32 = vpop.permute.xlu1 %7089 }
 0x93d   : > { %v11204_v19 = vpop.f32.mrf.mxu1  ;;  %v11206_v30 = vpop.f32.mrf.mxu0 }
 0x93f   : > { %v11208_v29 = vpop.f32.mrf.mxu1  ;;  %v11210_v7 = vpop.f32.mrf.mxu0 }
 0x941   : > { %v11214_v17 = vpop.f32.mrf.mxu1  ;;  %v11216_v18 = vpop.f32.mrf.mxu0 }
 0x943   : > { %v11220_v27 = vpop.f32.mrf.mxu1  ;;  %v11222_v12 = vpop.f32.mrf.mxu0 }
 0x945   : > { %v11224_v47 = vpop.f32.mrf.mxu1  ;;  %v11226_v41 = vpop.f32.mrf.mxu0 }
 0x946   : > { %11637 = vst [vmem:[#allocation21_spill] sm:$0xff] %v11224_v47  ;;  %11638 = vst [vmem:[#allocation23_spill] sm:$0xff] %v11226_v41  ;;  %v7095_v41 = vpop.permute.xlu0 %7094  ;;  %v6735_v47 = vadd.f32 %v6702_v40, %v6569_v55  ;;  %v6282_v40 = vadd.f32 %v11178_v6, %v11156_v33  ;;  %v6737_v55 = vadd.f32 %v6706_v45, %v6571_v50 }
 0x947   : > { %v11230_v56 = vpop.f32.mrf.mxu1  ;;  %v11232_v39 = vpop.f32.mrf.mxu0  ;;  %v6573_v33 = vadd.f32 %v11196_v54, %v11170_v48 }
 0x948   : > { %11640 = vst [vmem:[#allocation31_spill] sm:$0xff] %v11230_v56  ;;  %11641 = vst [vmem:[#allocation32_spill] sm:$0xff] %v11232_v39 }
 0x949   : > { %v11236_v15 = vpop.f32.mrf.mxu0  ;;  %v6858_v1 = vpop.f32.mrf.mxu1 }
 0x94a   : > { %11642 = vst [vmem:[#allocation28_spill] sm:$0xff] %v11236_v15  ;;  %v6897_v36 = vadd.f32 %v6858_v1, %v6731_v21  ;;  %v6570_v15 = vadd.f32 %v6538_v43, %v11164_v28 }
 0x94b   : > { %v11238_v23 = vpop.f32.mrf.mxu0  ;;  %v6860_v2 = vpop.f32.mrf.mxu1 }
 0x94c   : > { %11643 = vst [vmem:[#allocation33_spill] sm:$0xff] %v11238_v23  ;;  %v6898_v10 = vadd.f32 %v6860_v2, %v6732_v8  ;;  %v6281_v2 = vadd.f32 %v11174_v38, %v11154_v51  ;;  %v6736_v58 = vadd.f32 %v6704_v9, %v6570_v15 }
 0x94d   : > { %v6862_v3 = vpop.f32.mrf.mxu1  ;;  %v7024_v53 = vpop.f32.mrf.mxu0 }
 0x94e   : > { %v7063_v26 = vadd.f32 %v7024_v53, %v6897_v36  ;;  %v6899_v24 = vadd.f32 %v6862_v3, %v6733_v25 }
 0x94f   : > { %v6864_v35 = vpop.f32.mrf.mxu1  ;;  %v7026_v5 = vpop.f32.mrf.mxu0 }
 0x950   : > { %v11243_v56 = vadd.f32 %v7090_v32, %v7063_v26  ;;  %v7064_v63 = vadd.f32 %v7026_v5, %v6898_v10  ;;  %v6900_v25 = vadd.f32 %v6864_v35, %v6734_v46  ;;  %v6412_v35 = vadd.f32 %v11188_v37, %v6282_v40 }
 0x951   : > { %v6868_v23 = vpop.f32.mrf.mxu1  ;;  %v7028_v39 = vpop.f32.mrf.mxu0  ;;  %v6575_v37 = vadd.f32 %v11204_v19, %v11176_v20 }
 0x952   : > { %v8314_v21 = vmul.f32 -1.442695, %v11243_v56  ;;  %v11247_v1 = vadd.f32 %v7090_v32, %v7064_v63  ;;  %v7065_v8 = vadd.f32 %v7028_v39, %v6899_v24  ;;  %v6901_v43 = vadd.f32 %v6868_v23, %v6735_v47 }
 0x953   : > { %v6870_v36 = vpop.f32.mrf.mxu1  ;;  %v7030_v3 = vpop.f32.mrf.mxu0  ;;  %v6283_v24 = vadd.f32 %v11182_v59, %v11158_v22  ;;  %v6411_v63 = vadd.f32 %v11184_v4, %v6281_v2  ;;  %v6572_v47 = vadd.f32 %v11194_v31, %v11168_v34  ;;  %v6284_v23 = vadd.f32 %v11186_v44, %v11160_v62 }
 0x954   : > { %8751 = vpow2.f32 %v8314_v21  ;;  %v8315_v28 = vmul.f32 -1.442695, %v11247_v1  ;;  %v11253_v53 = vadd.f32 %v7095_v41, %v7065_v8  ;;  %v7066_v51 = vadd.f32 %v7030_v3, %v6900_v25 }
 0x955   : > { %v6872_v38 = vpop.f32.mrf.mxu1  ;;  %v7034_v61 = vpop.f32.mrf.mxu0  ;;  %v6902_v52 = vadd.f32 %v6870_v36, %v6736_v58  ;;  %v6574_v4 = vadd.f32 %v11198_v11, %v11172_v49  ;;  %v6738_v34 = vadd.f32 %v11200_v60, %v6572_v47  ;;  %v6413_v21 = vadd.f32 %v11190_v57, %v6283_v24 }
 0x956   : > { %8753 = vpow2.f32 %v8315_v28  ;;  %v8316_v46 = vmul.f32 -1.442695, %v11253_v53  ;;  %v7067_v9 = vadd.f32 %v7034_v61, %v6901_v43  ;;  %v11265_v6 = vadd.f32 %v7095_v41, %v7066_v51 }
 0x957   : > { %v6874_v22 = vpop.f32.mrf.mxu1  ;;  %v7036_v59 = vpop.f32.mrf.mxu0  ;;  %v6903_v45 = vadd.f32 %v6872_v38, %v6737_v55  ;;  %v6739_v41 = vadd.f32 %v11206_v30, %v6573_v33  ;;  %v6740_v62 = vadd.f32 %v11210_v7, %v6574_v4  ;;  %v6576_v36 = vadd.f32 %v11208_v29, %v11180_v14  ;;  %v11644_v14 = vld [vmem:[#allocation21_spill] sm:$0xff]  ;;  %v11645_v38 = vld [vmem:[#allocation23_spill] sm:$0xff] }
 0x958   : > { %8755 = vpow2.f32 %v8316_v46  ;;  %v11268_v39 = vadd.f32 %v11234_v0, %v7067_v9  ;;  %v7068_v15 = vadd.f32 %v7036_v59, %v6902_v52  ;;  %v8317_v48 = vmul.f32 -1.442695, %v11265_v6 }
 0x959   : > { %v6878_v31 = vpop.f32.mrf.mxu1  ;;  %v7038_v54 = vpop.f32.mrf.mxu0  ;;  %v6904_v49 = vadd.f32 %v6874_v22, %v6738_v34  ;;  %v6577_v3 = vadd.f32 %v11214_v17, %v6411_v63  ;;  %v6741_v57 = vadd.f32 %v11216_v18, %v6575_v37  ;;  %v6578_v19 = vadd.f32 %v11220_v27, %v6412_v35  ;;  %v11646_v63 = vld [vmem:[#allocation32_spill] sm:$0xff] }
 0x95a   : > { %v8318_v32 = vmul.f32 -1.442695, %v11268_v39  ;;  %v11279_v10 = vadd.f32 %v11234_v0, %v7068_v15  ;;  %v7069_v26 = vadd.f32 %v7038_v54, %v6903_v45  ;;  %8757 = vpow2.f32 %v8317_v48  ;;  %v11647_v34 = vld [vmem:[#allocation28_spill] sm:$0xff] }
 0x95b   : > { %v6880_v44 = vpop.f32.mrf.mxu1  ;;  %v7040_v11 = vpop.f32.mrf.mxu0  ;;  %v6905_v5 = vadd.f32 %v6878_v31, %v6739_v41  ;;  %v6414_v0 = vadd.f32 %v11192_v13, %v6284_v23  ;;  %v6742_v55 = vadd.f32 %v11222_v12, %v6576_v36  ;;  %v6579_v29 = vadd.f32 %v11644_v14, %v6413_v21  ;;  %v11648_v31 = vld [vmem:[#allocation29_spill] sm:$0xff] }
 0x95c   : > { %8759 = vpow2.f32 %v8318_v32  ;;  %v8319_v60 = vmul.f32 -1.442695, %v11279_v10  ;;  %v11285_v30 = vadd.f32 %v11240_v42, %v7069_v26  ;;  %v7070_v8 = vadd.f32 %v7040_v11, %v6904_v49  ;;  %v11649_v49 = vld [vmem:[#allocation31_spill] sm:$0xff] }
 0x95d   : > { %v6882_v7 = vpop.f32.mrf.mxu1  ;;  %v7044_v2 = vpop.f32.mrf.mxu0  ;;  %v6906_v58 = vadd.f32 %v6880_v44, %v6740_v62  ;;  %v6743_v61 = vadd.f32 %v11645_v38, %v6577_v3  ;;  %v6744_v47 = vadd.f32 %v11646_v63, %v6578_v19  ;;  %v6745_v48 = vadd.f32 %v11647_v34, %v6579_v29 }
 0x95e   : > { %8761 = vpow2.f32 %v8319_v60  ;;  %v8320_v50 = vmul.f32 -1.442695, %v11285_v30  ;;  %v7071_v25 = vadd.f32 %v7044_v2, %v6905_v5  ;;  %v11297_v13 = vadd.f32 %v11240_v42, %v7070_v8  ;;  %v11650_v8 = vld [vmem:[#allocation20_spill] sm:$0xff] }
 0x95f   : > { %v6884_v28 = vpop.f32.mrf.mxu1  ;;  %v7046_v20 = vpop.f32.mrf.mxu0  ;;  %v6907_v18 = vadd.f32 %v6882_v7, %v6741_v57  ;;  %v6580_v44 = vadd.f32 %v11649_v49, %v6414_v0 }
 0x960   : > { %8763 = vpow2.f32 %v8320_v50  ;;  %v11301_v43 = vadd.f32 %v11218_v16, %v7071_v25  ;;  %v7072_v40 = vadd.f32 %v7046_v20, %v6906_v58  ;;  %v8321_v17 = vmul.f32 -1.442695, %v11297_v13  ;;  %v11651_v25 = vld [vmem:[#allocation33_spill] sm:$0xff] }
 0x961   : > { %v8752_v24 = vpop.eup %8751  ;;  %v6888_v51 = vpop.f32.mrf.mxu1  ;;  %v6908_v12 = vadd.f32 %v6884_v28, %v6742_v55  ;;  %v6746_v36 = vadd.f32 %v11651_v25, %v6580_v44 }
 0x962   : > { %v7048_v42 = vpop.f32.mrf.mxu0  ;;  %v7191_v46 = vadd.f32 1.0, %v8752_v24  ;;  %v8322_v27 = vmul.f32 -1.442695, %v11301_v43  ;;  %v11309_v52 = vadd.f32 %v11218_v16, %v7072_v40  ;;  %8765 = vpow2.f32 %v8321_v17  ;;  %v11652_v17 = vld [vmem:[#allocation13_spill] sm:$0xff] }
 0x963   : > { %v8754_v9 = vpop.eup %8753  ;;  %v7073_v33 = vadd.f32 %v7048_v42, %v6907_v18  ;;  %v6890_v22 = vpop.f32.mrf.mxu1  ;;  %v6909_v23 = vadd.f32 %v6888_v51, %v6743_v61 }
 0x964   : > { %v7050_v59 = vpop.f32.mrf.mxu0  ;;  %8767 = vrcp.f32 %v7191_v46  ;;  %v7192_v45 = vadd.f32 1.0, %v8754_v9  ;;  %v8323_v15 = vmul.f32 -1.442695, %v11309_v52  ;;  %v6910_v35 = vadd.f32 %v6890_v22, %v6744_v47 }
 0x965   : > { %v8756_v4 = vpop.eup %8755  ;;  %8769 = vpow2.f32 %v8322_v27  ;;  %v11315_v16 = vadd.f32 %v11648_v31, %v7073_v33  ;;  %v7074_v54 = vadd.f32 %v7050_v59, %v6908_v12  ;;  %v6892_v41 = vpop.f32.mrf.mxu1 }
 0x966   : > { %v7054_v32 = vpop.f32.mrf.mxu0  ;;  %8771 = vrcp.f32 %v7192_v45  ;;  %v7193_v26 = vadd.f32 1.0, %v8756_v4  ;;  %v6911_v37 = vadd.f32 %v6892_v41, %v6745_v48 }
 0x967   : > { %v7075_v62 = vadd.f32 %v7054_v32, %v6909_v23  ;;  %8773 = vpow2.f32 %v8323_v15  ;;  %v8324_v11 = vmul.f32 -1.442695, %v11315_v16  ;;  %v11320_v60 = vadd.f32 %v11648_v31, %v7074_v54  ;;  %v8758_v21 = vpop.eup %8757  ;;  %v6894_v2 = vpop.f32.mrf.mxu1 }
 0x968   : > { %v7056_v5 = vpop.f32.mrf.mxu0  ;;  %8775 = vrcp.f32 %v7193_v26  ;;  %v7194_v3 = vadd.f32 1.0, %v8758_v21  ;;  %v6912_v55 = vadd.f32 %v6894_v2, %v6746_v36 }
 0x969   : > { %v11323_v7 = vadd.f32 %v11650_v8, %v7075_v62  ;;  %v7076_v50 = vadd.f32 %v7056_v5, %v6910_v35  ;;  %v8760_v58 = vpop.eup %8759  ;;  %8777 = vpow2.f32 %v8324_v11  ;;  %v8325_v0 = vmul.f32 -1.442695, %v11320_v60 }
 0x96a   : > { %v7058_v57 = vpop.f32.mrf.mxu0  ;;  %v7195_v28 = vadd.f32 1.0, %v8760_v58  ;;  %8779 = vrcp.f32 %v7194_v3 }
 0x96b   : > { %v11328_v20 = vadd.f32 %v11650_v8, %v7076_v50  ;;  %v7077_v19 = vadd.f32 %v7058_v57, %v6911_v37  ;;  %v8762_v40 = vpop.eup %8761  ;;  %v8326_v24 = vmul.f32 -1.442695, %v11323_v7 }
 0x96c   : > { %v7060_v14 = vpop.f32.mrf.mxu0  ;;  %8781 = vrcp.f32 %v7195_v28  ;;  %v7196_v29 = vadd.f32 1.0, %v8762_v40 }
 0x96d   : > { %v11332_v18 = vadd.f32 %v11652_v17, %v7077_v19  ;;  %v8764_v51 = vpop.eup %8763  ;;  %8783 = vpow2.f32 %v8325_v0  ;;  %v8327_v42 = vmul.f32 -1.442695, %v11328_v20  ;;  %v7078_v38 = vadd.f32 %v7060_v14, %v6912_v55 }
 0x96e   : > { %8785 = vrcp.f32 %v7196_v29  ;;  %v7197_v61 = vadd.f32 1.0, %v8764_v51 }
 0x96f   : > { %v8328_v46 = vmul.f32 -1.442695, %v11332_v18  ;;  %8787 = vpow2.f32 %v8326_v24  ;;  %v11337_v27 = vadd.f32 %v11652_v17, %v7078_v38  ;;  %v8766_v9 = vpop.eup %8765 }
 0x970   : > { %8789 = vrcp.f32 %v7197_v61  ;;  %v7198_v47 = vadd.f32 1.0, %v8766_v9 }
 0x971   : > { %v8768_v63 = vpop.eup %8767  ;;  %8791 = vpow2.f32 %v8327_v42  ;;  %v8329_v12 = vmul.f32 -1.442695, %v11337_v27 }
 0x972   : > { %v8770_v33 = vpop.eup %8769  ;;  %8793 = vpow2.f32 %v8328_v46  ;;  %v7239_v4 = vmul.f32 %v8768_v63, %v11243_v56 }
 0x973   : > { %v8772_v22 = vpop.eup %8771  ;;  %8795 = vrcp.f32 %v7198_v47  ;;  %v7199_v59 = vadd.f32 1.0, %v8770_v33 }
 0x974   : > { %v8774_v45 = vpop.eup %8773  ;;  %8797 = vpow2.f32 %v8329_v12  ;;  %v7240_v26 = vmul.f32 %v8772_v22, %v11247_v1 }
 0x975   : > { %v8776_v15 = vpop.eup %8775  ;;  %8799 = vrcp.f32 %v7199_v59  ;;  %v7200_v48 = vadd.f32 1.0, %v8774_v45 }
 0x976   : > { %v8778_v23 = vpop.eup %8777  ;;  %v7241_v34 = vmul.f32 %v8776_v15, %v11253_v53 }
 0x977   : > { %v7201_v31 = vadd.f32 1.0, %v8778_v23  ;;  %v8780_v54 = vpop.eup %8779 }
 0x978   : > { %v7255_v41 = vpack.c.bf16 %v7241_v34, %v7239_v4  ;;  %v7242_v35 = vmul.f32 %v8780_v54, %v11265_v6 }
 0x979   : > { %v8782_v32 = vpop.eup %8781  ;;  %8801 = vrcp.f32 %v7201_v31 }
 0x97a   : > { %v8784_v62 = vpop.eup %8783  ;;  %v7256_v44 = vpack.c.bf16 %v7242_v35, %v7240_v26  ;;  %8803 = vrcp.f32 %v7200_v48  ;;  %v7265_v56 = vunpack.c.h.bf16 %v7255_v41  ;;  %v7263_v21 = vunpack.c.l.bf16 %v7255_v41 }
 0x97b   : > { %v8786_v49 = vpop.eup %8785  ;;  %v7202_v11 = vadd.f32 1.0, %v8784_v62  ;;  %v7243_v58 = vmul.f32 %v8782_v32, %v11268_v39 }
 0x97c   : > { %v8788_v5 = vpop.eup %8787  ;;  %v7266_v8 = vunpack.c.h.bf16 %v7256_v44  ;;  %v7264_v2 = vunpack.c.l.bf16 %v7256_v44  ;;  %v7244_v40 = vmul.f32 %v8786_v49, %v11279_v10 }
 0x97d   : > { %v8790_v53 = vpop.eup %8789  ;;  %8805 = vrcp.f32 %v7202_v11  ;;  %v7203_v37 = vadd.f32 1.0, %v8788_v5 }
 0x97e   : > { %v8792_v50 = vpop.eup %8791  ;;  %v7245_v1 = vmul.f32 %v8790_v53, %v11285_v30  ;;  %v7282_v36 = vadd.f32 %v7266_v8, %v7265_v56  ;;  %v7279_v3 = vadd.f32 %v7264_v2, %v7263_v21 }
 0x97f   : > { %v8794_v6 = vpop.eup %8793  ;;  %v7204_v25 = vadd.f32 1.0, %v8792_v50  ;;  %8807 = vrcp.f32 %v7203_v37 }
 0x980   : > { %v8796_v0 = vpop.eup %8795  ;;  %v7257_v57 = vpack.c.bf16 %v7245_v1, %v7243_v58  ;;  %v7205_v28 = vadd.f32 1.0, %v8794_v6 }
 0x981   : > { %v8798_v19 = vpop.eup %8797  ;;  %v7246_v24 = vmul.f32 %v8796_v0, %v11297_v13  ;;  %8809 = vrcp.f32 %v7204_v25  ;;  %v7313_v0 = vld [vmem:[%s11416_s11 + $0x10] sm:$0xff] }
 0x982   : > { %8811 = vrcp.f32 %v7205_v28  ;;  %v7206_v55 = vadd.f32 1.0, %v8798_v19  ;;  %v8800_v39 = vpop.eup %8799  ;;  %v7269_v30 = vunpack.c.h.bf16 %v7257_v57  ;;  %v7267_v17 = vunpack.c.l.bf16 %v7257_v57  ;;  %v7314_v28 = vld [vmem:[%s11416_s11 + $0x18] sm:$0xff] }
 0x983   : > { %v7258_v14 = vpack.c.bf16 %v7246_v24, %v7244_v40  ;;  %v7247_v38 = vmul.f32 %v8800_v39, %v11301_v43  ;;  %v11653_v57 = vmov 0.0   ;;  %v7318_v24 = vld [vmem:[%s11417_s12 + $0x18] sm:$0xff]  ;;  %v7317_v39 = vld [vmem:[%s11417_s12 + $0x10] sm:$0xff] }
 0x984   : > { %8813 = vrcp.f32 %v7206_v55  ;;  %v7316_v55 = vld [vmem:[%s11417_s12 + $0x8] sm:$0xff] }
 0x985   : > { %v7270_v29 = vunpack.c.h.bf16 %v7258_v14  ;;  %v7268_v51 = vunpack.c.l.bf16 %v7258_v14 }
 0x986   : > { %v8802_v42 = vpop.eup %8801 }
 0x987   : > { %v7249_v61 = vmul.f32 %v8802_v42, %v11315_v16  ;;  %v7288_v46 = vadd.f32 %v7270_v29, %v7269_v30  ;;  %v7285_v9 = vadd.f32 %v7268_v51, %v7267_v17  ;;  %v8804_v10 = vpop.eup %8803  ;;  %v7315_v29 = vld [vmem:[%s11417_s12] sm:$0xff] }
 0x988   : > { %v7248_v47 = vmul.f32 %v8804_v10, %v11309_v52 }
 0x989   : > { %v7259_v63 = vpack.c.bf16 %v7249_v61, %v7247_v38 }
 0x98a   : > { %v8806_v13 = vpop.eup %8805 }
 0x98b   : > { %v7250_v12 = vmul.f32 %v8806_v13, %v11320_v60  ;;  %v7273_v15 = vunpack.c.h.bf16 %v7259_v63  ;;  %v7271_v4 = vunpack.c.l.bf16 %v7259_v63  ;;  %v7420_v63 = vld [vmem:[%s11418_s13] sm:$0xff] }
 0x98c   : > { %v8808_v33 = vpop.eup %8807  ;;  %v7421_v13 = vld [vmem:[%s11419_s14] sm:$0xff] }
 0x98d   : > { %v7260_v22 = vpack.c.bf16 %v7250_v12, %v7248_v47  ;;  %v7251_v43 = vmul.f32 %v8808_v33, %v11323_v7  ;;  %v7311_v7 = vld [vmem:[%s11416_s11] sm:$0xff] }
 0x98e   : > { %v8810_v59 = vpop.eup %8809  ;;  %8373 = vmatprep.mubr.msk.f32.mxu1 %vm4105_vm3, %v7311_v7 }
 0x98f   : > { %v8812_v45 = vpop.eup %8811  ;;  %v7274_v23 = vunpack.c.h.bf16 %v7260_v22  ;;  %v7272_v34 = vunpack.c.l.bf16 %v7260_v22  ;;  %v7252_v41 = vmul.f32 %v8810_v59, %v11328_v20 }
 0x990   : > { %v7253_v16 = vmul.f32 %v8812_v45, %v11332_v18 }
 0x991   : > { %v8814_v48 = vpop.eup %8813  ;;  %v7294_v31 = vadd.f32 %v7274_v23, %v7273_v15  ;;  %v7291_v54 = vadd.f32 %v7272_v34, %v7271_v4 }
 0x992   : > { %v7261_v52 = vpack.c.bf16 %v7253_v16, %v7251_v43  ;;  %v7254_v60 = vmul.f32 %v8814_v48, %v11337_v27 }
 0x994   : > { %v7262_v32 = vpack.c.bf16 %v7254_v60, %v7252_v41  ;;  %v7277_v26 = vunpack.c.h.bf16 %v7261_v52  ;;  %v7275_v62 = vunpack.c.l.bf16 %v7261_v52 }
 0x996   : > { %v7278_v35 = vunpack.c.h.bf16 %v7262_v32  ;;  %v7276_v49 = vunpack.c.l.bf16 %v7262_v32 }
 0x998   : > { %v7300_v44 = vadd.f32 %v7278_v35, %v7277_v26  ;;  %v7297_v11 = vadd.f32 %v7276_v49, %v7275_v62 }
 0x99a   : > { %7301 = vadd.xlane.f32.xlu1 %v7300_v44  ;;  %7298 = vadd.xlane.f32.xlu0 %v7297_v11 }
 0x99e   : > { %7295 = vadd.xlane.f32.xlu0 %v7294_v31  ;;  %7292 = vadd.xlane.f32.xlu1 %v7291_v54 }
 0x9a2   : > { %7289 = vadd.xlane.f32.xlu0 %v7288_v46  ;;  %7286 = vadd.xlane.f32.xlu1 %v7285_v9 }
 0x9a6   : > { %7283 = vadd.xlane.f32.xlu0 %v7282_v36  ;;  %7280 = vadd.xlane.f32.xlu1 %v7279_v3  ;;  %v7312_v3 = vld [vmem:[%s11416_s11 + $0x8] sm:$0xff] }
 0xa23   : > { %v7299_v20 = vpop.xlane.xlu0 %7298  ;;  %v7302_v18 = vpop.xlane.xlu1 %7301 }
 0xa24   : > { %v7310_v27 = vmul.f32 0.00390625, %v7302_v18  ;;  %v7309_v5 = vmul.f32 0.00390625, %v7299_v20 }
 0xa26   : > { %8357 = vmatprep.subr.mxu1 %v7310_v27 }
 0xa27   : > { %v7296_v56 = vpop.xlane.xlu0 %7295  ;;  %8358 = vmatpush3.msra.mxu1 %v7310_v27  ;;  %v7293_v21 = vpop.xlane.xlu1 %7292 }
 0xa28   : > { %v7308_v53 = vmul.f32 0.00390625, %v7296_v56  ;;  %8359 = vmatprep.subr.mxu1 %v7309_v5  ;;  %v7307_v37 = vmul.f32 0.00390625, %v7293_v21 }
 0xa29   : > { %8360 = vmatpush3.msra.mxu1 %v7309_v5 }
 0xa2a   : > { %8361 = vmatprep.subr.mxu1 %v7308_v53 }
 0xa2b   : > { %v7290_v8 = vpop.xlane.xlu0 %7289  ;;  %8362 = vmatpush3.msra.mxu1 %v7308_v53  ;;  %v7287_v2 = vpop.xlane.xlu1 %7286 }
 0xa2c   : > { %v7306_v50 = vmul.f32 0.00390625, %v7290_v8  ;;  %8363 = vmatprep.subr.mxu1 %v7307_v37  ;;  %v7305_v58 = vmul.f32 0.00390625, %v7287_v2 }
 0xa2d   : > { %8364 = vmatpush3.msra.mxu1 %v7307_v37 }
 0xa2e   : > { %8365 = vmatprep.subr.mxu1 %v7306_v50 }
 0xa2f   : > { %v7284_v1 = vpop.xlane.xlu0 %7283  ;;  %8366 = vmatpush3.msra.mxu1 %v7306_v50  ;;  %v7281_v6 = vpop.xlane.xlu1 %7280 }
 0xa30   : > { %v7304_v25 = vmul.f32 0.00390625, %v7284_v1  ;;  %8367 = vmatprep.subr.mxu1 %v7305_v58  ;;  %v7303_v36 = vmul.f32 0.00390625, %v7281_v6 }
 0xa31   : > { %8368 = vmatpush3.msra.mxu1 %v7305_v58 }
 0xa32   : > { %8369 = vmatprep.subr.mxu1 %v7304_v25 }
 0xa33   : > { %8370 = vmatpush3.msra.mxu1 %v7304_v25 }
 0xa34   : > { %8371 = vmatprep.subr.mxu1 %v7303_v36 }
 0xa35   : > { %8372 = vmatpush3.msra.mxu1 %v7303_v36 }
 0xa36   : > { %8374 = vmatmul.mubr.msk.f32.vlgmr.msra.gmra.mxu1 %vm4105_vm3, %v7312_v3  ;;  %8379 = vmatprep.subr.mxu1 %v11653_v57 }
 0xa37   : > { %8376 = vmatprep.mubr.msk.f32.mxu1 %vm4105_vm3, %v7313_v0 }
 0xa3a   : > { %8377 = vmatmul.mubr.msk.f32.gmra.mxu1 %vm4105_vm3, %v7314_v28 }
 0xa3b   : > { %8387 = vmatprep.mubr.msk.f32.mxu1 %vm8833_vm4, %v11653_v57 }
 0xaf6   : > { %v8375_v19 = vpop.f32.mrf.mxu1 }
 0xaf7   : > { %v7403_v51 = vadd.f32 %v8375_v19, %v7316_v55 }
 0xaf8   : > { %v7397_v40 = vpop.f32.mrf.mxu1 }
 0xaf9   : > { %v7398_v61 = vadd.f32 %v7397_v40, %v7315_v29  ;;  %v7417_v9 = vmax.f32 %v7403_v51, 0.0 }
 0xafa   : > { %v8378_v14 = vpop.f32.mrf.mxu1 }
 0xafb   : > { %v7413_v30 = vadd.f32 %v8378_v14, %v7318_v24  ;;  %v7416_v10 = vmax.f32 %v7398_v61, 0.0 }
 0xafc   : > { %v7407_v17 = vpop.f32.mrf.mxu1 }
 0xafd   : > { %v7419_v42 = vmax.f32 %v7413_v30, 0.0  ;;  %v7408_v38 = vadd.f32 %v7407_v17, %v7317_v39 }
 0xaff   : > { %v7418_v46 = vmax.f32 %v7408_v38, 0.0  ;;  %8380 = vmatpush3.msra.mxu1 %v7419_v42 }
 0xb00   : > { %8381 = vmatprep.subr.mxu1 %v11653_v57 }
 0xb01   : > { %8382 = vmatpush3.msra.mxu1 %v7418_v46 }
 0xb02   : > { %8383 = vmatprep.subr.mxu1 %v11653_v57 }
 0xb03   : > { %8384 = vmatpush3.msra.mxu1 %v7417_v9 }
 0xb04   : > { %8385 = vmatprep.subr.mxu1 %v11653_v57 }
 0xb05   : > { %8386 = vmatpush3.msra.mxu1 %v7416_v10 }
 0xb06   : > { %8388 = vmatmul.mubr.msk.f32.vlgmr.msra.gmra.mxu1 %vm1572_vm15, %v7420_v63 }
 0xbc6   : > { %v7491_v47 = vpop.f32.mrf.mxu1 }
 0xbc7   : > { %v7492_v12 = vadd.f32 %v7491_v47, %v7421_v13 }
 0xbc8   : > { %v8389_v33 = vpop.f32.mrf.mxu1 }
 0xbc9   : > { %7495 = vst.msk [vmem:[%s492_s1] sm:$0xff] %vm845_vm9, %v7492_v12 }
 0xbca PF: > { %s25_s18 = sadd.s32 1, %s8821_s18  }
 0xbcb   : > { %p22_p4 = scmp.ge.s32.totalorder %s25_s18, 4  }
 0xbcd   :  { %24 = sbr.rel (!%p22_p4) target bundleno = 4 (0x4), region = 150 }

</bundles_post_ra>
